<compile_context>
chip_gen: v5e
topology: v5e:2x2
jax: 0.10.0
libtpu: 0.0.40
codegen_flags: <defaults>
</compile_context>

<pallas_src>
import jax
import jax.numpy as jnp
from jax import lax
from jax.experimental import pallas as pl
from jax.experimental.pallas import tpu as pltpu


def xclip_head_kernel(patches_ref, w_patch_ref, tok_ref, mask_ref,
                      w_vis_ref, w_txt_ref, scale_ref, out_ref):
    # ---- vision surrogate: pool first (linear embed => exact), then one 2D matmul ----
    pooled = jnp.mean(patches_ref[...].astype(jnp.float32), axis=1)     # [N_img, patch_dim] f32
    img_feats = jnp.dot(pooled.astype(jnp.bfloat16), w_patch_ref[...],
                        preferred_element_type=jnp.float32)             # [N_img, 768] f32

    # ---- text surrogate: masked mean pool of token embeddings (f32 elementwise) ----
    mask = mask_ref[...]                                                # [N_txt, S] f32
    tok = tok_ref[...].astype(jnp.float32)                              # [N_txt, S, 512]
    denom = jnp.maximum(jnp.sum(mask, axis=-1, keepdims=True), 1.0)     # [N_txt, 1]
    txt_sum = jnp.sum(tok * mask[..., None], axis=1)                    # [N_txt, 512]
    txt_feats = txt_sum * pl.reciprocal(denom, approx=True)             # EUP reciprocal

    # ---- head: matches base_Model.forward exactly from here on ----
    img_emb = jnp.dot(img_feats.astype(jnp.bfloat16), w_vis_ref[...],
                      preferred_element_type=jnp.float32)               # visual_fc (no bias)
    txt_emb = jnp.dot(txt_feats.astype(jnp.bfloat16), w_txt_ref[...],
                      preferred_element_type=jnp.float32)               # text_fc (no bias)
    img_emb = img_emb * lax.rsqrt(jnp.sum(img_emb * img_emb, axis=-1, keepdims=True))
    txt_emb = txt_emb * lax.rsqrt(jnp.sum(txt_emb * txt_emb, axis=-1, keepdims=True))

    # (txt @ img.T).T == img contracted with txt on the feature dim; scaling commutes
    # with transpose, so compute the [N_img, N_txt] result directly (no XLU transposes).
    # NOTE: reproduces the original PyTorch code, which computes logit_scale.exp()
    # but then multiplies by the RAW self.logit_scale parameter.
    logits = lax.dot_general(img_emb, txt_emb,
                             dimension_numbers=(((1,), (1,)), ((), ())),
                             preferred_element_type=jnp.float32)        # [N_img, N_txt]
    out_ref[...] = logits * scale_ref[0]


def init_params(key, *, patch_size, num_channels, vision_hidden=768,
                embed_dim=512, vocab_size=64):
    ks = jax.random.split(key, 4)
    patch_dim = num_channels * patch_size * patch_size
    return {
        "patch_size": patch_size,
        # surrogate vision patch embedding
        "w_patch": jax.random.normal(ks[0], (patch_dim, vision_hidden),
                                     jnp.float32) * 0.02,
        # surrogate text token embedding table
        "token_embed": jax.random.normal(ks[1], (vocab_size, embed_dim),
                                         jnp.float32) * 0.02,
        # visual_fc: nn.Linear(768, 512, bias=False)  (stored as [in, out])
        "w_visual": jax.random.normal(ks[2], (vision_hidden, embed_dim),
                                      jnp.float32) * 0.02,
        # text_fc: nn.Linear(512, 512, bias=False)
        "w_text": jax.random.normal(ks[3], (embed_dim, embed_dim),
                                    jnp.float32) * 0.02,
        # nn.Parameter(torch.ones([]) * 2.6592)
        "logit_scale": jnp.array([2.6592], jnp.float32),
    }


def xclip_forward(text_input, pixel_values, params):
    B, F, C, H, W = pixel_values.shape
    pixel_flat = pixel_values.reshape(-1, C, H, W)     # same reshape as PyTorch
    n_img = B * F
    P = params["patch_size"]
    ph, pw = H // P, W // P
    num_patches = ph * pw
    patch_dim = C * P * P

    # glue: patchify NCHW frames -> [N_img, num_patches, C*P*P]
    patches = pixel_flat.reshape(n_img, C, ph, P, pw, P)
    patches = patches.transpose(0, 2, 4, 1, 3, 5).reshape(n_img, num_patches, patch_dim)

    # glue: token embedding lookup + mask cast
    input_ids = text_input["input_ids"]
    attention_mask = text_input["attention_mask"]
    tok_emb = jnp.take(params["token_embed"], input_ids, axis=0)   # [N_txt, S, 512]
    mask = attention_mask.astype(jnp.float32)                      # [N_txt, S]

    n_txt, s = input_ids.shape
    vh = params["w_visual"].shape[0]
    ed = params["w_visual"].shape[1]

    # bf16 matmul operands (halves HBM->VMEM traffic); f32 accumulation in-kernel.
    patches_bf = patches.astype(jnp.bfloat16)
    tok_bf = tok_emb.astype(jnp.bfloat16)
    w_patch_bf = params["w_patch"].astype(jnp.bfloat16)
    w_vis_bf = params["w_visual"].astype(jnp.bfloat16)
    w_txt_bf = params["w_text"].astype(jnp.bfloat16)

    logits = pl.pallas_call(
        xclip_head_kernel,
        out_shape=jax.ShapeDtypeStruct((n_img, n_txt), jnp.float32),
        grid=(1,),
        in_specs=[
            pl.BlockSpec((n_img, num_patches, patch_dim), lambda i: (0, 0, 0)),
            pl.BlockSpec((patch_dim, vh), lambda i: (0, 0)),
            pl.BlockSpec((n_txt, s, ed), lambda i: (0, 0, 0)),
            pl.BlockSpec((n_txt, s), lambda i: (0, 0)),
            pl.BlockSpec((vh, ed), lambda i: (0, 0)),
            pl.BlockSpec((ed, ed), lambda i: (0, 0)),
            pl.BlockSpec(memory_space=pltpu.SMEM),
        ],
        out_specs=pl.BlockSpec((n_img, n_txt), lambda i: (0, 0)),
        compiler_params=pltpu.CompilerParams(
            dimension_semantics=("arbitrary",)),
    )(patches_bf, w_patch_bf, tok_bf, mask,
      w_vis_bf, w_txt_bf, params["logit_scale"])

    # same return structure as the PyTorch module:
    # (text_input, reshaped pixel_values, logits_per_text [N_img, N_txt])
    return text_input, pixel_flat, logits


if __name__ == "__main__":
    key = jax.random.PRNGKey(0)
    k_pix, k_ids, k_params = jax.random.split(key, 3)

    # small shapes: batch=2, frames=4, channels=3, spatial=16, patch=8,
    # 8 text prompts of length 8, vocab 64
    B, F, C, H, W = 2, 4, 3, 16, 16
    N_TXT, S, VOCAB = 8, 8, 64

    pixel_values = jax.random.normal(k_pix, (B, F, C, H, W), jnp.float32)
    input_ids = jax.random.randint(k_ids, (N_TXT, S), 0, VOCAB, dtype=jnp.int32)
    attention_mask = jnp.ones((N_TXT, S), jnp.int32)
    text_input = {"input_ids": input_ids, "attention_mask": attention_mask}

    params = init_params(k_params, patch_size=8, num_channels=C, vocab_size=VOCAB)

    _, pix_out, logits_per_text = xclip_forward(text_input, pixel_values, params)
    jax.block_until_ready(logits_per_text)

    assert logits_per_text.shape == (B * F, N_TXT)
    assert pix_out.shape == (B * F, C, H, W)
    print("KERNEL_OK")
</pallas_src>

<mosaic_0001>
module attributes {stable_mosaic.version = 11 : i64} {
  func.func @xclip_head_kernel(%arg0: i32, %arg1: memref<8x4x192xbf16, #tpu.memory_space<vmem>>, %arg2: memref<192x768xbf16, #tpu.memory_space<vmem>>, %arg3: memref<8x8x512xbf16, #tpu.memory_space<vmem>>, %arg4: memref<8x8xf32, #tpu.memory_space<vmem>>, %arg5: memref<768x512xbf16, #tpu.memory_space<vmem>>, %arg6: memref<512x512xbf16, #tpu.memory_space<vmem>>, %arg7: memref<1xf32, #tpu.memory_space<smem>>, %arg8: memref<8x8xf32, #tpu.memory_space<vmem>>) attributes {dimension_semantics = [#tpu.dimension_semantics<arbitrary>], iteration_bounds = array<i64: 1>, scalar_prefetch = 0 : i64, scratch_operands = 0 : i64, tpu.core_type = #tpu.core_type<tc>, window_params = [{pipeline_mode = #tpu.pipeline_mode<synchronous>, transform_indices = @transform_0, window_bounds = array<i64: 8, 4, 192>}, {pipeline_mode = #tpu.pipeline_mode<synchronous>, transform_indices = @transform_1, window_bounds = array<i64: 192, 768>}, {pipeline_mode = #tpu.pipeline_mode<synchronous>, transform_indices = @transform_2, window_bounds = array<i64: 8, 8, 512>}, {pipeline_mode = #tpu.pipeline_mode<synchronous>, transform_indices = @transform_3, window_bounds = array<i64: 8, 8>}, {pipeline_mode = #tpu.pipeline_mode<synchronous>, transform_indices = @transform_4, window_bounds = array<i64: 768, 512>}, {pipeline_mode = #tpu.pipeline_mode<synchronous>, transform_indices = @transform_5, window_bounds = array<i64: 512, 512>}, {transform_indices = @transform_6, window_bounds = array<i64: 1>}, {pipeline_mode = #tpu.pipeline_mode<synchronous>, transform_indices = @transform_7, window_bounds = array<i64: 8, 8>}]} {
    %c0 = arith.constant 0 : index
    %c0_0 = arith.constant 0 : index
    %c0_1 = arith.constant 0 : index
    %0 = vector.load %arg1[%c0, %c0_0, %c0_1] : memref<8x4x192xbf16, #tpu.memory_space<vmem>>, vector<8x4x192xbf16>
    %1 = arith.extf %0 : vector<8x4x192xbf16> to vector<8x4x192xf32>
    %cst = arith.constant dense<0.000000e+00> : vector<8x192xf32>
    %2 = vector.multi_reduction <add>, %1, %cst [1] : vector<8x4x192xf32> to vector<8x192xf32>
    %cst_2 = arith.constant 4.000000e+00 : f32
    %3 = vector.broadcast %cst_2 : f32 to vector<8x192xf32>
    %4 = arith.divf %2, %3 : vector<8x192xf32>
    %5 = arith.truncf %4 : vector<8x192xf32> to vector<8x192xbf16>
    %c0_3 = arith.constant 0 : index
    %c0_4 = arith.constant 0 : index
    %6 = vector.load %arg2[%c0_3, %c0_4] : memref<192x768xbf16, #tpu.memory_space<vmem>>, vector<192x768xbf16>
    %cst_5 = arith.constant dense<0.000000e+00> : vector<8x768xf32>
    %7 = tpu.matmul %5, %6, %cst_5 {dimension_numbers = #tpu.dot_dimension_numbers<[1], [0], [0], [1], [0, 0, 1, 1], [], []>} : vector<8x192xbf16>, vector<192x768xbf16>, vector<8x768xf32> -> vector<8x768xf32>
    %c0_6 = arith.constant 0 : index
    %c0_7 = arith.constant 0 : index
    %8 = vector.load %arg4[%c0_6, %c0_7] : memref<8x8xf32, #tpu.memory_space<vmem>>, vector<8x8xf32>
    %c0_8 = arith.constant 0 : index
    %c0_9 = arith.constant 0 : index
    %c0_10 = arith.constant 0 : index
    %9 = vector.load %arg3[%c0_8, %c0_9, %c0_10] : memref<8x8x512xbf16, #tpu.memory_space<vmem>>, vector<8x8x512xbf16>
    %10 = arith.extf %9 : vector<8x8x512xbf16> to vector<8x8x512xf32>
    %cst_11 = arith.constant dense<0.000000e+00> : vector<8xf32>
    %11 = vector.multi_reduction <add>, %8, %cst_11 [1] : vector<8x8xf32> to vector<8xf32>
    %12 = vector.shape_cast %11 : vector<8xf32> to vector<8x1xf32>
    %cst_12 = arith.constant 1.000000e+00 : f32
    %13 = vector.broadcast %cst_12 : f32 to vector<8x1xf32>
    %14 = arith.maximumf %12, %13 : vector<8x1xf32>
    %15 = vector.shape_cast %8 : vector<8x8xf32> to vector<8x8x1xf32>
    %16 = vector.broadcast %15 : vector<8x8x1xf32> to vector<8x8x512xf32>
    %17 = arith.mulf %10, %16 : vector<8x8x512xf32>
    %cst_13 = arith.constant dense<0.000000e+00> : vector<8x512xf32>
    %18 = vector.multi_reduction <add>, %17, %cst_13 [1] : vector<8x8x512xf32> to vector<8x512xf32>
    %19 = tpu.reciprocal %14 {approx = true} : vector<8x1xf32> -> vector<8x1xf32>
    %20 = vector.broadcast %19 : vector<8x1xf32> to vector<8x512xf32>
    %21 = arith.mulf %18, %20 : vector<8x512xf32>
    %22 = arith.truncf %7 : vector<8x768xf32> to vector<8x768xbf16>
    %c0_14 = arith.constant 0 : index
    %c0_15 = arith.constant 0 : index
    %23 = vector.load %arg5[%c0_14, %c0_15] : memref<768x512xbf16, #tpu.memory_space<vmem>>, vector<768x512xbf16>
    %cst_16 = arith.constant dense<0.000000e+00> : vector<8x512xf32>
    %24 = tpu.matmul %22, %23, %cst_16 {dimension_numbers = #tpu.dot_dimension_numbers<[1], [0], [0], [1], [0, 0, 1, 1], [], []>} : vector<8x768xbf16>, vector<768x512xbf16>, vector<8x512xf32> -> vector<8x512xf32>
    %25 = arith.truncf %21 : vector<8x512xf32> to vector<8x512xbf16>
    %c0_17 = arith.constant 0 : index
    %c0_18 = arith.constant 0 : index
    %26 = vector.load %arg6[%c0_17, %c0_18] : memref<512x512xbf16, #tpu.memory_space<vmem>>, vector<512x512xbf16>
    %cst_19 = arith.constant dense<0.000000e+00> : vector<8x512xf32>
    %27 = tpu.matmul %25, %26, %cst_19 {dimension_numbers = #tpu.dot_dimension_numbers<[1], [0], [0], [1], [0, 0, 1, 1], [], []>} : vector<8x512xbf16>, vector<512x512xbf16>, vector<8x512xf32> -> vector<8x512xf32>
    %28 = arith.mulf %24, %24 : vector<8x512xf32>
    %cst_20 = arith.constant dense<0.000000e+00> : vector<8xf32>
    %29 = vector.multi_reduction <add>, %28, %cst_20 [1] : vector<8x512xf32> to vector<8xf32>
    %30 = vector.shape_cast %29 : vector<8xf32> to vector<8x1xf32>
    %31 = math.rsqrt %30 : vector<8x1xf32>
    %32 = vector.broadcast %31 : vector<8x1xf32> to vector<8x512xf32>
    %33 = arith.mulf %24, %32 : vector<8x512xf32>
    %34 = arith.mulf %27, %27 : vector<8x512xf32>
    %cst_21 = arith.constant dense<0.000000e+00> : vector<8xf32>
    %35 = vector.multi_reduction <add>, %34, %cst_21 [1] : vector<8x512xf32> to vector<8xf32>
    %36 = vector.shape_cast %35 : vector<8xf32> to vector<8x1xf32>
    %37 = math.rsqrt %36 : vector<8x1xf32>
    %38 = vector.broadcast %37 : vector<8x1xf32> to vector<8x512xf32>
    %39 = arith.mulf %27, %38 : vector<8x512xf32>
    %cst_22 = arith.constant dense<0.000000e+00> : vector<8x8xf32>
    %40 = tpu.matmul %33, %39, %cst_22 {dimension_numbers = #tpu.dot_dimension_numbers<[1], [1], [0], [0], [0, 0, 1, 0], [], []>} : vector<8x512xf32>, vector<8x512xf32>, vector<8x8xf32> -> vector<8x8xf32>
    %c0_23 = arith.constant 0 : index
    %41 = memref.load %arg7[%c0_23] : memref<1xf32, #tpu.memory_space<smem>>
    %42 = vector.broadcast %41 : f32 to vector<8x8xf32>
    %43 = arith.mulf %40, %42 : vector<8x8xf32>
    %c0_24 = arith.constant 0 : index
    %c0_25 = arith.constant 0 : index
    %44 = vector.load %arg8[%c0_24, %c0_25] : memref<8x8xf32, #tpu.memory_space<vmem>>, vector<8x8xf32>
    tpu.vector_store %arg8[%c0_24, %c0_25], %43 {strides = array<i32>} : memref<8x8xf32, #tpu.memory_space<vmem>>, vector<8x8xf32>,
    return
  }
  func.func @transform_0(%arg0: i32) -> (i32, i32, i32) {
    %c0_i32 = arith.constant 0 : i32
    %c0_i32_0 = arith.constant 0 : i32
    %c0_i32_1 = arith.constant 0 : i32
    %c0_i32_2 = arith.constant 0 : i32
    return %c0_i32, %c0_i32_0, %c0_i32_1 : i32, i32, i32
  }
  func.func @transform_1(%arg0: i32) -> (i32, i32) {
    %c0_i32 = arith.constant 0 : i32
    %c0_i32_0 = arith.constant 0 : i32
    %c0_i32_1 = arith.constant 0 : i32
    return %c0_i32, %c0_i32_0 : i32, i32
  }
  func.func @transform_2(%arg0: i32) -> (i32, i32, i32) {
    %c0_i32 = arith.constant 0 : i32
    %c0_i32_0 = arith.constant 0 : i32
    %c0_i32_1 = arith.constant 0 : i32
    %c0_i32_2 = arith.constant 0 : i32
    return %c0_i32, %c0_i32_0, %c0_i32_1 : i32, i32, i32
  }
  func.func @transform_3(%arg0: i32) -> (i32, i32) {
    %c0_i32 = arith.constant 0 : i32
    %c0_i32_0 = arith.constant 0 : i32
    %c0_i32_1 = arith.constant 0 : i32
    return %c0_i32, %c0_i32_0 : i32, i32
  }
  func.func @transform_4(%arg0: i32) -> (i32, i32) {
    %c0_i32 = arith.constant 0 : i32
    %c0_i32_0 = arith.constant 0 : i32
    %c0_i32_1 = arith.constant 0 : i32
    return %c0_i32, %c0_i32_0 : i32, i32
  }
  func.func @transform_5(%arg0: i32) -> (i32, i32) {
    %c0_i32 = arith.constant 0 : i32
    %c0_i32_0 = arith.constant 0 : i32
    %c0_i32_1 = arith.constant 0 : i32
    return %c0_i32, %c0_i32_0 : i32, i32
  }
  func.func @transform_6(%arg0: i32) -> i32 {
    %c0_i32 = arith.constant 0 : i32
    %c0_i32_0 = arith.constant 0 : i32
    return %c0_i32 : i32
  }
  func.func @transform_7(%arg0: i32) -> (i32, i32) {
    %c0_i32 = arith.constant 0 : i32
    %c0_i32_0 = arith.constant 0 : i32
    %c0_i32_1 = arith.constant 0 : i32
    return %c0_i32, %c0_i32_0 : i32, i32
  }
}

</mosaic_0001>

<bundles_post_ra>
// kernel: tpu_custom_call.1
= control target key start
LH: loop header
LB: loop body
LE: loop exit
PB: predicated region body
PF: predicated region fallthrough
CT: control target
= control target key end

     0   :  { %13 = vsyncpa [#allocation4], 0  ;;  %s7487_s0 = inlined_call_operand.hbm [shape: bf16[8,4,192], index: 0, kind: input, shape index: {}]   ;;  %s7488_s1 = inlined_call_operand.hbm [shape: bf16[192,768], index: 1, kind: input, shape index: {}]   ;;  %s7489_s2 = inlined_call_operand.hbm [shape: bf16[8,8,512], index: 2, kind: input, shape index: {}]   ;;  %s7490_s3 = inlined_call_operand.hbm [shape: f32[8,8], index: 3, kind: input, shape index: {}]   ;;  %s7491_s4 = inlined_call_operand.hbm [shape: bf16[768,512], index: 4, kind: input, shape index: {}]   ;;  %s7492_s5 = inlined_call_operand.hbm [shape: bf16[512,512], index: 5, kind: input, shape index: {}]   ;;  %s7493_s6 = inlined_call_operand.<no memory space> [shape: f32[1], index: 6, kind: input, shape index: {}]   ;;  %s7494_s7 = inlined_call_operand.hbm [shape: f32[8,8], index: 7, kind: output, shape index: {}]  }
   0x1   :  { %14 = vsyncpa [#allocation7], 0 }
   0x2   :  { %15 = vsyncpa [#allocation10], 0 }
   0x3   :  { %16 = vsyncpa [#allocation13], 0  ;;  %s35_s26 = sshll.u32 %s7488_s1, 4  ;;  %s36_s26 = int_to_ptr.hbm [resolvable:$true] %s35_s26 }
   0x4   :  { %17 = vsyncpa [#allocation5], 0  ;;  %s6316_s27 = smov [#allocation6]   ;;  %s62_s8 = sshll.u32 %s7490_s3, 4  ;;  %s63_s8 = int_to_ptr.hbm [resolvable:$true] %s62_s8 }
   0x5   :  { %s37_s28 = sshll.u32 %s6316_s27, 4  ;;  %s6317_s9 = smov 384   ;;  %s38_s28 = int_to_ptr.vmem [resolvable:$true] %s37_s28 }
   0x6   :  { %s6318_s10 = smov 24   ;;  %s6319_s11 = smov [#allocation9]  }
   0x7   :  { %43 = dma.hbm_to_vmem [thread:$0]  %s36_s26, 9216, %s38_s28, [#allocation7], %s6317_s9, %s6317_s9, %s6318_s10  }
   0x8   :  { %s64_s12 = sshll.u32 %s6319_s11, 4  ;;  %s22_s15 = sshll.u32 %s7487_s0, 4  ;;  %s65_s12 = int_to_ptr.vmem [resolvable:$true] %s64_s12  ;;  %s23_s15 = int_to_ptr.hbm [resolvable:$true] %s22_s15 }
   0x9   :  { %67 = dma.hbm_to_vmem [thread:$0]  %s63_s8, 128, %s65_s12, [#allocation10]  }
   0xa   :  { %s6320_s1 = smov [#allocation3]   ;;  %s48_s3 = sshll.u32 %s7489_s2, 4  ;;  %s49_s3 = int_to_ptr.hbm [resolvable:$true] %s48_s3 }
   0xb   :  { %s24_s16 = sshll.u32 %s6320_s1, 4  ;;  %s6321_s19 = smov 64   ;;  %s25_s16 = int_to_ptr.vmem [resolvable:$true] %s24_s16 }
   0xc   :  { %s6322_s20 = smov 4   ;;  %s6323_s21 = smov [#allocation8]  }
   0xd   :  { %30 = dma.hbm_to_vmem [thread:$0]  %s23_s15, 512, %s25_s16, [#allocation4], %s6321_s19, %s6321_s19, %s6322_s20  }
   0xe   :  { %s50_s22 = sshll.u32 %s6323_s21, 4  ;;  %s6324_s23 = smov 256   ;;  %s51_s22 = int_to_ptr.vmem [resolvable:$true] %s50_s22 }
   0xf   :  { %s6325_s24 = smov 16   ;;  %s72_s26 = sshll.u32 %s7491_s4, 4  ;;  %s73_s26 = int_to_ptr.hbm [resolvable:$true] %s72_s26 }
  0x10   :  { %56 = dma.hbm_to_vmem [thread:$0]  %s49_s3, 2048, %s51_s22, [#allocation7], %s6324_s23, %s6324_s23, %s6325_s24  }
  0x11   :  { %s6326_s27 = smov [#allocation11]   ;;  %s85_s30 = sshll.u32 %s7492_s5, 4  ;;  %s86_s30 = int_to_ptr.hbm [resolvable:$true] %s85_s30 }
  0x12   :  { %s74_s28 = sshll.u32 %s6326_s27, 4  ;;  %s6327_s8 = smov [#allocation12]   ;;  %s75_s28 = int_to_ptr.vmem [resolvable:$true] %s74_s28 }
  0x13   :  { %80 = dma.hbm_to_vmem [thread:$0]  %s73_s26, 24576, %s75_s28, [#allocation10], %s6324_s23, %s6324_s23, %s6325_s24  }
  0x14   :  { %s87_s9 = sshll.u32 %s6327_s8, 4  ;;  %s88_s9 = int_to_ptr.vmem [resolvable:$true] %s87_s9 }
  0x15   :  { %93 = dma.hbm_to_vmem [thread:$0]  %s86_s30, 16384, %s88_s9, [#allocation13], %s6324_s23, %s6324_s23, %s6325_s24  }
  0x16   :  { %6306 = dma.done.wait [#allocation4], 512  }
  0x17   :  { %6307 = vsyncadd [#allocation4], 4294966784 }
  0x18   :  { %6308 = dma.done.wait [#allocation7], 11264  }
  0x19   :  { %6309 = vsyncadd [#allocation7], 4294956032 }
  0x1a   :  { %6310 = dma.done.wait [#allocation10], 24704  }
  0x1b   :  { %6311 = vsyncadd [#allocation10], 4294942592 }
  0x1c   :  { %6312 = dma.done.wait [#allocation13], 16384  }
  0x1d   :  { %6313 = vsyncadd [#allocation13], 4294950912  ;;  %v4298_v0 = vld [vmem:[#allocation6 + $0x150] sm:$0xf]  ;;  %v5747_v1 = vld [vmem:[#allocation6 + $0x164] sm:$0xf0] }
  0x1e   :  { %v5744_v2 = vld [vmem:[#allocation6 + $0x154] sm:$0xf]  ;;  %v4299_v3 = vor.u32 %v5747_v1, %v4298_v0  ;;  %v4300_v4 = vld [vmem:[#allocation6 + $0x168] sm:$0xf0]  ;;  %v4274_v5 = vld [vmem:[#allocation6 + $0x120] sm:$0xf] }
  0x1f   :  { %v5741_v6 = vld [vmem:[#allocation6 + $0x134] sm:$0xf0]  ;;  %v4303_v7 = vor.u32 %v5744_v2, %v4300_v4  ;;  %v5738_v8 = vld [vmem:[#allocation6 + $0x124] sm:$0xf]  ;;  %v4276_v9 = vld [vmem:[#allocation6 + $0x138] sm:$0xf0] }
  0x20   :  { %833 = vmatpush.bf16.msra.mxu0 %v4299_v3  ;;  %v4275_v10 = vor.u32 %v5741_v6, %v4274_v5  ;;  %v4279_v11 = vor.u32 %v5738_v8, %v4276_v9  ;;  %v4250_v12 = vld [vmem:[#allocation6 + $0xf0] sm:$0xf]  ;;  %v5735_v13 = vld [vmem:[#allocation6 + $0x104] sm:$0xf0]  ;;  %v5732_v14 = vld [vmem:[#allocation6 + $0xf4] sm:$0xf] }
  0x21   :  { %859 = vmatpush.bf16.msra.mxu2 %v4303_v7  ;;  %v4252_v15 = vld [vmem:[#allocation6 + $0x108] sm:$0xf0]  ;;  %v4394_v16 = vld [vmem:[#allocation6 + $0x210] sm:$0xf]  ;;  %v5771_v17 = vld [vmem:[#allocation6 + $0x224] sm:$0xf0]  ;;  %v4251_v19 = vor.u32 %v5735_v13, %v4250_v12 }
  0x22   :  { %v4395_v18 = vor.u32 %v5771_v17, %v4394_v16  ;;  %v4226_v20 = vld [vmem:[#allocation6 + $0xc0] sm:$0xf]  ;;  %v5768_v21 = vld [vmem:[#allocation6 + $0x214] sm:$0xf]  ;;  %v4396_v22 = vld [vmem:[#allocation6 + $0x228] sm:$0xf0]  ;;  %v4255_v23 = vor.u32 %v5732_v14, %v4252_v15 }
  0x23   :  { %v5729_v24 = vld [vmem:[#allocation6 + $0xd4] sm:$0xf0]  ;;  %v4399_v25 = vor.u32 %v5768_v21, %v4396_v22  ;;  %v4370_v26 = vld [vmem:[#allocation6 + $0x1e0] sm:$0xf]  ;;  %v5726_v28 = vld [vmem:[#allocation6 + $0xc4] sm:$0xf] }
  0x24   :  { %834 = vmatpush.bf16.msra.mxu0 %v4275_v10  ;;  %850 = vmatpush.bf16.msra.mxu1 %v4395_v18  ;;  %v5765_v27 = vld [vmem:[#allocation6 + $0x1f4] sm:$0xf0]  ;;  %v4228_v29 = vld [vmem:[#allocation6 + $0xd8] sm:$0xf0]  ;;  %v5762_v31 = vld [vmem:[#allocation6 + $0x1e4] sm:$0xf]  ;;  %v4227_v34 = vor.u32 %v5729_v24, %v4226_v20 }
  0x25   :  { %860 = vmatpush.bf16.msra.mxu2 %v4279_v11  ;;  %v4371_v30 = vor.u32 %v5765_v27, %v4370_v26  ;;  %876 = vmatpush.bf16.msra.mxu3 %v4399_v25  ;;  %v4372_v32 = vld [vmem:[#allocation6 + $0x1f8] sm:$0xf0]  ;;  %v4346_v33 = vld [vmem:[#allocation6 + $0x1b0] sm:$0xf]  ;;  %v5723_v36 = vld [vmem:[#allocation6 + $0xa4] sm:$0xf0]  ;;  %v4231_v39 = vor.u32 %v5726_v28, %v4228_v29 }
  0x26   :  { %v4202_v35 = vld [vmem:[#allocation6 + $0x90] sm:$0xf]  ;;  %v4375_v37 = vor.u32 %v5762_v31, %v4372_v32  ;;  %v5759_v38 = vld [vmem:[#allocation6 + $0x1c4] sm:$0xf0]  ;;  %v5720_v40 = vld [vmem:[#allocation6 + $0x94] sm:$0xf] }
  0x27   :  { %v4204_v41 = vld [vmem:[#allocation6 + $0xa8] sm:$0xf0]  ;;  %v4347_v42 = vor.u32 %v5759_v38, %v4346_v33  ;;  %v5756_v43 = vld [vmem:[#allocation6 + $0x1b4] sm:$0xf]  ;;  %v4322_v45 = vld [vmem:[#allocation6 + $0x180] sm:$0xf]  ;;  %v4203_v49 = vor.u32 %v5723_v36, %v4202_v35 }
  0x28   :  { %835 = vmatpush.bf16.msra.mxu0 %v4251_v19  ;;  %851 = vmatpush.bf16.msra.mxu1 %v4371_v30  ;;  %v4348_v44 = vld [vmem:[#allocation6 + $0x1c8] sm:$0xf0]  ;;  %v5753_v46 = vld [vmem:[#allocation6 + $0x194] sm:$0xf0]  ;;  %v4178_v47 = vld [vmem:[#allocation6 + $0x60] sm:$0xf]  ;;  %v4207_v53 = vor.u32 %v5720_v40, %v4204_v41 }
  0x29   :  { %861 = vmatpush.bf16.msra.mxu2 %v4255_v23  ;;  %877 = vmatpush.bf16.msra.mxu3 %v4375_v37  ;;  %v4351_v48 = vor.u32 %v5756_v43, %v4348_v44  ;;  %v5717_v50 = vld [vmem:[#allocation6 + $0x74] sm:$0xf0]  ;;  %v5750_v51 = vld [vmem:[#allocation6 + $0x184] sm:$0xf]  ;;  %v4324_v52 = vld [vmem:[#allocation6 + $0x198] sm:$0xf0]  ;;  %v4323_v54 = vor.u32 %v5753_v46, %v4322_v45 }
  0x2a   :  { %v4306_v55 = vld [vmem:[#allocation6 + $0x158] sm:$0xf]  ;;  %v5748_v56 = vld [vmem:[#allocation6 + $0x16c] sm:$0xf0]  ;;  %v5714_v58 = vld [vmem:[#allocation6 + $0x64] sm:$0xf]  ;;  %v4327_v62 = vor.u32 %v5750_v51, %v4324_v52  ;;  %v4179_v0 = vor.u32 %v5717_v50, %v4178_v47 }
  0x2b   :  { %v4402_v57 = vld [vmem:[#allocation6 + $0x218] sm:$0xf]  ;;  %v4180_v59 = vld [vmem:[#allocation6 + $0x78] sm:$0xf0]  ;;  %v4307_v60 = vor.u32 %v5748_v56, %v4306_v55  ;;  %v5772_v61 = vld [vmem:[#allocation6 + $0x22c] sm:$0xf0] }
  0x2c   :  { %836 = vmatpush.bf16.msra.mxu0 %v4227_v34  ;;  %852 = vmatpush.bf16.msra.mxu1 %v4347_v42  ;;  %v4282_v63 = vld [vmem:[#allocation6 + $0x128] sm:$0xf]  ;;  %v4154_v1 = vld [vmem:[#allocation6 + $0x30] sm:$0xf]  ;;  %v4403_v2 = vor.u32 %v5772_v61, %v4402_v57  ;;  %v5742_v3 = vld [vmem:[#allocation6 + $0x13c] sm:$0xf0]  ;;  %v4183_v4 = vor.u32 %v5714_v58, %v4180_v59 }
  0x2d   :  { %862 = vmatpush.bf16.msra.mxu2 %v4231_v39  ;;  %878 = vmatpush.bf16.msra.mxu3 %v4351_v48  ;;  %v5711_v5 = vld [vmem:[#allocation6 + $0x44] sm:$0xf0]  ;;  %v5766_v7 = vld [vmem:[#allocation6 + $0x1fc] sm:$0xf0]  ;;  %v5708_v8 = vld [vmem:[#allocation6 + $0x34] sm:$0xf]  ;;  %v4283_v10 = vor.u32 %v5742_v3, %v4282_v63 }
  0x2e   :  { %v4378_v6 = vld [vmem:[#allocation6 + $0x1e8] sm:$0xf]  ;;  %v4156_v9 = vld [vmem:[#allocation6 + $0x48] sm:$0xf0]  ;;  %v4130_v11 = vld [vmem:[#allocation6] sm:$0xf]  ;;  %v4155_v15 = vor.u32 %v5711_v5, %v4154_v1 }
  0x2f   :  { %v5705_v12 = vld [vmem:[#allocation6 + $0x14] sm:$0xf0]  ;;  %v5736_v14 = vld [vmem:[#allocation6 + $0x10c] sm:$0xf0]  ;;  %v5702_v16 = vld [vmem:[#allocation6 + $0x4] sm:$0xf]  ;;  %v4379_v19 = vor.u32 %v5766_v7, %v4378_v6  ;;  %v4159_v20 = vor.u32 %v5708_v8, %v4156_v9 }
  0x30   :  { %837 = vmatpush.bf16.msra.mxu0 %v4203_v49  ;;  %853 = vmatpush.bf16.msra.mxu1 %v4323_v54  ;;  %v4258_v13 = vld [vmem:[#allocation6 + $0xf8] sm:$0xf]  ;;  %v4132_v17 = vld [vmem:[#allocation6 + $0x18] sm:$0xf0]  ;;  %v5760_v22 = vld [vmem:[#allocation6 + $0x1cc] sm:$0xf0]  ;;  %v4131_v35 = vor.u32 %v5705_v12, %v4130_v11 }
  0x31   :  { %863 = vmatpush.bf16.msra.mxu2 %v4207_v53  ;;  %879 = vmatpush.bf16.msra.mxu3 %v4327_v62  ;;  %v5745_v18 = vld [vmem:[#allocation6 + $0x15c] sm:$0xf]  ;;  %v4354_v21 = vld [vmem:[#allocation6 + $0x1b8] sm:$0xf]  ;;  %v6095_v23 = vld [vmem:[#allocation3] sm:$0xff]   ;;  %v4259_v26 = vor.u32 %v5736_v14, %v4258_v13  ;;  %v4135_v37 = vor.u32 %v5702_v16, %v4132_v17  ;;  %v6328_v46 = vmov 4.0  }
  0x32   :  { %v4308_v24 = vld [vmem:[#allocation6 + $0x170] sm:$0xf0]  ;;  %v5769_v25 = vld [vmem:[#allocation6 + $0x21c] sm:$0xf]  ;;  %v6096_v27 = vunpack.c.l.bf16 %v6095_v23  ;;  %v6097_v28 = vunpack.c.h.bf16 %v6095_v23  ;;  %v6110_v29 = vld [vmem:[#allocation3 + $0x8] sm:$0xff]   ;;  %v4355_v36 = vor.u32 %v5760_v22, %v4354_v21  ;;  %6130 = vrcp.f32 %v6328_v46  ;;  %s6329_s10 = smov [#allocation14]  }
  0x33   :  { %v4404_v30 = vld [vmem:[#allocation6 + $0x230] sm:$0xf0]  ;;  %v4234_v31 = vld [vmem:[#allocation6 + $0xc8] sm:$0xf]  ;;  %v5730_v32 = vld [vmem:[#allocation6 + $0xdc] sm:$0xf0]  ;;  %v6100_v33 = vunpack.c.l.bf16 %v6110_v29  ;;  %v6101_v34 = vunpack.c.h.bf16 %v6110_v29  ;;  %v4311_v38 = vor.u32 %v5745_v18, %v4308_v24 }
  0x34   :  { %885 = vmatpush.bf16.msrb.mxu1 %v4307_v60  ;;  %838 = vmatpush.bf16.msra.mxu0 %v4179_v0  ;;  %145 = vst [vmem:[#allocation1] ss:$2 sm:$0xff] %v6096_v27  ;;  %v4407_v39 = vor.u32 %v5769_v25, %v4404_v30  ;;  %v5739_v40 = vld [vmem:[#allocation6 + $0x12c] sm:$0xf]  ;;  %v4284_v41 = vld [vmem:[#allocation6 + $0x140] sm:$0xf0]  ;;  %v4235_v42 = vor.u32 %v5730_v32, %v4234_v31 }
  0x35   :  { %902 = vmatpush.bf16.msrb.mxu3 %v4403_v2  ;;  %864 = vmatpush.bf16.msra.mxu2 %v4183_v4  ;;  %149 = vst [vmem:[#allocation1 + $0x10] ss:$2 sm:$0xff] %v6097_v28  ;;  %v5763_v43 = vld [vmem:[#allocation6 + $0x1ec] sm:$0xf]  ;;  %v4380_v44 = vld [vmem:[#allocation6 + $0x200] sm:$0xf0]  ;;  %v4287_v47 = vor.u32 %v5739_v40, %v4284_v41 }
  0x36   :  { %153 = vst [vmem:[#allocation1 + $0x20] ss:$2 sm:$0xff] %v6100_v33  ;;  %v6111_v45 = vld [vmem:[#allocation3 + $0x10] sm:$0xff]   ;;  %v5733_v48 = vld [vmem:[#allocation6 + $0xfc] sm:$0xf]  ;;  %v4383_v51 = vor.u32 %v5763_v43, %v4380_v44  ;;  %vm188_vm0 = vcmask 1043456  }
  0x37   :  { %157 = vst [vmem:[#allocation1 + $0x30] ss:$2 sm:$0xff] %v6101_v34  ;;  %v4260_v49 = vld [vmem:[#allocation6 + $0x110] sm:$0xf0]  ;;  %v5757_v50 = vld [vmem:[#allocation6 + $0x1bc] sm:$0xf]  ;;  %v6104_v54 = vunpack.c.l.bf16 %v6111_v45  ;;  %v6105_v57 = vunpack.c.h.bf16 %v6111_v45 }
  0x38   :  { %886 = vmatpush.bf16.msrb.mxu1 %v4283_v10  ;;  %839 = vmatpush.bf16.msra.mxu0 %v4155_v15  ;;  %v4356_v52 = vld [vmem:[#allocation6 + $0x1d0] sm:$0xf0]  ;;  %v6112_v53 = vld [vmem:[#allocation3 + $0x18] sm:$0xff]   ;;  %vm196_vm1 = vcmask 519168   ;;  %v4263_v60 = vor.u32 %v5733_v48, %v4260_v49  ;;  %v6131_v0 = vpop.eup %6130  ;;  %vm445_vm3 = vcmask 1041409   ;;  %vm447_vm4 = vcmask 1042434  }
  0x39   :  { %903 = vmatpush.bf16.msrb.mxu3 %v4379_v19  ;;  %865 = vmatpush.bf16.msra.mxu2 %v4159_v20  ;;  %v6108_v61 = vunpack.c.l.bf16 %v6112_v53  ;;  %v4359_v1 = vor.u32 %v5757_v50, %v4356_v52  ;;  %v6109_v2 = vunpack.c.h.bf16 %v6112_v53  ;;  %v303_v13 = vmul.f32 4.0, %v6131_v0  ;;  %s4113_s11 = sshll.u32 %s6329_s10, 4  ;;  %s4115_s14 = sshll.u32 %s7494_s7, 4  ;;  %s4114_s11 = int_to_ptr.vmem [resolvable:$true] %s4113_s11  ;;  %s4116_s14 = int_to_ptr.hbm [resolvable:$true] %s4115_s14 }
  0x3a   :  { %vm307_vm2 = vweird.f32 %v6131_v0  ;;  %vm449_vm5 = vcmask 1043459   ;;  %vm451_vm6 = vcmask 1044484   ;;  %vm453_vm7 = vcmask 1045509  }
  0x3b   :  { %v146_v55 = vld.sshfl [vmem:[#allocation1] sm:$0xff pattern:$0x75316420]  ;;  %v147_v56 = vld.sshfl [vmem:[#allocation1 + $0x8] sm:$0xff pattern:$0x75316420] }
  0x3c   :  { %887 = vmatpush.bf16.msrb.mxu1 %v4259_v26  ;;  %840 = vmatpush.bf16.msra.mxu0 %v4131_v35  ;;  %v150_v58 = vld.sshfl [vmem:[#allocation1 + $0x10] sm:$0xff pattern:$0x75316420]  ;;  %v151_v59 = vld.sshfl [vmem:[#allocation1 + $0x18] sm:$0xff pattern:$0x75316420] }
  0x3d   :  { %904 = vmatpush.bf16.msrb.mxu3 %v4355_v36  ;;  %866 = vmatpush.bf16.msra.mxu2 %v4135_v37  ;;  %v154_v62 = vld.sshfl [vmem:[#allocation1 + $0x20] sm:$0xff pattern:$0x75316420]  ;;  %v155_v63 = vld.sshfl [vmem:[#allocation1 + $0x28] sm:$0xff pattern:$0x75316420] }
  0x3e   :  { %v158_v3 = vld.sshfl [vmem:[#allocation1 + $0x30] sm:$0xff pattern:$0x75316420]  ;;  %v6388_v4 = vld.sshfl [vmem:[#allocation1 + $0x38] sm:$0xff pattern:$0x75316420] }
  0x3f   :  { %160 = vst [vmem:[#allocation1] ss:$2 sm:$0xff] %v6104_v54  ;;  %v189_v5 = vsel %vm188_vm0, %v146_v55, 0.0  ;;  %v204_v6 = vsel %vm188_vm0, %v150_v58, 0.0  ;;  %v218_v7 = vsel %vm188_vm0, %v154_v62, 0.0  ;;  %v232_v8 = vsel %vm188_vm0, %v158_v3, 0.0 }
  0x40   :  { %911 = vmatpush.bf16.msrb.mxu0 %v4311_v38  ;;  %888 = vmatpush.bf16.msrb.mxu1 %v4235_v42  ;;  %163 = vst [vmem:[#allocation1 + $0x10] ss:$2 sm:$0xff] %v6105_v57  ;;  %v190_v9 = vrot.slane %v189_v5, 4  ;;  %v205_v10 = vrot.slane %v204_v6, 4  ;;  %v219_v11 = vrot.slane %v218_v7, 4  ;;  %v233_v12 = vrot.slane %v232_v8, 4 }
  0x41   :  { %928 = vmatpush.bf16.msrb.mxu2 %v4407_v39  ;;  %166 = vst [vmem:[#allocation1 + $0x20] ss:$2 sm:$0xff] %v6108_v61  ;;  %v304_v18 = vsub.f32 1.0, %v303_v13  ;;  %v197_v19 = vsel %vm196_vm1, %v147_v56, 0.0  ;;  %v211_v20 = vsel %vm196_vm1, %v151_v59, 0.0  ;;  %v6397_v32 = vsel %vm196_vm1, %v155_v63, 0.0 }
  0x42   :  { %169 = vst [vmem:[#allocation1 + $0x30] ss:$2 sm:$0xff] %v6109_v2  ;;  %v191_v14 = vadd.f32 %v190_v9, %v189_v5  ;;  %v206_v15 = vadd.f32 %v205_v10, %v204_v6  ;;  %v220_v16 = vadd.f32 %v219_v11, %v218_v7  ;;  %v234_v17 = vadd.f32 %v233_v12, %v232_v8 }
  0x43   :  { %v198_v24 = vrot.slane %v197_v19, 4  ;;  %v305_v26 = vmul.f32 %v6131_v0, %v304_v18  ;;  %v212_v27 = vrot.slane %v211_v20, 4  ;;  %vm455_vm8 = vcmask 1046534  }
  0x44   :  { %912 = vmatpush.bf16.msrb.mxu0 %v4287_v47  ;;  %v192_v21 = vrot.slane %v191_v14, 2  ;;  %v207_v22 = vrot.slane %v206_v15, 2  ;;  %v221_v23 = vrot.slane %v220_v16, 2  ;;  %v235_v25 = vrot.slane %v234_v17, 2 }
  0x45   :  { %929 = vmatpush.bf16.msrb.mxu2 %v4383_v51  ;;  %v306_v36 = vadd.f32 %v6131_v0, %v305_v26  ;;  %v6400_v37 = vadd.f32 %v198_v24, %v197_v19  ;;  %v213_v42 = vadd.f32 %v212_v27, %v211_v20  ;;  %v226_v24 = vrot.slane %v6397_v32, 4 }
  0x46   :  { %v161_v28 = vld.sshfl [vmem:[#allocation1] sm:$0xff pattern:$0x75316420]  ;;  %v193_v29 = vadd.f32 %v192_v21, %v191_v14  ;;  %v208_v30 = vadd.f32 %v207_v22, %v206_v15  ;;  %v222_v31 = vadd.f32 %v221_v23, %v220_v16  ;;  %v236_v34 = vadd.f32 %v235_v25, %v234_v17 }
  0x47   :  { %v164_v33 = vld.sshfl [vmem:[#allocation1 + $0x10] sm:$0xff pattern:$0x75316420]  ;;  %v246_v35 = vsel %vm188_vm0, %v161_v28, 0.0  ;;  %v6404_v47 = vsel %vm307_vm2, %v6131_v0, %v306_v36  ;;  %v200_v20 = vrot.slane %v6400_v37, 2  ;;  %v214_v23 = vrot.slane %v213_v42, 2 }
  0x48   :  { %913 = vmatpush.bf16.msrb.mxu0 %v4263_v60  ;;  %v167_v38 = vld.sshfl [vmem:[#allocation1 + $0x20] sm:$0xff pattern:$0x75316420]  ;;  %v194_v39 = vrot.slane %v193_v29, 1  ;;  %v209_v40 = vrot.slane %v208_v30, 1  ;;  %v223_v41 = vrot.slane %v222_v31, 1 }
  0x49   :  { %930 = vmatpush.bf16.msrb.mxu2 %v4359_v1  ;;  %v170_v43 = vld.sshfl [vmem:[#allocation1 + $0x30] sm:$0xff pattern:$0x75316420]  ;;  %v237_v44 = vrot.slane %v236_v34, 1  ;;  %v247_v45 = vrot.slane %v246_v35, 4  ;;  %v260_v46 = vsel %vm188_vm0, %v164_v33, 0.0  ;;  %v215_v33 = vadd.f32 %v214_v23, %v213_v42 }
  0x4a   :  { %v195_v48 = vadd.f32 %v194_v39, %v193_v29  ;;  %v210_v49 = vadd.f32 %v209_v40, %v208_v30  ;;  %v224_v50 = vadd.f32 %v223_v41, %v222_v31  ;;  %v261_v51 = vrot.slane %v260_v46, 4  ;;  %v162_v40 = vld.sshfl [vmem:[#allocation1 + $0x8] sm:$0xff pattern:$0x75316420] }
  0x4b   :  { %v238_v52 = vadd.f32 %v237_v44, %v236_v34  ;;  %v248_v53 = vadd.f32 %v247_v45, %v246_v35  ;;  %v274_v54 = vsel %vm188_vm0, %v167_v38, 0.0  ;;  %v288_v55 = vsel %vm188_vm0, %v170_v43, 0.0 }
  0x4c   :  { %v262_v56 = vadd.f32 %v261_v51, %v260_v46  ;;  %v275_v57 = vrot.slane %v274_v54, 4  ;;  %v289_v58 = vrot.slane %v288_v55, 4  ;;  %v309_v59 = vmul.f32 %v6404_v47, %v195_v48 }
  0x4d   :  { %v249_v60 = vrot.slane %v248_v53, 2  ;;  %v311_v61 = vmul.f32 %v6404_v47, %v210_v49  ;;  %v313_v62 = vmul.f32 %v6404_v47, %v224_v50  ;;  %v315_v63 = vmul.f32 %v6404_v47, %v238_v52 }
  0x4e   :  { %v263_v0 = vrot.slane %v262_v56, 2  ;;  %v276_v1 = vadd.f32 %v275_v57, %v274_v54  ;;  %v290_v2 = vadd.f32 %v289_v58, %v288_v55  ;;  %v325_v3 = vpack.c.bf16 %v309_v59, %v309_v59  ;;  %v168_v55 = vld.sshfl [vmem:[#allocation1 + $0x28] sm:$0xff pattern:$0x75316420] }
  0x4f   :  { %v250_v5 = vadd.f32 %v249_v60, %v248_v53  ;;  %v327_v6 = vpack.c.bf16 %v311_v61, %v311_v61  ;;  %v329_v7 = vpack.c.bf16 %v313_v62, %v313_v62  ;;  %v331_v8 = vpack.c.bf16 %v315_v63, %v315_v63  ;;  %v171_v58 = vld.sshfl [vmem:[#allocation1 + $0x38] sm:$0xff pattern:$0x75316420] }
  0x50   :  { %v264_v9 = vadd.f32 %v263_v0, %v262_v56  ;;  %v277_v10 = vrot.slane %v276_v1, 2  ;;  %v291_v11 = vrot.slane %v290_v2, 2  ;;  %v429_v12 = vunpack.c.l.b16 %v325_v3 }
  0x51   :  { %v251_v13 = vrot.slane %v250_v5, 1  ;;  %v431_v14 = vunpack.c.l.b16 %v327_v6  ;;  %v433_v15 = vunpack.c.l.b16 %v329_v7  ;;  %v435_v16 = vunpack.c.l.b16 %v331_v8 }
  0x52   :  { %v265_v17 = vrot.slane %v264_v9, 1  ;;  %v278_v18 = vadd.f32 %v277_v10, %v276_v1  ;;  %v292_v19 = vadd.f32 %v291_v11, %v290_v2  ;;  %vm457_vm9 = vcmask 1047559  }
  0x53   :  { %v252_v21 = vadd.f32 %v251_v13, %v250_v5  ;;  %v446_v22 = vsel %vm445_vm3, %v431_v14, %v429_v12  ;;  %v201_v31 = vadd.f32 %v200_v20, %v6400_v37  ;;  %v227_v38 = vadd.f32 %v226_v24, %v6397_v32  ;;  %v165_v37 = vld.sshfl [vmem:[#allocation1 + $0x18] sm:$0xff pattern:$0x75316420] }
  0x54   :  { %v266_v25 = vadd.f32 %v265_v17, %v264_v9  ;;  %v279_v26 = vrot.slane %v278_v18, 1  ;;  %v293_v27 = vrot.slane %v292_v19, 1  ;;  %v448_v28 = vsel %vm447_vm4, %v433_v15, %v446_v22 }
  0x55   :  { %v317_v29 = vmul.f32 %v6404_v47, %v252_v21  ;;  %v450_v30 = vsel %vm449_vm5, %v435_v16, %v448_v28  ;;  %v202_v41 = vrot.slane %v201_v31, 1  ;;  %v216_v43 = vrot.slane %v215_v33, 1 }
  0x56   :  { %v280_v34 = vadd.f32 %v279_v26, %v278_v18  ;;  %v294_v35 = vadd.f32 %v293_v27, %v292_v19  ;;  %v319_v36 = vmul.f32 %v6404_v47, %v266_v25  ;;  %v239_v44 = vsel %vm196_vm1, %v6388_v4, 0.0 }
  0x57   :  { %v333_v39 = vpack.c.bf16 %v317_v29, %v317_v29  ;;  %v228_v42 = vrot.slane %v227_v38, 2  ;;  %v203_v50 = vadd.f32 %v202_v41, %v201_v31  ;;  %v217_v51 = vadd.f32 %v216_v43, %v215_v33  ;;  %v5754_v41 = vld [vmem:[#allocation6 + $0x19c] sm:$0xf0] }
  0x58   :  { %v321_v45 = vmul.f32 %v6404_v47, %v280_v34  ;;  %v323_v46 = vmul.f32 %v6404_v47, %v294_v35  ;;  %v335_v48 = vpack.c.bf16 %v319_v36, %v319_v36  ;;  %v240_v52 = vrot.slane %v239_v44, 4 }
  0x59   :  { %v437_v49 = vunpack.c.l.b16 %v333_v39  ;;  %v229_v56 = vadd.f32 %v228_v42, %v227_v38  ;;  %v253_v59 = vsel %vm196_vm1, %v162_v40, 0.0  ;;  %v267_v60 = vsel %vm196_vm1, %v165_v37, 0.0  ;;  %v4330_v40 = vld [vmem:[#allocation6 + $0x188] sm:$0xf] }
  0x5a   :  { %v337_v53 = vpack.c.bf16 %v321_v45, %v321_v45  ;;  %v339_v32 = vpack.c.bf16 %v323_v46, %v323_v46  ;;  %v439_v54 = vunpack.c.l.b16 %v335_v48  ;;  %v241_v4 = vadd.f32 %v240_v52, %v239_v44  ;;  %v5727_v46 = vld [vmem:[#allocation6 + $0xcc] sm:$0xf]  ;;  %v4236_v48 = vld [vmem:[#allocation6 + $0xe0] sm:$0xf0] }
  0x5b   :  { %v452_v57 = vsel %vm451_vm6, %v437_v49, %v450_v30  ;;  %v230_v0 = vrot.slane %v229_v56, 1  ;;  %v254_v2 = vrot.slane %v253_v59, 4  ;;  %v268_v3 = vrot.slane %v267_v60, 4  ;;  %v4332_v52 = vld [vmem:[#allocation6 + $0x1a0] sm:$0xf0] }
  0x5c   :  { %v441_v61 = vunpack.c.l.b16 %v337_v53  ;;  %v443_v62 = vunpack.c.l.b16 %v339_v32  ;;  %v454_v63 = vsel %vm453_vm7, %v439_v54, %v452_v57  ;;  %v242_v1 = vrot.slane %v241_v4, 2  ;;  %v5746_v53 = vld [vmem:[#allocation6 + $0x164] sm:$0xf]  ;;  %v4316_v57 = vld [vmem:[#allocation6 + $0x178] sm:$0xf0] }
  0x5d   :  { %v281_v5 = vsel %vm196_vm1, %v168_v55, 0.0  ;;  %v231_v7 = vadd.f32 %v230_v0, %v229_v56  ;;  %v295_v9 = vsel %vm196_vm1, %v171_v58, 0.0  ;;  %v255_v12 = vadd.f32 %v254_v2, %v253_v59  ;;  %v4210_v58 = vld [vmem:[#allocation6 + $0x98] sm:$0xf]  ;;  %v4212_v0 = vld [vmem:[#allocation6 + $0xb0] sm:$0xf0] }
  0x5e   :  { %v456_v6 = vsel %vm455_vm8, %v441_v61, %v454_v63  ;;  %v282_v8 = vrot.slane %v281_v5, 4  ;;  %v243_v11 = vadd.f32 %v242_v1, %v241_v4  ;;  %v269_v13 = vadd.f32 %v268_v3, %v267_v60  ;;  %v5721_v63 = vld [vmem:[#allocation6 + $0x9c] sm:$0xf] }
  0x5f   :  { %v458_v10 = vsel %vm457_vm9, %v443_v62, %v456_v6  ;;  %v296_v16 = vrot.slane %v295_v9, 4  ;;  %v310_v17 = vmul.f32 %v6404_v47, %v203_v50  ;;  %v256_v19 = vrot.slane %v255_v12, 2  ;;  %v5724_v62 = vld [vmem:[#allocation6 + $0xac] sm:$0xf0]  ;;  %v4292_v6 = vld [vmem:[#allocation6 + $0x148] sm:$0xf0] }
  0x60   :  { %v6433_v14 = vpack.c.b16 %v458_v10, %v458_v10  ;;  %v283_v15 = vadd.f32 %v282_v8, %v281_v5  ;;  %v244_v18 = vrot.slane %v243_v11, 1  ;;  %v270_v20 = vrot.slane %v269_v13, 2  ;;  %v5740_v5 = vld [vmem:[#allocation6 + $0x134] sm:$0xf] }
  0x61   :  { %v312_v21 = vmul.f32 %v6404_v47, %v217_v51  ;;  %v297_v23 = vadd.f32 %v296_v16, %v295_v9  ;;  %v314_v24 = vmul.f32 %v6404_v47, %v231_v7  ;;  %v326_v25 = vpack.c.bf16 %v310_v17, %v310_v17  ;;  %v5751_v51 = vld [vmem:[#allocation6 + $0x18c] sm:$0xf] }
  0x62   :  { %841 = vmatmul.bf16.vlgmr.msra.gmra.mxu0 %v6433_v14  ;;  %v284_v22 = vrot.slane %v283_v15, 2  ;;  %867 = vmatmul.bf16.vlgmr.msra.gmra.mxu2 %v6433_v14  ;;  %v245_v26 = vadd.f32 %v244_v18, %v243_v11  ;;  %v257_v27 = vadd.f32 %v256_v19, %v255_v12  ;;  %v271_v28 = vadd.f32 %v270_v20, %v269_v13  ;;  %v4186_v11 = vld [vmem:[#allocation6 + $0x68] sm:$0xf]  ;;  %v5718_v12 = vld [vmem:[#allocation6 + $0x7c] sm:$0xf0] }
  0x63   :  { %v328_v29 = vpack.c.bf16 %v312_v21, %v312_v21  ;;  %v298_v31 = vrot.slane %v297_v23, 2  ;;  %v330_v33 = vpack.c.bf16 %v314_v24, %v314_v24  ;;  %v430_v34 = vunpack.c.l.b16 %v326_v25  ;;  %v5715_v18 = vld [vmem:[#allocation6 + $0x6c] sm:$0xf]  ;;  %v4188_v19 = vld [vmem:[#allocation6 + $0x80] sm:$0xf0] }
  0x64   :  { %v285_v30 = vadd.f32 %v284_v22, %v283_v15  ;;  %v258_v35 = vrot.slane %v257_v27, 1  ;;  %v272_v36 = vrot.slane %v271_v28, 1  ;;  %v316_v38 = vmul.f32 %v6404_v47, %v245_v26  ;;  %v4314_v25 = vld [vmem:[#allocation6 + $0x160] sm:$0xf]  ;;  %v5749_v26 = vld [vmem:[#allocation6 + $0x174] sm:$0xf0] }
  0x65   :  { %v432_v39 = vunpack.c.l.b16 %v328_v29  ;;  %v299_v44 = vadd.f32 %v298_v31, %v297_v23  ;;  %v434_v45 = vunpack.c.l.b16 %v330_v33  ;;  %v4331_v56 = vor.u32 %v5754_v41, %v4330_v40  ;;  %v5734_v29 = vld [vmem:[#allocation6 + $0x104] sm:$0xf]  ;;  %v4162_v31 = vld [vmem:[#allocation6 + $0x38] sm:$0xf]  ;;  %v4290_v40 = vld [vmem:[#allocation6 + $0x130] sm:$0xf] }
  0x66   :  { %v286_v43 = vrot.slane %v285_v30, 1  ;;  %v259_v37 = vadd.f32 %v258_v35, %v257_v27  ;;  %v273_v42 = vadd.f32 %v272_v36, %v271_v28  ;;  %v332_v49 = vpack.c.bf16 %v316_v38, %v316_v38  ;;  %v5712_v35 = vld [vmem:[#allocation6 + $0x4c] sm:$0xf0]  ;;  %v5709_v36 = vld [vmem:[#allocation6 + $0x3c] sm:$0xf] }
  0x67   :  { %v459_v50 = vsel %vm445_vm3, %v432_v39, %v430_v34  ;;  %v300_v54 = vrot.slane %v299_v44, 1  ;;  %v4239_v61 = vor.u32 %v5727_v46, %v4236_v48  ;;  %905 = vmatpush.bf16.msrb.mxu3 %v4331_v56  ;;  %v4335_v3 = vor.u32 %v5751_v51, %v4332_v52  ;;  %v4164_v38 = vld [vmem:[#allocation6 + $0x50] sm:$0xf0]  ;;  %v5706_v51 = vld [vmem:[#allocation6 + $0x1c] sm:$0xf0] }
  0x68   :  { %v287_v32 = vadd.f32 %v286_v43, %v285_v30  ;;  %v460_v55 = vsel %vm447_vm4, %v434_v45, %v459_v50  ;;  %v318_v4 = vmul.f32 %v6404_v47, %v259_v37  ;;  %v320_v59 = vmul.f32 %v6404_v47, %v273_v42  ;;  %v4268_v30 = vld [vmem:[#allocation6 + $0x118] sm:$0xf0]  ;;  %v5728_v46 = vld [vmem:[#allocation6 + $0xd4] sm:$0xf]  ;;  %v4138_v50 = vld [vmem:[#allocation6 + $0x8] sm:$0xf] }
  0x69   :  { %v436_v60 = vunpack.c.l.b16 %v332_v49  ;;  %v301_v1 = vadd.f32 %v300_v54, %v299_v44  ;;  %914 = vmatpush.bf16.msrb.mxu0 %v4239_v61  ;;  %v4319_v10 = vor.u32 %v5746_v53, %v4316_v57  ;;  %931 = vmatpush.bf16.msrb.mxu2 %v4335_v3  ;;  %v4211_v16 = vor.u32 %v5724_v62, %v4210_v58  ;;  %v5743_v44 = vld [vmem:[#allocation6 + $0x144] sm:$0xf0]  ;;  %v4244_v49 = vld [vmem:[#allocation6 + $0xe8] sm:$0xf0]  ;;  %v4140_v53 = vld [vmem:[#allocation6 + $0x20] sm:$0xf0] }
  0x6a   :  { %v322_v2 = vmul.f32 %v6404_v47, %v287_v32  ;;  %v334_v7 = vpack.c.bf16 %v318_v4, %v318_v4  ;;  %v336_v8 = vpack.c.bf16 %v320_v59, %v320_v59  ;;  %v4215_v17 = vor.u32 %v5721_v63, %v4212_v0  ;;  %v5703_v52 = vld [vmem:[#allocation6 + $0xc] sm:$0xf]  ;;  %v4410_v32 = vld [vmem:[#allocation6 + $0x220] sm:$0xf]  ;;  %v5773_v54 = vld [vmem:[#allocation6 + $0x234] sm:$0xf0] }
  0x6b   :  { %v461_v9 = vsel %vm449_vm5, %v436_v60, %v460_v55  ;;  %v324_v13 = vmul.f32 %v6404_v47, %v301_v1  ;;  %v4295_v22 = vor.u32 %v5740_v5, %v4292_v6  ;;  %889 = vmatpush.bf16.msrb.mxu1 %v4211_v16  ;;  %v4187_v27 = vor.u32 %v5718_v12, %v4186_v11  ;;  %v5770_v55 = vld [vmem:[#allocation6 + $0x224] sm:$0xf]  ;;  %v4412_v56 = vld [vmem:[#allocation6 + $0x238] sm:$0xf0]  ;;  %v4266_v58 = vld [vmem:[#allocation6 + $0x100] sm:$0xf] }
  0x6c   :  { %v338_v15 = vpack.c.bf16 %v322_v2, %v322_v2  ;;  %v438_v20 = vunpack.c.l.b16 %v334_v7  ;;  %v440_v21 = vunpack.c.l.b16 %v336_v8  ;;  %v4191_v47 = vor.u32 %v5715_v18, %v4188_v19  ;;  %v5737_v59 = vld [vmem:[#allocation6 + $0x114] sm:$0xf0]  ;;  %v5722_v62 = vld [vmem:[#allocation6 + $0xa4] sm:$0xf]  ;;  %v4220_v63 = vld [vmem:[#allocation6 + $0xb8] sm:$0xf0] }
  0x6d   :  { %963 = vmatpush.bf16.msra.mxu2 %v4319_v10  ;;  %v340_v23 = vpack.c.bf16 %v324_v13, %v324_v13  ;;  %915 = vmatpush.bf16.msrb.mxu0 %v4215_v17  ;;  %vm829_vm10 = vcmask 523264   ;;  %v4315_v43 = vor.u32 %v5749_v26, %v4314_v25  ;;  %v4271_v45 = vor.u32 %v5734_v29, %v4268_v30  ;;  %v4386_v2 = vld [vmem:[#allocation6 + $0x1f0] sm:$0xf]  ;;  %v5767_v3 = vld [vmem:[#allocation6 + $0x204] sm:$0xf0] }
  0x6e   :  { %v442_v24 = vunpack.c.l.b16 %v338_v15  ;;  %v462_v28 = vsel %vm451_vm6, %v438_v20, %v461_v9  ;;  %v4163_v37 = vor.u32 %v5712_v35, %v4162_v31  ;;  %v4167_v42 = vor.u32 %v5709_v36, %v4164_v38  ;;  %v5764_v5 = vld [vmem:[#allocation6 + $0x1f4] sm:$0xf]  ;;  %v4388_v6 = vld [vmem:[#allocation6 + $0x208] sm:$0xf0]  ;;  %v4242_v8 = vld [vmem:[#allocation6 + $0xd0] sm:$0xf] }
  0x6f   :  { %v444_v33 = vunpack.c.l.b16 %v340_v23  ;;  %v463_v34 = vsel %vm453_vm7, %v440_v21, %v462_v28  ;;  %890 = vmatpush.bf16.msrb.mxu1 %v4187_v27  ;;  %v4291_v57 = vor.u32 %v5743_v44, %v4290_v40  ;;  %v4247_v4 = vor.u32 %v5728_v46, %v4244_v49  ;;  %v5731_v10 = vld [vmem:[#allocation6 + $0xe4] sm:$0xf0]  ;;  %v5716_v11 = vld [vmem:[#allocation6 + $0x74] sm:$0xf]  ;;  %v4196_v12 = vld [vmem:[#allocation6 + $0x88] sm:$0xf0] }
  0x70   :  { %v464_v39 = vsel %vm455_vm8, %v442_v24, %v463_v34  ;;  %v4139_v60 = vor.u32 %v5706_v51, %v4138_v50  ;;  %v4143_v61 = vor.u32 %v5703_v52, %v4140_v53  ;;  %v4411_v0 = vor.u32 %v5773_v54, %v4410_v32  ;;  %v4362_v16 = vld [vmem:[#allocation6 + $0x1c0] sm:$0xf]  ;;  %v5761_v17 = vld [vmem:[#allocation6 + $0x1d4] sm:$0xf0]  ;;  %v5758_v18 = vld [vmem:[#allocation6 + $0x1c4] sm:$0xf] }
  0x71   :  { %964 = vmatpush.bf16.msra.mxu2 %v4295_v22  ;;  %v465_v41 = vsel %vm457_vm9, %v444_v33, %v464_v39  ;;  %916 = vmatpush.bf16.msrb.mxu0 %v4191_v47  ;;  %v4415_v1 = vor.u32 %v5770_v55, %v4412_v56  ;;  %v4267_v7 = vor.u32 %v5737_v59, %v4266_v58  ;;  %v4364_v19 = vld [vmem:[#allocation6 + $0x1d8] sm:$0xf0]  ;;  %v4218_v21 = vld [vmem:[#allocation6 + $0xa0] sm:$0xf]  ;;  %v5725_v23 = vld [vmem:[#allocation6 + $0xb4] sm:$0xf0] }
  0x72   :  { %v6452_v48 = vpack.c.b16 %v465_v41, %v465_v41  ;;  %v4223_v9 = vor.u32 %v5722_v62, %v4220_v63  ;;  %v4387_v13 = vor.u32 %v5767_v3, %v4386_v2  ;;  %v4391_v15 = vor.u32 %v5764_v5, %v4388_v6  ;;  %v5710_v24 = vld [vmem:[#allocation6 + $0x44] sm:$0xf]  ;;  %v4172_v25 = vld [vmem:[#allocation6 + $0x58] sm:$0xf0]  ;;  %v4338_v28 = vld [vmem:[#allocation6 + $0x190] sm:$0xf] }
  0x73   :  { %891 = vmatpush.bf16.msrb.mxu1 %v4163_v37  ;;  %v4243_v20 = vor.u32 %v5731_v10, %v4242_v8  ;;  %v4199_v22 = vor.u32 %v5716_v11, %v4196_v12  ;;  %v4363_v26 = vor.u32 %v5761_v17, %v4362_v16  ;;  %v4367_v27 = vor.u32 %v5758_v18, %v4364_v19  ;;  %v5755_v47 = vld [vmem:[#allocation6 + $0x1a4] sm:$0xf0]  ;;  %v4194_v29 = vld [vmem:[#allocation6 + $0x70] sm:$0xf]  ;;  %v5752_v30 = vld [vmem:[#allocation6 + $0x194] sm:$0xf] }
  0x74   :  { %4416 = vmatmul.msk.bf16.vlgmr.msra.gmra.mxu1 %vm829_vm10, %v6452_v48  ;;  %4417 = vmatmul.msk.bf16.vlgmr.msra.gmra.mxu3 %vm829_vm10, %v6452_v48  ;;  %v4340_v31 = vld [vmem:[#allocation6 + $0x1a8] sm:$0xf0]  ;;  %v4536_v33 = vld [vmem:[#allocation11 + $0xe0] sm:$0xf]  ;;  %v4219_v34 = vor.u32 %v5725_v23, %v4218_v21  ;;  %v4175_v35 = vor.u32 %v5710_v24, %v4172_v25  ;;  %v5804_v36 = vld [vmem:[#allocation11 + $0xec] sm:$0xf0]  ;;  %v4339_v44 = vor.u32 %v5755_v47, %v4338_v28  ;;  %v1044_v24 = vlaneseq }
  0x75   :  { %937 = vmatpush.bf16.msra.mxu3 %v4315_v43  ;;  %965 = vmatpush.bf16.msra.mxu2 %v4271_v45  ;;  %v4792_v38 = vld [vmem:[#allocation11 + $0x2e0] sm:$0xf]  ;;  %v5868_v39 = vld [vmem:[#allocation11 + $0x2ec] sm:$0xf0]  ;;  %v5704_v41 = vld [vmem:[#allocation6 + $0x14] sm:$0xf]  ;;  %v4343_v45 = vor.u32 %v5752_v30, %v4340_v31 }
  0x76   :  { %917 = vmatpush.bf16.msrb.mxu0 %v4167_v42  ;;  %4419 = vmatmul.msk.bf16.vlgmr.msrb.gmra.mxu2 %vm829_vm10, %v6452_v48  ;;  %v5719_v40 = vld [vmem:[#allocation6 + $0x84] sm:$0xf0]  ;;  %v4148_v43 = vld [vmem:[#allocation6 + $0x28] sm:$0xf0]  ;;  %v5900_v37 = vld [vmem:[#allocation11 + $0x3ec] sm:$0xf0]  ;;  %v4537_v42 = vor.u32 %v5804_v36, %v4536_v33  ;;  %v4793_v49 = vor.u32 %v5868_v39, %v4792_v38 }
  0x77   :  { %892 = vmatpush.bf16.msrb.mxu1 %v4139_v60  ;;  %v4920_v46 = vld [vmem:[#allocation11 + $0x3e0] sm:$0xf]  ;;  %v4195_v50 = vor.u32 %v5719_v40, %v4194_v29  ;;  %v4170_v51 = vld [vmem:[#allocation6 + $0x40] sm:$0xf]  ;;  %v4151_v52 = vor.u32 %v5704_v41, %v4148_v43  ;;  %v5800_v32 = vld [vmem:[#allocation11 + $0xcc] sm:$0xf0] }
  0x78   :  { %v4520_v53 = vld [vmem:[#allocation11 + $0xc0] sm:$0xf]  ;;  %v5713_v54 = vld [vmem:[#allocation6 + $0x54] sm:$0xf0]  ;;  %v4921_v55 = vor.u32 %v5900_v37, %v4920_v46  ;;  %v4146_v59 = vld [vmem:[#allocation6 + $0x10] sm:$0xf] }
  0x79   :  { %938 = vmatpush.bf16.msra.mxu3 %v4291_v57  ;;  %966 = vmatpush.bf16.msra.mxu2 %v4247_v4  ;;  %v4776_v56 = vld [vmem:[#allocation11 + $0x2c0] sm:$0xf]  ;;  %v5864_v57 = vld [vmem:[#allocation11 + $0x2cc] sm:$0xf0]  ;;  %v4521_v60 = vor.u32 %v5800_v32, %v4520_v53  ;;  %v1045_v29 = vshrl.u32 %v1044_v24, 7  ;;  %v6467_v39 = vld [vmem:[#allocation9] sm:$0xff] }
  0x7a   :  { %918 = vmatpush.bf16.msrb.mxu0 %v4143_v61  ;;  %v4904_v58 = vld [vmem:[#allocation11 + $0x3c0] sm:$0xf]  ;;  %v5896_v4 = vld [vmem:[#allocation11 + $0x3cc] sm:$0xf0]  ;;  %v4171_v61 = vor.u32 %v5713_v54, %v4170_v51  ;;  %vm1038_vm11 = vcmask 64512  }
  0x7b   :  { %954 = vmatpush.bf16.msra.mxu1 %v4411_v0  ;;  %v5707_v62 = vld [vmem:[#allocation6 + $0x24] sm:$0xf0]  ;;  %v5796_v0 = vld [vmem:[#allocation11 + $0xac] sm:$0xf0]  ;;  %v4905_v3 = vor.u32 %v5896_v4, %v4904_v58  ;;  %6127 = vset.pattern.permute.xlu0 %v1045_v29  ;;  %v1039_v40 = vsel %vm1038_vm11, %v6467_v39, 0.0 }
  0x7c   :  { %v4504_v63 = vld [vmem:[#allocation11 + $0xa0] sm:$0xf]  ;;  %v5860_v6 = vld [vmem:[#allocation11 + $0x2ac] sm:$0xf0]  ;;  %v4147_v11 = vor.u32 %v5707_v62, %v4146_v59  ;;  %6128 = vset.pattern.permute.xlu1 %v1045_v29  ;;  %6129 = vset.pattern.permute.xlu2 %v1045_v29 }
  0x7d   :  { %939 = vmatpush.bf16.msra.mxu3 %v4267_v7  ;;  %967 = vmatpush.bf16.msra.mxu2 %v4223_v9  ;;  %v4664_v2 = vld [vmem:[#allocation11 + $0x1e0] sm:$0xf]  ;;  %v5836_v7 = vld [vmem:[#allocation11 + $0x1ec] sm:$0xf0]  ;;  %v4505_v10 = vor.u32 %v5796_v0, %v4504_v63 }
  0x7e   :  { %980 = vmatpush.bf16.msra.mxu0 %v4415_v1  ;;  %v4777_v1 = vor.u32 %v5864_v57, %v4776_v56  ;;  %v4760_v5 = vld [vmem:[#allocation11 + $0x2a0] sm:$0xf]  ;;  %v5892_v9 = vld [vmem:[#allocation11 + $0x3ac] sm:$0xf0]  ;;  %v4665_v16 = vor.u32 %v5836_v7, %v4664_v2  ;;  %1040 = vadd.xlane.f32.xlu1 %v1039_v40 }
  0x7f   :  { %919 = vmatmul.bf16.vlgmr.msrb.gmra.mxu0 %v6433_v14  ;;  %955 = vmatpush.bf16.msra.mxu1 %v4387_v13  ;;  %v4888_v8 = vld [vmem:[#allocation11 + $0x3a0] sm:$0xf]  ;;  %v5792_v17 = vld [vmem:[#allocation11 + $0x8c] sm:$0xf0] }
  0x80   :  { %v4648_v12 = vld [vmem:[#allocation11 + $0x1c0] sm:$0xf]  ;;  %v4889_v18 = vor.u32 %v5892_v9, %v4888_v8  ;;  %v5832_v21 = vld [vmem:[#allocation11 + $0x1cc] sm:$0xf0] }
  0x81   :  { %940 = vmatpush.bf16.msra.mxu3 %v4243_v20  ;;  %968 = vmatpush.bf16.msra.mxu2 %v4199_v22  ;;  %v4488_v13 = vld [vmem:[#allocation11 + $0x80] sm:$0xf]  ;;  %v5856_v20 = vld [vmem:[#allocation11 + $0x28c] sm:$0xf0]  ;;  %v4649_v30 = vor.u32 %v5832_v21, %v4648_v12 }
  0x82   :  { %981 = vmatpush.bf16.msra.mxu0 %v4391_v15  ;;  %v4761_v15 = vor.u32 %v5860_v6, %v4760_v5  ;;  %v4744_v19 = vld [vmem:[#allocation11 + $0x280] sm:$0xf]  ;;  %v5888_v23 = vld [vmem:[#allocation11 + $0x38c] sm:$0xf0] }
  0x83   :  { %956 = vmatpush.bf16.msra.mxu1 %v4363_v26  ;;  %v4872_v22 = vld [vmem:[#allocation11 + $0x380] sm:$0xf]  ;;  %v5828_v26 = vld [vmem:[#allocation11 + $0x1ac] sm:$0xf0]  ;;  %v4745_v47 = vor.u32 %v5856_v20, %v4744_v19  ;;  %v5834_v19 = vld [vmem:[#allocation11 + $0x1e4] sm:$0xf] }
  0x84   :  { %4418 = vmatmul.msk.bf16.vlgmr.msrb.gmra.mxu3 %vm829_vm10, %v6452_v48  ;;  %893 = vmatmul.bf16.vlgmr.msrb.gmra.mxu1 %v6433_v14  ;;  %v4632_v25 = vld [vmem:[#allocation11 + $0x1a0] sm:$0xf]  ;;  %v5788_v31 = vld [vmem:[#allocation11 + $0x6c] sm:$0xf0]  ;;  %v4873_v33 = vor.u32 %v5888_v23, %v4872_v22  ;;  %v4666_v20 = vld [vmem:[#allocation11 + $0x1f0] sm:$0xf0] }
  0x85   :  { %941 = vmatpush.bf16.msra.mxu3 %v4219_v34  ;;  %969 = vmatpush.bf16.msra.mxu2 %v4175_v35  ;;  %v4472_v28 = vld [vmem:[#allocation11 + $0x60] sm:$0xf]  ;;  %v5852_v35 = vld [vmem:[#allocation11 + $0x26c] sm:$0xf0]  ;;  %v4633_v37 = vor.u32 %v5828_v26, %v4632_v25 }
  0x86   :  { %982 = vmatpush.bf16.msra.mxu0 %v4367_v27  ;;  %v4489_v27 = vor.u32 %v5792_v17, %v4488_v13  ;;  %v4728_v34 = vld [vmem:[#allocation11 + $0x260] sm:$0xf]  ;;  %v5884_v38 = vld [vmem:[#allocation11 + $0x36c] sm:$0xf0] }
  0x87   :  { %957 = vmatpush.bf16.msra.mxu1 %v4339_v44  ;;  %v4856_v36 = vld [vmem:[#allocation11 + $0x360] sm:$0xf]  ;;  %v5824_v43 = vld [vmem:[#allocation11 + $0x18c] sm:$0xf0]  ;;  %v4473_v44 = vor.u32 %v5788_v31, %v4472_v28  ;;  %v4729_v46 = vor.u32 %v5852_v35, %v4728_v34 }
  0x88   :  { %v4616_v41 = vld [vmem:[#allocation11 + $0x180] sm:$0xf]  ;;  %v5780_v57 = vld [vmem:[#allocation11 + $0x2c] sm:$0xf0] }
  0x89   :  { %942 = vmatpush.bf16.msra.mxu3 %v4195_v50  ;;  %970 = vmatpush.bf16.msra.mxu2 %v4151_v52  ;;  %v4712_v50 = vld [vmem:[#allocation11 + $0x240] sm:$0xf]  ;;  %v5880_v52 = vld [vmem:[#allocation11 + $0x34c] sm:$0xf0]  ;;  %v4617_v56 = vor.u32 %v5824_v43, %v4616_v41 }
  0x8a   :  { %983 = vmatpush.bf16.msra.mxu0 %v4343_v45  ;;  %v4456_v45 = vld [vmem:[#allocation11 + $0x40] sm:$0xf]  ;;  %v5844_v59 = vld [vmem:[#allocation11 + $0x22c] sm:$0xf0] }
  0x8b   :  { %2530 = vmatpush.bf16.msrb.mxu1 %v4537_v42  ;;  %v5784_v42 = vld [vmem:[#allocation11 + $0x4c] sm:$0xf0]  ;;  %v4840_v51 = vld [vmem:[#allocation11 + $0x340] sm:$0xf] }
  0x8c   :  { %971 = vmatmul.bf16.vlgmr.msra.gmra.mxu2 %v6433_v14  ;;  %v4600_v53 = vld [vmem:[#allocation11 + $0x160] sm:$0xf]  ;;  %v4457_v32 = vor.u32 %v5784_v42, %v4456_v45  ;;  %v4841_v58 = vor.u32 %v5880_v52, %v4840_v51  ;;  %v5876_v62 = vld [vmem:[#allocation11 + $0x32c] sm:$0xf0] }
  0x8d   :  { %2569 = vmatpush.bf16.msrb.mxu2 %v4921_v55  ;;  %943 = vmatpush.bf16.msra.mxu3 %v4171_v61  ;;  %v4440_v54 = vld [vmem:[#allocation11 + $0x20] sm:$0xf]  ;;  %v5816_v0 = vld [vmem:[#allocation11 + $0x14c] sm:$0xf0] }
  0x8e   :  { %2556 = vmatpush.bf16.msrb.mxu0 %v4793_v49  ;;  %v4857_v49 = vor.u32 %v5884_v38, %v4856_v36  ;;  %v4696_v4 = vld [vmem:[#allocation11 + $0x220] sm:$0xf]  ;;  %v5776_v6 = vld [vmem:[#allocation11 + $0xc] sm:$0xf0] }
  0x8f   :  { %2531 = vmatpush.bf16.msrb.mxu1 %v4521_v60  ;;  %4421 = vmatmul.msk.bf16.vlgmr.msra.gmra.mxu0 %vm829_vm10, %v6452_v48  ;;  %v5820_v60 = vld [vmem:[#allocation11 + $0x16c] sm:$0xf0]  ;;  %v4824_v61 = vld [vmem:[#allocation11 + $0x320] sm:$0xf] }
  0x90   :  { %v4584_v63 = vld [vmem:[#allocation11 + $0x140] sm:$0xf]  ;;  %v4601_v5 = vor.u32 %v5820_v60, %v4600_v53  ;;  %v4825_v7 = vor.u32 %v5876_v62, %v4824_v61  ;;  %v5840_v9 = vld [vmem:[#allocation11 + $0x20c] sm:$0xf0]  ;;  %v5830_v61 = vld [vmem:[#allocation11 + $0x1c4] sm:$0xf] }
  0x91   :  { %2570 = vmatpush.bf16.msrb.mxu2 %v4905_v3  ;;  %944 = vmatpush.bf16.msra.mxu3 %v4147_v11  ;;  %v4424_v2 = vld [vmem:[#allocation11] sm:$0xf]  ;;  %v4697_v3 = vor.u32 %v5844_v59, %v4696_v4  ;;  %v5932_v11 = vld [vmem:[#allocation11 + $0x4ec] sm:$0xf0]  ;;  %v4585_v21 = vor.u32 %v5816_v0, %v4584_v63  ;;  %v4522_v4 = vld [vmem:[#allocation11 + $0xd0] sm:$0xf0] }
  0x92   :  { %2557 = vmatpush.bf16.msrb.mxu0 %v4777_v1  ;;  %v4441_v1 = vor.u32 %v5780_v57, %v4440_v54  ;;  %v4680_v8 = vld [vmem:[#allocation11 + $0x200] sm:$0xf]  ;;  %v5872_v13 = vld [vmem:[#allocation11 + $0x30c] sm:$0xf0]  ;;  %v4425_v17 = vor.u32 %v5776_v6, %v4424_v2  ;;  %v4650_v62 = vld [vmem:[#allocation11 + $0x1d0] sm:$0xf0] }
  0x93   :  { %2532 = vmatpush.bf16.msrb.mxu1 %v4505_v10  ;;  %v5048_v10 = vld [vmem:[#allocation11 + $0x4e0] sm:$0xf]  ;;  %v5812_v24 = vld [vmem:[#allocation11 + $0x12c] sm:$0xf0]  ;;  %v4653_v63 = vor.u32 %v5830_v61, %v4650_v62 }
  0x94   :  { %945 = vmatmul.bf16.vlgmr.msra.gmra.mxu3 %v6433_v14  ;;  %4420 = vmatmul.msk.bf16.vlgmr.msra.gmra.mxu1 %vm829_vm10, %v6452_v48  ;;  %v5848_v14 = vld [vmem:[#allocation11 + $0x24c] sm:$0xf0]  ;;  %v1050_v48 = vperm.slane %v6467_v39, 1  ;;  %v4808_v12 = vld [vmem:[#allocation11 + $0x300] sm:$0xf]  ;;  %v5049_v23 = vor.u32 %v5932_v11, %v5048_v10 }
  0x95   :  { %2543 = vmatpush.bf16.msrb.mxu3 %v4665_v16  ;;  %2571 = vmatpush.bf16.msrb.mxu2 %v4889_v18  ;;  %v4713_v55 = vor.u32 %v5848_v14, %v4712_v50  ;;  %v4538_v16 = vld [vmem:[#allocation11 + $0xf0] sm:$0xf0]  ;;  %v4681_v18 = vor.u32 %v5840_v9, %v4680_v8  ;;  %v4568_v22 = vld [vmem:[#allocation11 + $0x120] sm:$0xf]  ;;  %v5928_v26 = vld [vmem:[#allocation11 + $0x4cc] sm:$0xf0] }
  0x96   :  { %2558 = vmatpush.bf16.msrb.mxu0 %v4761_v15  ;;  %1055 = vperm.xlu0 %6127, %v1050_v48   ;;  %v5802_v15 = vld [vmem:[#allocation11 + $0xe4] sm:$0xf]  ;;  %v5032_v25 = vld [vmem:[#allocation11 + $0x4c0] sm:$0xf]  ;;  %v4569_v29 = vor.u32 %v5812_v24, %v4568_v22  ;;  %v5924_v35 = vld [vmem:[#allocation11 + $0x4ac] sm:$0xf0] }
  0x97   :  { %2533 = vmatpush.bf16.msrb.mxu1 %v4489_v27  ;;  %v4809_v27 = vor.u32 %v5872_v13, %v4808_v12  ;;  %v4541_v28 = vor.u32 %v5802_v15, %v4538_v16  ;;  %v5033_v31 = vor.u32 %v5928_v26, %v5032_v25  ;;  %v5016_v34 = vld [vmem:[#allocation11 + $0x4a0] sm:$0xf]  ;;  %v5964_v38 = vld [vmem:[#allocation11 + $0x5ec] sm:$0xf0]  ;;  %v4506_v9 = vld [vmem:[#allocation11 + $0xb0] sm:$0xf0] }
  0x98   :  { %v5176_v36 = vld [vmem:[#allocation11 + $0x5e0] sm:$0xf]  ;;  %v5017_v41 = vor.u32 %v5924_v35, %v5016_v34  ;;  %v5920_v45 = vld [vmem:[#allocation11 + $0x48c] sm:$0xf0]  ;;  %v5826_v10 = vld [vmem:[#allocation11 + $0x1a4] sm:$0xf] }
  0x99   :  { %2544 = vmatpush.bf16.msrb.mxu3 %v4649_v30  ;;  %2572 = vmatpush.bf16.msrb.mxu2 %v4873_v33  ;;  %v4552_v30 = vld [vmem:[#allocation11 + $0x100] sm:$0xf]  ;;  %v5808_v33 = vld [vmem:[#allocation11 + $0x10c] sm:$0xf0]  ;;  %v5177_v43 = vor.u32 %v5964_v38, %v5176_v36  ;;  %v4634_v11 = vld [vmem:[#allocation11 + $0x1b0] sm:$0xf0] }
  0x9a   :  { %2559 = vmatpush.bf16.msrb.mxu0 %v4745_v47  ;;  %v4669_v47 = vor.u32 %v5834_v19, %v4666_v20  ;;  %v4553_v40 = vor.u32 %v5808_v33, %v4552_v30  ;;  %v5144_v50 = vld [vmem:[#allocation11 + $0x5a0] sm:$0xf]  ;;  %v5956_v14 = vld [vmem:[#allocation11 + $0x5ac] sm:$0xf0]  ;;  %v4637_v13 = vor.u32 %v5826_v10, %v4634_v11  ;;  %v5790_v20 = vld [vmem:[#allocation11 + $0x84] sm:$0xf] }
  0x9b   :  { %2534 = vmatpush.bf16.msrb.mxu1 %v4473_v44  ;;  %v5000_v44 = vld [vmem:[#allocation11 + $0x480] sm:$0xf]  ;;  %v5145_v51 = vor.u32 %v5956_v14, %v5144_v50  ;;  %v5952_v48 = vld [vmem:[#allocation11 + $0x58c] sm:$0xf0]  ;;  %v5822_v24 = vld [vmem:[#allocation11 + $0x184] sm:$0xf] }
  0x9c   :  { %v5001_v42 = vor.u32 %v5920_v45, %v5000_v44  ;;  %v5128_v52 = vld [vmem:[#allocation11 + $0x580] sm:$0xf]  ;;  %v5916_v54 = vld [vmem:[#allocation11 + $0x46c] sm:$0xf0]  ;;  %v4618_v25 = vld [vmem:[#allocation11 + $0x190] sm:$0xf0] }
  0x9d   :  { %2545 = vmatpush.bf16.msrb.mxu3 %v4633_v37  ;;  %2573 = vmatpush.bf16.msrb.mxu2 %v4857_v49  ;;  %v5960_v37 = vld [vmem:[#allocation11 + $0x5cc] sm:$0xf0]  ;;  %v5129_v53 = vor.u32 %v5952_v48, %v5128_v52  ;;  %v4968_v0 = vld [vmem:[#allocation11 + $0x440] sm:$0xf]  ;;  %v4621_v26 = vor.u32 %v5822_v24, %v4618_v25  ;;  %v5786_v33 = vld [vmem:[#allocation11 + $0x64] sm:$0xf] }
  0x9e   :  { %2560 = vmatpush.bf16.msrb.mxu0 %v4729_v46  ;;  %v5160_v46 = vld [vmem:[#allocation11 + $0x5c0] sm:$0xf]  ;;  %v5948_v57 = vld [vmem:[#allocation11 + $0x56c] sm:$0xf0]  ;;  %v4474_v35 = vld [vmem:[#allocation11 + $0x70] sm:$0xf0] }
  0x9f   :  { %2535 = vmatpush.bf16.msrb.mxu1 %v4457_v32  ;;  %v5161_v49 = vor.u32 %v5960_v37, %v5160_v46  ;;  %v4984_v32 = vld [vmem:[#allocation11 + $0x460] sm:$0xf]  ;;  %v5944_v6 = vld [vmem:[#allocation11 + $0x54c] sm:$0xf0]  ;;  %v5818_v36 = vld [vmem:[#allocation11 + $0x164] sm:$0xf] }
  0xa0   :  { %v5096_v2 = vld [vmem:[#allocation11 + $0x540] sm:$0xf]  ;;  %v5908_v16 = vld [vmem:[#allocation11 + $0x42c] sm:$0xf0]  ;;  %v4602_v38 = vld [vmem:[#allocation11 + $0x170] sm:$0xf0] }
  0xa1   :  { %2546 = vmatpush.bf16.msrb.mxu3 %v4617_v56  ;;  %2574 = vmatpush.bf16.msrb.mxu2 %v4841_v58  ;;  %v4985_v56 = vor.u32 %v5916_v54, %v4984_v32  ;;  %v5798_v58 = vld [vmem:[#allocation11 + $0xc4] sm:$0xf]  ;;  %v5097_v8 = vor.u32 %v5944_v6, %v5096_v2  ;;  %v4952_v15 = vld [vmem:[#allocation11 + $0x420] sm:$0xf]  ;;  %v5940_v19 = vld [vmem:[#allocation11 + $0x52c] sm:$0xf0] }
  0xa2   :  { %2561 = vmatpush.bf16.msrb.mxu0 %v4713_v55  ;;  %v5112_v55 = vld [vmem:[#allocation11 + $0x560] sm:$0xf]  ;;  %v4525_v60 = vor.u32 %v5798_v58, %v4522_v4  ;;  %v1043_v44 = vperm.slane %v6467_v39, 0  ;;  %v5782_v45 = vld [vmem:[#allocation11 + $0x44] sm:$0xf]  ;;  %v1092_v14 = vperm.slane %v6467_v39, 7 }
  0xa3   :  { %2536 = vmatpush.bf16.msrb.mxu1 %v4441_v1  ;;  %v5113_v59 = vor.u32 %v5948_v57, %v5112_v55  ;;  %v5912_v1 = vld [vmem:[#allocation11 + $0x44c] sm:$0xf0]  ;;  %v4458_v46 = vld [vmem:[#allocation11 + $0x50] sm:$0xf0]  ;;  %v5814_v37 = vld [vmem:[#allocation11 + $0x144] sm:$0xf] }
  0xa4   :  { %1048 = vperm.xlu1 %6128, %v1043_v44   ;;  %v5778_v52 = vld [vmem:[#allocation11 + $0x24] sm:$0xf]  ;;  %v4442_v48 = vld [vmem:[#allocation11 + $0x30] sm:$0xf0] }
  0xa5   :  { %2547 = vmatpush.bf16.msrb.mxu3 %v4601_v5  ;;  %2575 = vmatpush.bf16.msrb.mxu2 %v4825_v7  ;;  %v4969_v5 = vor.u32 %v5912_v1, %v4968_v0  ;;  %v5794_v7 = vld [vmem:[#allocation11 + $0xa4] sm:$0xf]  ;;  %v4445_v32 = vor.u32 %v5778_v52, %v4442_v48  ;;  %v4570_v54 = vld [vmem:[#allocation11 + $0x130] sm:$0xf0] }
  0xa6   :  { %2562 = vmatpush.bf16.msrb.mxu0 %v4697_v3  ;;  %v1057_v3 = vperm.slane %v6467_v39, 2  ;;  %v4509_v12 = vor.u32 %v5794_v7, %v4506_v9  ;;  %v5774_v57 = vld [vmem:[#allocation11 + $0x4] sm:$0xf]  ;;  %v4426_v58 = vld [vmem:[#allocation11 + $0x10] sm:$0xf0]  ;;  %v1071_v9 = vperm.slane %v6467_v39, 4 }
  0xa7   :  { %2537 = vmatpush.bf16.msrb.mxu1 %v4425_v17  ;;  %v5080_v17 = vld [vmem:[#allocation11 + $0x520] sm:$0xf]  ;;  %v5806_v4 = vld [vmem:[#allocation11 + $0x104] sm:$0xf]  ;;  %v4794_v1 = vld [vmem:[#allocation11 + $0x2f0] sm:$0xf0] }
  0xa8   :  { %1062 = vperm.xlu0 %6127, %v1057_v3   ;;  %v5081_v22 = vor.u32 %v5940_v19, %v5080_v17  ;;  %v5866_v0 = vld [vmem:[#allocation11 + $0x2e4] sm:$0xf]  ;;  %v4922_v11 = vld [vmem:[#allocation11 + $0x3f0] sm:$0xf0] }
  0xa9   :  { %2548 = vmatpush.bf16.msrb.mxu3 %v4585_v21  ;;  %2576 = vmatpush.bf16.msrb.mxu2 %v4809_v27  ;;  %v4490_v21 = vld [vmem:[#allocation11 + $0x90] sm:$0xf0]  ;;  %v4936_v27 = vld [vmem:[#allocation11 + $0x400] sm:$0xf]  ;;  %v5862_v7 = vld [vmem:[#allocation11 + $0x2c4] sm:$0xf] }
  0xaa   :  { %2563 = vmatpush.bf16.msrb.mxu0 %v4681_v18  ;;  %v4953_v18 = vor.u32 %v5908_v16, %v4952_v15  ;;  %v5898_v10 = vld [vmem:[#allocation11 + $0x3e4] sm:$0xf]  ;;  %v4762_v17 = vld [vmem:[#allocation11 + $0x2b0] sm:$0xf0] }
  0xab   :  { %2582 = vmatpush.bf16.msra.mxu1 %v5049_v23  ;;  %v4493_v23 = vor.u32 %v5790_v20, %v4490_v21  ;;  %v5858_v16 = vld [vmem:[#allocation11 + $0x2a4] sm:$0xf]  ;;  %v4925_v19 = vor.u32 %v5898_v10, %v4922_v11  ;;  %v5178_v25 = vld [vmem:[#allocation11 + $0x5f0] sm:$0xf0] }
  0xac   :  { %v5894_v20 = vld [vmem:[#allocation11 + $0x3c4] sm:$0xf]  ;;  %v4842_v11 = vld [vmem:[#allocation11 + $0x350] sm:$0xf0] }
  0xad   :  { %2621 = vmatpush.bf16.msra.mxu2 %v4669_v47  ;;  %2549 = vmatpush.bf16.msrb.mxu3 %v4569_v29  ;;  %v5064_v47 = vld [vmem:[#allocation11 + $0x500] sm:$0xf]  ;;  %v1078_v29 = vperm.slane %v6467_v39, 5  ;;  %v5962_v24 = vld [vmem:[#allocation11 + $0x5e4] sm:$0xf] }
  0xae   :  { %2608 = vmatpush.bf16.msra.mxu0 %v4541_v28  ;;  %v5904_v28 = vld [vmem:[#allocation11 + $0x40c] sm:$0xf0]  ;;  %v5850_v44 = vld [vmem:[#allocation11 + $0x264] sm:$0xf] }
  0xaf   :  { %2583 = vmatpush.bf16.msra.mxu1 %v5033_v31  ;;  %v4937_v30 = vor.u32 %v5904_v28, %v4936_v27  ;;  %v5936_v31 = vld [vmem:[#allocation11 + $0x50c] sm:$0xf0]  ;;  %v4765_v27 = vor.u32 %v5858_v16, %v4762_v17  ;;  %v5878_v10 = vld [vmem:[#allocation11 + $0x344] sm:$0xf]  ;;  %v5114_v17 = vld [vmem:[#allocation11 + $0x570] sm:$0xf0] }
  0xb0   :  { %v5065_v34 = vor.u32 %v5936_v31, %v5064_v47  ;;  %1083 = vperm.xlu0 %6127, %v1078_v29   ;;  %v5854_v47 = vld [vmem:[#allocation11 + $0x284] sm:$0xf]  ;;  %v4746_v29 = vld [vmem:[#allocation11 + $0x290] sm:$0xf0] }
  0xb1   :  { %2550 = vmatpush.bf16.msrb.mxu3 %v4553_v40  ;;  %2622 = vmatpush.bf16.msra.mxu2 %v4653_v63  ;;  %v1064_v63 = vperm.slane %v6467_v39, 3  ;;  %v5890_v31 = vld [vmem:[#allocation11 + $0x3a4] sm:$0xf] }
  0xb2   :  { %2609 = vmatpush.bf16.msra.mxu0 %v4525_v60  ;;  %v4554_v60 = vld [vmem:[#allocation11 + $0x110] sm:$0xf0]  ;;  %v5946_v16 = vld [vmem:[#allocation11 + $0x564] sm:$0xf] }
  0xb3   :  { %2584 = vmatpush.bf16.msra.mxu1 %v5017_v41  ;;  %v4477_v41 = vor.u32 %v5786_v33, %v4474_v35  ;;  %v4557_v61 = vor.u32 %v5806_v4, %v4554_v60  ;;  %1069 = vperm.xlu2 %6129, %v1064_v63   ;;  %v5181_v33 = vor.u32 %v5962_v24, %v5178_v25  ;;  %v4858_v4 = vld [vmem:[#allocation11 + $0x370] sm:$0xf0]  ;;  %v5874_v25 = vld [vmem:[#allocation11 + $0x324] sm:$0xf] }
  0xb4   :  { %v5018_v24 = vld [vmem:[#allocation11 + $0x4b0] sm:$0xf0] }
  0xb5   :  { %2595 = vmatpush.bf16.msra.mxu3 %v5177_v43  ;;  %2623 = vmatpush.bf16.msra.mxu2 %v4637_v13  ;;  %v4605_v43 = vor.u32 %v5818_v36, %v4602_v38  ;;  %v4890_v36 = vld [vmem:[#allocation11 + $0x3b0] sm:$0xf0]  ;;  %v5958_v38 = vld [vmem:[#allocation11 + $0x5c4] sm:$0xf] }
  0xb6   :  { %2610 = vmatpush.bf16.msra.mxu0 %v4509_v12 }
  0xb7   :  { %2585 = vmatpush.bf16.msra.mxu1 %v5001_v42  ;;  %v4461_v42 = vor.u32 %v5782_v45, %v4458_v46  ;;  %v4730_v45 = vld [vmem:[#allocation11 + $0x270] sm:$0xf0] }
  0xb8   :  { %1097 = vperm.xlu0 %6127, %v1092_v14   ;;  %v5954_v14 = vld [vmem:[#allocation11 + $0x5a4] sm:$0xf]  ;;  %v4733_v48 = vor.u32 %v5850_v44, %v4730_v45  ;;  %v4810_v45 = vld [vmem:[#allocation11 + $0x310] sm:$0xf0] }
  0xb9   :  { %2596 = vmatpush.bf16.msra.mxu3 %v5161_v49  ;;  %2624 = vmatpush.bf16.msra.mxu2 %v4621_v26  ;;  %v4586_v49 = vld [vmem:[#allocation11 + $0x150] sm:$0xf0]  ;;  %v5870_v44 = vld [vmem:[#allocation11 + $0x304] sm:$0xf] }
  0xba   :  { %2611 = vmatpush.bf16.msra.mxu0 %v4493_v23  ;;  %v4589_v50 = vor.u32 %v5814_v37, %v4586_v49  ;;  %v4893_v37 = vor.u32 %v5890_v31, %v4890_v36  ;;  %v5098_v31 = vld [vmem:[#allocation11 + $0x550] sm:$0xf0] }
  0xbb   :  { %2586 = vmatpush.bf16.msra.mxu1 %v4985_v56  ;;  %1076 = vperm.xlu2 %6129, %v1071_v9   ;;  %v5034_v9 = vld [vmem:[#allocation11 + $0x4d0] sm:$0xf0] }
  0xbd   :  { %2597 = vmatpush.bf16.msra.mxu3 %v5145_v51  ;;  %2625 = vmatpush.bf16.msra.mxu2 %v4605_v43  ;;  %v4749_v43 = vor.u32 %v5854_v47, %v4746_v29 }
  0xbe   :  { %2612 = vmatpush.bf16.msra.mxu0 %v4477_v41 }
  0xbf   :  { %2587 = vmatpush.bf16.msra.mxu1 %v4969_v5  ;;  %v4797_v5 = vor.u32 %v5866_v0, %v4794_v1  ;;  %v5842_v0 = vld [vmem:[#allocation11 + $0x224] sm:$0xf]  ;;  %v4698_v1 = vld [vmem:[#allocation11 + $0x230] sm:$0xf0] }
  0xc1   :  { %2598 = vmatpush.bf16.msra.mxu3 %v5129_v53  ;;  %2626 = vmatpush.bf16.msra.mxu2 %v4589_v50  ;;  %v5810_v53 = vld [vmem:[#allocation11 + $0x124] sm:$0xf] }
  0xc2   :  { %2613 = vmatpush.bf16.msra.mxu0 %v4461_v42  ;;  %v4573_v56 = vor.u32 %v5810_v53, %v4570_v54  ;;  %v5886_v42 = vld [vmem:[#allocation11 + $0x384] sm:$0xf] }
  0xc3   :  { %2588 = vmatpush.bf16.msra.mxu1 %v4953_v18  ;;  %v5846_v53 = vld [vmem:[#allocation11 + $0x244] sm:$0xf] }
  0xc5   :  { %2599 = vmatpush.bf16.msra.mxu3 %v5113_v59  ;;  %2627 = vmatpush.bf16.msra.mxu2 %v4573_v56  ;;  %v4429_v59 = vor.u32 %v5774_v57, %v4426_v58  ;;  %v5050_v57 = vld [vmem:[#allocation11 + $0x4f0] sm:$0xf0]  ;;  %v5882_v58 = vld [vmem:[#allocation11 + $0x364] sm:$0xf] }
  0xc6   :  { %2614 = vmatpush.bf16.msra.mxu0 %v4445_v32  ;;  %v4714_v32 = vld [vmem:[#allocation11 + $0x250] sm:$0xf0] }
  0xc7   :  { %2589 = vmatpush.bf16.msra.mxu1 %v4937_v30  ;;  %v4717_v60 = vor.u32 %v5846_v53, %v4714_v32  ;;  %v4544_v53 = vld [vmem:[#allocation11 + $0xe8] sm:$0xf]  ;;  %v5805_v32 = vld [vmem:[#allocation11 + $0xf4] sm:$0xf0] }
  0xc9   :  { %2600 = vmatpush.bf16.msra.mxu3 %v5097_v8  ;;  %2628 = vmatpush.bf16.msra.mxu2 %v4557_v61  ;;  %v4778_v8 = vld [vmem:[#allocation11 + $0x2d0] sm:$0xf0]  ;;  %v5950_v61 = vld [vmem:[#allocation11 + $0x584] sm:$0xf] }
  0xca   :  { %2615 = vmatpush.bf16.msra.mxu0 %v4429_v59  ;;  %v4781_v13 = vor.u32 %v5862_v7, %v4778_v8  ;;  %v5926_v7 = vld [vmem:[#allocation11 + $0x4c4] sm:$0xf] }
  0xcd   :  { %2601 = vmatpush.bf16.msra.mxu3 %v5081_v22  ;;  %v4906_v22 = vld [vmem:[#allocation11 + $0x3d0] sm:$0xf0] }
  0xce   :  { %v4909_v30 = vor.u32 %v5894_v20, %v4906_v22  ;;  %v5037_v20 = vor.u32 %v5926_v7, %v5034_v9  ;;  %v4845_v22 = vor.u32 %v5878_v10, %v4842_v11  ;;  %v4970_v7 = vld [vmem:[#allocation11 + $0x450] sm:$0xf0]  ;;  %v4528_v9 = vld [vmem:[#allocation11 + $0xc8] sm:$0xf]  ;;  %v5801_v10 = vld [vmem:[#allocation11 + $0xd4] sm:$0xf0] }
  0xd1   :  { %2602 = vmatpush.bf16.msra.mxu3 %v5065_v34  ;;  %v1085_v34 = vperm.slane %v6467_v39, 6  ;;  %v4874_v39 = vld [vmem:[#allocation11 + $0x390] sm:$0xf0] }
  0xd2   :  { %v4877_v54 = vor.u32 %v5886_v42, %v4874_v39  ;;  %v5837_v42 = vld [vmem:[#allocation11 + $0x1f4] sm:$0xf0]  ;;  %v5938_v39 = vld [vmem:[#allocation11 + $0x524] sm:$0xf] }
  0xd3   :  { %1090 = vperm.xlu2 %6129, %v1085_v34  }
  0xdf   :  { %v842_v40 = vpop.f32.mrf.mxu0 }
  0xe5   :  { %v868_v51 = vpop.f32.mrf.mxu2 }
  0xe7   :  { %v844_v55 = vpop.f32.mrf.mxu0 }
  0xe8   :  { %v5930_v55 = vld [vmem:[#allocation11 + $0x4e4] sm:$0xf] }
  0xed   :  { %v870_v62 = vpop.f32.mrf.mxu2 }
  0xee   :  { %v5130_v62 = vld [vmem:[#allocation11 + $0x590] sm:$0xf0] }
  0xf1   :  { %v855_v2 = vpop.f32.mrf.mxu1 }
  0xf2   :  { %v856_v3 = vadd.f32 %v855_v2, %v842_v40  ;;  %v5162_v40 = vld [vmem:[#allocation11 + $0x5d0] sm:$0xf0] }
  0xf3   :  { %v5165_v49 = vor.u32 %v5958_v38, %v5162_v40  ;;  %v5918_v40 = vld [vmem:[#allocation11 + $0x484] sm:$0xf] }
  0xf4   :  { %v6480_v6 = vpack.c.bf16 %v856_v3, %v856_v3  ;;  %v5053_v3 = vor.u32 %v5930_v55, %v5050_v57  ;;  %v4656_v55 = vld [vmem:[#allocation11 + $0x1c8] sm:$0xf] }
  0xf6   :  { %7517 = vst [vmem:[#allocation20_spill] sm:$0xff] %v6480_v6  ;;  %2538 = vmatmul.bf16.vlgmr.msrb.gmra.mxu1 %v6480_v6 }
  0xf7   :  { %v881_v12 = vpop.f32.mrf.mxu3  ;;  %2634 = vmatpush.bf16.msrb.mxu1 %v4797_v5  ;;  %v4861_v5 = vor.u32 %v5882_v58, %v4858_v4  ;;  %v5833_v4 = vld [vmem:[#allocation11 + $0x1d4] sm:$0xf0] }
  0xf8   :  { %v882_v15 = vadd.f32 %v881_v12, %v868_v51  ;;  %v5146_v51 = vld [vmem:[#allocation11 + $0x5b0] sm:$0xf0]  ;;  %v5133_v12 = vor.u32 %v5950_v61, %v5130_v62  ;;  %v4928_v62 = vld [vmem:[#allocation11 + $0x3e8] sm:$0xf]  ;;  %v4657_v11 = vor.u32 %v5833_v4, %v4656_v55  ;;  %v5865_v55 = vld [vmem:[#allocation11 + $0x2d4] sm:$0xf0] }
  0xf9   :  { %v857_v18 = vpop.f32.mrf.mxu1  ;;  %v933_v23 = vpop.f32.mrf.mxu2  ;;  %v5149_v56 = vor.u32 %v5954_v14, %v5146_v51  ;;  %v4813_v51 = vor.u32 %v5870_v44, %v4810_v45  ;;  %v4800_v45 = vld [vmem:[#allocation11 + $0x2e8] sm:$0xf] }
  0xfa   :  { %v6484_v21 = vpack.c.bf16 %v882_v15, %v882_v15  ;;  %v4701_v15 = vor.u32 %v5842_v0, %v4698_v1  ;;  %v5838_v18 = vld [vmem:[#allocation11 + $0x204] sm:$0xf]  ;;  %v4545_v1 = vor.u32 %v5805_v32, %v4544_v53  ;;  %v5789_v53 = vld [vmem:[#allocation11 + $0x74] sm:$0xf0]  ;;  %v4864_v4 = vld [vmem:[#allocation11 + $0x368] sm:$0xf] }
  0xfb   :  { %2635 = vmatpush.bf16.msrb.mxu1 %v4781_v13 }
  0xfc   :  { %7518 = vst [vmem:[#allocation21_spill] sm:$0xff] %v6484_v21  ;;  %v920_v26 = vpop.f32.mrf.mxu0  ;;  %2551 = vmatmul.bf16.vlgmr.msrb.gmra.mxu3 %v6484_v21 }
  0xfd   :  { %v934_v28 = vadd.f32 %v933_v23, %v920_v26  ;;  %2647 = vmatpush.bf16.msrb.mxu3 %v4925_v19  ;;  %v4682_v19 = vld [vmem:[#allocation11 + $0x210] sm:$0xf0]  ;;  %v5922_v23 = vld [vmem:[#allocation11 + $0x4a4] sm:$0xf] }
  0xfe   :  { %v4826_v26 = vld [vmem:[#allocation11 + $0x330] sm:$0xf0]  ;;  %v4685_v29 = vor.u32 %v5838_v18, %v4682_v19  ;;  %v5021_v34 = vor.u32 %v5922_v23, %v5018_v24  ;;  %v5897_v18 = vld [vmem:[#allocation11 + $0x3d4] sm:$0xf0]  ;;  %v4512_v24 = vld [vmem:[#allocation11 + $0xa8] sm:$0xf] }
  0xff   :  { %v6488_v35 = vpack.c.bf16 %v934_v28, %v934_v28  ;;  %v883_v41 = vpop.f32.mrf.mxu3  ;;  %2636 = vmatpush.bf16.msrb.mxu1 %v4765_v27  ;;  %v5117_v27 = vor.u32 %v5946_v16, %v5114_v17  ;;  %v4829_v38 = vor.u32 %v5874_v25, %v4826_v26  ;;  %v4912_v17 = vld [vmem:[#allocation11 + $0x3c8] sm:$0xf]  ;;  %v4954_v23 = vld [vmem:[#allocation11 + $0x430] sm:$0xf0]  ;;  %v5797_v25 = vld [vmem:[#allocation11 + $0xb4] sm:$0xf0] }
 0x100   :  { %v5002_v41 = vld [vmem:[#allocation11 + $0x490] sm:$0xf0] }
 0x101   :  { %7519 = vst [vmem:[#allocation22_spill] sm:$0xff] %v6488_v35  ;;  %2577 = vmatmul.bf16.vlgmr.msrb.gmra.mxu2 %v6488_v35  ;;  %v894_v46 = vpop.f32.mrf.mxu1  ;;  %2648 = vmatpush.bf16.msrb.mxu3 %v4909_v30  ;;  %v935_v50 = vpop.f32.mrf.mxu2  ;;  %v5942_v30 = vld [vmem:[#allocation11 + $0x544] sm:$0xf]  ;;  %v5005_v14 = vor.u32 %v5918_v40, %v5002_v41  ;;  %v4496_v40 = vld [vmem:[#allocation11 + $0x88] sm:$0xf] }
 0x102   :  { %2673 = vmatpush.bf16.msrb.mxu2 %v5181_v33  ;;  %v5082_v50 = vld [vmem:[#allocation11 + $0x530] sm:$0xf0]  ;;  %v5793_v41 = vld [vmem:[#allocation11 + $0x94] sm:$0xf0] }
 0x103   :  { %2637 = vmatpush.bf16.msrb.mxu1 %v4749_v43 }
 0x104   :  { %v922_v52 = vpop.f32.mrf.mxu0 }
 0x105   :  { %2649 = vmatpush.bf16.msrb.mxu3 %v4893_v37  ;;  %v5101_v37 = vor.u32 %v5942_v30, %v5098_v31  ;;  %v5914_v52 = vld [vmem:[#allocation11 + $0x464] sm:$0xf]  ;;  %v4896_v30 = vld [vmem:[#allocation11 + $0x3a8] sm:$0xf]  ;;  %v5893_v31 = vld [vmem:[#allocation11 + $0x3b4] sm:$0xf0] }
 0x106   :  { %2674 = vmatpush.bf16.msrb.mxu2 %v5165_v49 }
 0x107   :  { %v907_v59 = vpop.f32.mrf.mxu3  ;;  %2638 = vmatpush.bf16.msrb.mxu1 %v4733_v48  ;;  %v4986_v48 = vld [vmem:[#allocation11 + $0x470] sm:$0xf0] }
 0x108   :  { %v908_v63 = vadd.f32 %v907_v59, %v894_v46  ;;  %v4672_v46 = vld [vmem:[#allocation11 + $0x1e8] sm:$0xf]  ;;  %v5934_v59 = vld [vmem:[#allocation11 + $0x504] sm:$0xf]  ;;  %v4989_v0 = vor.u32 %v5914_v52, %v4986_v48 }
 0x109   :  { %v896_v2 = vpop.f32.mrf.mxu1  ;;  %2650 = vmatpush.bf16.msrb.mxu3 %v4877_v54  ;;  %v4673_v54 = vor.u32 %v5837_v42, %v4672_v46  ;;  %v5869_v46 = vld [vmem:[#allocation11 + $0x2f4] sm:$0xf0]  ;;  %v4480_v48 = vld [vmem:[#allocation11 + $0x68] sm:$0xf] }
 0x10a   :  { %2675 = vmatpush.bf16.msrb.mxu2 %v5149_v56  ;;  %v6491_v8 = vpack.c.bf16 %v908_v63, %v908_v63  ;;  %v5085_v56 = vor.u32 %v5938_v39, %v5082_v50  ;;  %v5901_v63 = vld [vmem:[#allocation11 + $0x3f4] sm:$0xf0]  ;;  %v5910_v2 = vld [vmem:[#allocation11 + $0x444] sm:$0xf]  ;;  %v4880_v39 = vld [vmem:[#allocation11 + $0x388] sm:$0xf]  ;;  %v4801_v52 = vor.u32 %v5869_v46, %v4800_v45 }
 0x10b   :  { %2639 = vmatpush.bf16.msrb.mxu1 %v4717_v60  ;;  %v5066_v60 = vld [vmem:[#allocation11 + $0x510] sm:$0xf0]  ;;  %v4929_v16 = vor.u32 %v5901_v63, %v4928_v62  ;;  %v4973_v19 = vor.u32 %v5910_v2, %v4970_v7  ;;  %v5821_v42 = vld [vmem:[#allocation11 + $0x174] sm:$0xf0]  ;;  %v4464_v62 = vld [vmem:[#allocation11 + $0x48] sm:$0xf] }
 0x10c   :  { %7520 = vst [vmem:[#allocation23_spill] sm:$0xff] %v6491_v8  ;;  %v985_v13 = vpop.f32.mrf.mxu0  ;;  %2564 = vmatmul.bf16.vlgmr.msrb.gmra.mxu0 %v6491_v8  ;;  %v5889_v50 = vld [vmem:[#allocation11 + $0x394] sm:$0xf0]  ;;  %v4816_v46 = vld [vmem:[#allocation11 + $0x308] sm:$0xf] }
 0x10d   :  { %2660 = vmatpush.bf16.msrb.mxu0 %v5053_v3  ;;  %2651 = vmatpush.bf16.msrb.mxu3 %v4861_v5  ;;  %v5785_v63 = vld [vmem:[#allocation11 + $0x54] sm:$0xf0] }
 0x10e   :  { %2676 = vmatpush.bf16.msrb.mxu2 %v5133_v12  ;;  %v5069_v12 = vor.u32 %v5934_v59, %v5066_v60  ;;  %v5885_v59 = vld [vmem:[#allocation11 + $0x374] sm:$0xf0]  ;;  %v4481_v60 = vor.u32 %v5789_v53, %v4480_v48 }
 0x10f   :  { %v909_v28 = vpop.f32.mrf.mxu3  ;;  %v972_v47 = vpop.f32.mrf.mxu2  ;;  %2640 = vmatpush.bf16.msrb.mxu1 %v4701_v15  ;;  %v5829_v15 = vld [vmem:[#allocation11 + $0x1b4] sm:$0xf0] }
 0x110   :  { %v986_v33 = vadd.f32 %v985_v13, %v972_v47  ;;  %v4640_v13 = vld [vmem:[#allocation11 + $0x1a8] sm:$0xf]  ;;  %v5825_v47 = vld [vmem:[#allocation11 + $0x194] sm:$0xf0] }
 0x111   :  { %2629 = vmatmul.bf16.vlgmr.msra.gmra.mxu2 %v6484_v21  ;;  %2661 = vmatpush.bf16.msrb.mxu0 %v5037_v20  ;;  %v959_v36 = vpop.f32.mrf.mxu1  ;;  %v4529_v20 = vor.u32 %v5801_v10, %v4528_v9  ;;  %v4641_v26 = vor.u32 %v5829_v15, %v4640_v13  ;;  %v4624_v28 = vld [vmem:[#allocation11 + $0x188] sm:$0xf]  ;;  %v5861_v2 = vld [vmem:[#allocation11 + $0x2b4] sm:$0xf0]  ;;  %v4865_v9 = vor.u32 %v5885_v59, %v4864_v4 }
 0x112   :  { %2652 = vmatpush.bf16.msrb.mxu3 %v4845_v22  ;;  %v6495_v43 = vpack.c.bf16 %v986_v33, %v986_v33  ;;  %2677 = vmatpush.bf16.msrb.mxu2 %v5117_v27  ;;  %v5906_v22 = vld [vmem:[#allocation11 + $0x424] sm:$0xf]  ;;  %v4625_v44 = vor.u32 %v5825_v47, %v4624_v28  ;;  %v5813_v7 = vld [vmem:[#allocation11 + $0x134] sm:$0xf0]  ;;  %v4848_v10 = vld [vmem:[#allocation11 + $0x348] sm:$0xf] }
 0x113   :  { %2641 = vmatpush.bf16.msrb.mxu1 %v4685_v29  ;;  %v4913_v29 = vor.u32 %v5897_v18, %v4912_v17  ;;  %v4957_v33 = vor.u32 %v5906_v22, %v4954_v23  ;;  %v4448_v13 = vld [vmem:[#allocation11 + $0x28] sm:$0xf]  ;;  %v5809_v22 = vld [vmem:[#allocation11 + $0x114] sm:$0xf0] }
 0x114   :  { %v987_v49 = vpop.f32.mrf.mxu0  ;;  %2603 = vmatmul.bf16.vlgmr.msra.gmra.mxu3 %v6495_v43  ;;  %v4752_v18 = vld [vmem:[#allocation11 + $0x288] sm:$0xf]  ;;  %v5961_v45 = vld [vmem:[#allocation11 + $0x5d4] sm:$0xf0] }
 0x115   :  { %2662 = vmatpush.bf16.msrb.mxu0 %v5021_v34  ;;  %v4513_v34 = vor.u32 %v5797_v25, %v4512_v24  ;;  %v4897_v49 = vor.u32 %v5893_v31, %v4896_v30  ;;  %v5184_v23 = vld [vmem:[#allocation11 + $0x5e8] sm:$0xf]  ;;  %v5965_v25 = vld [vmem:[#allocation11 + $0x5f4] sm:$0xf0] }
 0x116   :  { %2653 = vmatpush.bf16.msrb.mxu3 %v4829_v38  ;;  %2678 = vmatpush.bf16.msrb.mxu2 %v5101_v37  ;;  %v4938_v38 = vld [vmem:[#allocation11 + $0x410] sm:$0xf0]  ;;  %v4608_v37 = vld [vmem:[#allocation11 + $0x168] sm:$0xf]  ;;  %v5777_v30 = vld [vmem:[#allocation11 + $0x14] sm:$0xf0] }
 0x117   :  { %v946_v57 = vpop.f32.mrf.mxu3  ;;  %v974_v58 = vpop.f32.mrf.mxu2  ;;  %v4609_v32 = vor.u32 %v5821_v42, %v4608_v37  ;;  %v4432_v47 = vld [vmem:[#allocation11 + $0x8] sm:$0xf]  ;;  %v5873_v37 = vld [vmem:[#allocation11 + $0x314] sm:$0xf0] }
 0x118   :  { %v960_v61 = vadd.f32 %v959_v36, %v946_v57  ;;  %v5902_v36 = vld [vmem:[#allocation11 + $0x404] sm:$0xf]  ;;  %v5817_v57 = vld [vmem:[#allocation11 + $0x154] sm:$0xf0]  ;;  %v4881_v58 = vor.u32 %v5889_v50, %v4880_v39  ;;  %v4433_v42 = vor.u32 %v5777_v30, %v4432_v47  ;;  %v6510_v50 = vld [vmem:[#allocation11 + $0x4c8] sm:$0xf] }
 0x119   :  { %2663 = vmatpush.bf16.msrb.mxu0 %v5005_v14  ;;  %v961_v3 = vpop.f32.mrf.mxu1  ;;  %v4941_v14 = vor.u32 %v5902_v36, %v4938_v38  ;;  %v5056_v36 = vld [vmem:[#allocation11 + $0x4e8] sm:$0xf]  ;;  %v5933_v38 = vld [vmem:[#allocation11 + $0x4f4] sm:$0xf0]  ;;  %v6575_v47 = vld [vmem:[#allocation11 + $0x1ac] sm:$0xf] }
 0x11a   :  { %2654 = vmatpush.bf16.msrb.mxu3 %v4813_v51  ;;  %v6498_v5 = vpack.c.bf16 %v960_v61, %v960_v61  ;;  %2679 = vmatpush.bf16.msrb.mxu2 %v5085_v56  ;;  %v4497_v51 = vor.u32 %v5793_v41, %v4496_v40  ;;  %v4592_v56 = vld [vmem:[#allocation11 + $0x148] sm:$0xf]  ;;  %v5185_v40 = vor.u32 %v5965_v25, %v5184_v23  ;;  %v6508_v39 = vld [vmem:[#allocation11 + $0x254] sm:$0xf0]  ;;  %v6567_v25 = vld [vmem:[#allocation11 + $0xac] sm:$0xf] }
 0x11b   :  { %v4576_v3 = vld [vmem:[#allocation11 + $0x128] sm:$0xf]  ;;  %v5057_v53 = vor.u32 %v5933_v38, %v5056_v36  ;;  %v6524_v4 = vld [vmem:[#allocation11 + $0x5b4] sm:$0xf0] }
 0x11c   :  { %7521 = vst [vmem:[#allocation24_spill] sm:$0xff] %v6498_v5  ;;  %2590 = vmatmul.bf16.vlgmr.msra.gmra.mxu1 %v6498_v5  ;;  %2616 = vmatmul.bf16.vlgmr.msra.gmra.mxu0 %v6480_v6  ;;  %v4577_v17 = vor.u32 %v5813_v7, %v4576_v3  ;;  %v5168_v41 = vld [vmem:[#allocation11 + $0x5c8] sm:$0xf]  ;;  %v6540_v3 = vld [vmem:[#allocation11 + $0xf8] sm:$0xf0] }
 0x11d   :  { %2664 = vmatpush.bf16.msrb.mxu0 %v4989_v0  ;;  %2686 = vmatpush.bf16.msra.mxu1 %v4545_v1  ;;  %v4593_v0 = vor.u32 %v5817_v57, %v4592_v56  ;;  %v4768_v1 = vld [vmem:[#allocation11 + $0x2a8] sm:$0xf]  ;;  %v5169_v56 = vor.u32 %v5961_v45, %v5168_v41  ;;  %v6586_v36 = vld [vmem:[#allocation11 + $0x434] sm:$0xf0]  ;;  %v6592_v41 = vld [vmem:[#allocation11 + $0x8c] sm:$0xf] }
 0x11e   :  { %2699 = vmatpush.bf16.msra.mxu3 %v4673_v54  ;;  %2680 = vmatpush.bf16.msrb.mxu2 %v5069_v12  ;;  %v4784_v54 = vld [vmem:[#allocation11 + $0x2c8] sm:$0xf]  ;;  %v4465_v12 = vor.u32 %v5785_v63, %v4464_v62  ;;  %v4769_v15 = vor.u32 %v5861_v2, %v4768_v1  ;;  %v6532_v63 = vld [vmem:[#allocation11 + $0x494] sm:$0xf0]  ;;  %v6538_v2 = vld [vmem:[#allocation11 + $0xec] sm:$0xf] }
 0x11f   :  { %v948_v27 = vpop.f32.mrf.mxu3  ;;  %v4785_v61 = vor.u32 %v5865_v55, %v4784_v54  ;;  %v6516_v54 = vld [vmem:[#allocation11 + $0x234] sm:$0xf0]  ;;  %v6518_v55 = vld [vmem:[#allocation11 + $0x5a8] sm:$0xf] }
 0x120   :  { %v5877_v27 = vld [vmem:[#allocation11 + $0x334] sm:$0xf0]  ;;  %v6520_v57 = vld [vmem:[#allocation11 + $0x4a8] sm:$0xf] }
 0x121   :  { %2665 = vmatpush.bf16.msrb.mxu0 %v4973_v19  ;;  %2687 = vmatpush.bf16.msra.mxu1 %v4529_v20  ;;  %v5857_v19 = vld [vmem:[#allocation11 + $0x294] sm:$0xf0]  ;;  %v4560_v20 = vld [vmem:[#allocation11 + $0x108] sm:$0xf] }
 0x122   :  { %2700 = vmatpush.bf16.msra.mxu3 %v4657_v11  ;;  %2725 = vmatpush.bf16.msra.mxu2 %v4929_v16  ;;  %v5881_v11 = vld [vmem:[#allocation11 + $0x354] sm:$0xf0]  ;;  %v4561_v31 = vor.u32 %v5809_v22, %v4560_v20  ;;  %v6526_v59 = vld [vmem:[#allocation11 + $0x208] sm:$0xf] }
 0x123   :  { %2681 = vmatmul.bf16.vlgmr.msrb.gmra.mxu2 %v6495_v43  ;;  %v5781_v16 = vld [vmem:[#allocation11 + $0x34] sm:$0xf0]  ;;  %v4849_v24 = vor.u32 %v5881_v11, %v4848_v10  ;;  %v6530_v62 = vld [vmem:[#allocation11 + $0x488] sm:$0xf]  ;;  %v5831_v11 = vld [vmem:[#allocation11 + $0x1cc] sm:$0xf] }
 0x124   :  { %2655 = vmatmul.bf16.vlgmr.msrb.gmra.mxu3 %v6488_v35  ;;  %v4449_v28 = vor.u32 %v5781_v16, %v4448_v13  ;;  %v6536_v1 = vld [vmem:[#allocation11 + $0x594] sm:$0xf0]  ;;  %v6553_v16 = vld [vmem:[#allocation11 + $0xd8] sm:$0xf0]  ;;  %v6563_v23 = vld [vmem:[#allocation11 + $0x548] sm:$0xf] }
 0x125   :  { %2666 = vmatpush.bf16.msrb.mxu0 %v4957_v33  ;;  %2688 = vmatpush.bf16.msra.mxu1 %v4513_v34  ;;  %v4736_v33 = vld [vmem:[#allocation11 + $0x268] sm:$0xf]  ;;  %v5853_v34 = vld [vmem:[#allocation11 + $0x274] sm:$0xf0] }
 0x126   :  { %2701 = vmatpush.bf16.msra.mxu3 %v4641_v26  ;;  %2726 = vmatpush.bf16.msra.mxu2 %v4913_v29  ;;  %v4832_v26 = vld [vmem:[#allocation11 + $0x328] sm:$0xf]  ;;  %v4753_v29 = vor.u32 %v5857_v19, %v4752_v18  ;;  %v4737_v48 = vor.u32 %v5853_v34, %v4736_v33  ;;  %v6544_v10 = vld [vmem:[#allocation11 + $0x474] sm:$0xf0] }
 0x127   :  { %v6549_v13 = vld [vmem:[#allocation11 + $0x574] sm:$0xf0]  ;;  %v6555_v18 = vld [vmem:[#allocation11 + $0x448] sm:$0xf] }
 0x128   :  { %v6557_v19 = vld [vmem:[#allocation11 + $0x454] sm:$0xf0]  ;;  %v6584_v34 = vld [vmem:[#allocation11 + $0x428] sm:$0xf] }
 0x129   :  { %2667 = vmatpush.bf16.msrb.mxu0 %v4941_v14  ;;  %2689 = vmatpush.bf16.msra.mxu1 %v4497_v51  ;;  %v6512_v14 = vld [vmem:[#allocation11 + $0x4d4] sm:$0xf0]  ;;  %v5835_v51 = vld [vmem:[#allocation11 + $0x1ec] sm:$0xf]  ;;  %v6588_v38 = vld [vmem:[#allocation11 + $0x528] sm:$0xf] }
 0x12a   :  { %2702 = vmatpush.bf16.msra.mxu3 %v4625_v44  ;;  %2727 = vmatpush.bf16.msra.mxu2 %v4897_v49  ;;  %v4833_v44 = vor.u32 %v5877_v27, %v4832_v26  ;;  %v6506_v49 = vld [vmem:[#allocation11 + $0x248] sm:$0xf]  ;;  %v5041_v22 = vor.u32 %v6512_v14, %v6510_v50  ;;  %v5153_v27 = vor.u32 %v6524_v4, %v6518_v55  ;;  %v6624_v55 = vld [vmem:[#allocation11 + $0x78] sm:$0xf0]  ;;  %v6633_v4 = vld [vmem:[#allocation11 + $0x16c] sm:$0xf] }
 0x12b   :  { %v4721_v20 = vor.u32 %v6508_v39, %v6506_v49  ;;  %v6604_v49 = vld [vmem:[#allocation11 + $0x18c] sm:$0xf]  ;;  %v6606_v39 = vld [vmem:[#allocation11 + $0x198] sm:$0xf0]  ;;  %7523 = vst [vmem:[#allocation26_spill] sm:$0xff] %v6624_v55 }
 0x12c   :  { %2642 = vmatmul.bf16.vlgmr.msrb.gmra.mxu1 %v6491_v8  ;;  %2668 = vmatmul.bf16.vlgmr.msrb.gmra.mxu0 %v6498_v5  ;;  %v6657_v50 = vld [vmem:[#allocation11 + $0x14c] sm:$0xf] }
 0x12d   :  { %2712 = vmatpush.bf16.msra.mxu0 %v4801_v52  ;;  %2690 = vmatpush.bf16.msra.mxu1 %v4481_v60  ;;  %v4674_v52 = vld [vmem:[#allocation11 + $0x1f8] sm:$0xf0]  ;;  %v6528_v60 = vld [vmem:[#allocation11 + $0x214] sm:$0xf0]  ;;  %v6705_v55 = vld [vmem:[#allocation11 + $0x3ac] sm:$0xf] }
 0x12e   :  { %2703 = vmatpush.bf16.msra.mxu3 %v4609_v32  ;;  %2728 = vmatpush.bf16.msra.mxu2 %v4881_v58  ;;  %v6514_v32 = vld [vmem:[#allocation11 + $0x228] sm:$0xf]  ;;  %v6522_v58 = vld [vmem:[#allocation11 + $0x4b4] sm:$0xf0]  ;;  %v4677_v7 = vor.u32 %v5835_v51, %v4674_v52 }
 0x12f   :  { %v4705_v26 = vor.u32 %v6516_v54, %v6514_v32  ;;  %v5025_v30 = vor.u32 %v6522_v58, %v6520_v57  ;;  %v6614_v52 = vld [vmem:[#allocation11 + $0x408] sm:$0xf]  ;;  %v6620_v32 = vld [vmem:[#allocation11 + $0x514] sm:$0xf0]  ;;  %v6622_v54 = vld [vmem:[#allocation11 + $0x6c] sm:$0xf] }
 0x130   :  { %7522 = vst [vmem:[#allocation25_spill] sm:$0xff] %v6622_v54  ;;  %v6691_v54 = vld [vmem:[#allocation11 + $0x2ac] sm:$0xf] }
 0x131   :  { %2713 = vmatpush.bf16.msra.mxu0 %v4785_v61  ;;  %2691 = vmatpush.bf16.msra.mxu1 %v4465_v12  ;;  %v4817_v61 = vor.u32 %v5873_v37, %v4816_v46  ;;  %v6547_v12 = vld [vmem:[#allocation11 + $0x568] sm:$0xf]  ;;  %v4629_v37 = vor.u32 %v6604_v49, %v6606_v39  ;;  %v6659_v46 = vld [vmem:[#allocation11 + $0x158] sm:$0xf0]  ;;  %7527 = vst [vmem:[#allocation30_spill] sm:$0xff] %v6691_v54  ;;  %v995_v54 = vld [vmem:[#allocation8 + $0x28] sm:$0xff] }
 0x132   :  { %2704 = vmatpush.bf16.msra.mxu3 %v4593_v0  ;;  %2729 = vmatpush.bf16.msra.mxu2 %v4865_v9  ;;  %v6534_v0 = vld [vmem:[#allocation11 + $0x588] sm:$0xf]  ;;  %v6725_v39 = vld [vmem:[#allocation11 + $0x10c] sm:$0xf] }
 0x133   :  { %v6542_v9 = vld [vmem:[#allocation11 + $0x468] sm:$0xf]  ;;  %v5137_v45 = vor.u32 %v6536_v1, %v6534_v0  ;;  %v993_v1 = vld [vmem:[#allocation8 + $0x18] sm:$0xff] }
 0x134   :  { %v992_v0 = vld [vmem:[#allocation8 + $0x10] sm:$0xff]  ;;  %v1012_v57 = vunpack.c.l.bf16 %v993_v1  ;;  %v1013_v51 = vunpack.c.h.bf16 %v993_v1  ;;  %v6663_v1 = vld [vmem:[#allocation11 + $0x2d8] sm:$0xf0] }
 0x135   :  { %2714 = vmatpush.bf16.msra.mxu0 %v4769_v15  ;;  %2692 = vmatpush.bf16.msra.mxu1 %v4449_v28  ;;  %v6551_v15 = vld [vmem:[#allocation11 + $0xcc] sm:$0xf]  ;;  %v6573_v28 = vld [vmem:[#allocation11 + $0xb8] sm:$0xf0] }
 0x136   :  { %2705 = vmatpush.bf16.msra.mxu3 %v4577_v17  ;;  %2730 = vmatpush.bf16.msra.mxu2 %v4849_v24  ;;  %v4658_v17 = vld [vmem:[#allocation11 + $0x1d8] sm:$0xf0]  ;;  %v6565_v24 = vld [vmem:[#allocation11 + $0x554] sm:$0xf0] }
 0x137   :  { %v4661_v33 = vor.u32 %v5831_v11, %v4658_v17  ;;  %v6639_v11 = vld [vmem:[#allocation11 + $0x2f8] sm:$0xf0]  ;;  %v6641_v17 = vld [vmem:[#allocation11 + $0x3ec] sm:$0xf] }
 0x139   :  { %2715 = vmatpush.bf16.msra.mxu0 %v4753_v29  ;;  %2693 = vmatpush.bf16.msra.mxu1 %v4433_v42  ;;  %v6577_v29 = vld [vmem:[#allocation11 + $0x1b8] sm:$0xf0] }
 0x13a   :  { %2706 = vmatpush.bf16.msra.mxu3 %v4561_v31  ;;  %2731 = vmatpush.bf16.msra.mxu2 %v4833_v44  ;;  %v6602_v42 = vld [vmem:[#allocation11 + $0x98] sm:$0xf0]  ;;  %v4645_v58 = vor.u32 %v6575_v47, %v6577_v29  ;;  %v1010_v47 = vunpack.c.l.bf16 %v992_v0  ;;  %v1011_v29 = vunpack.c.h.bf16 %v992_v0  ;;  %v6661_v44 = vld [vmem:[#allocation11 + $0x2cc] sm:$0xf]  ;;  %v1056_v0 = vpop.permute.xlu0 %1055 }
 0x13b   :  { %v1106_v5 = vmul.f32 %v1056_v0, %v1013_v51  ;;  %v6693_v51 = vld [vmem:[#allocation11 + $0x2b8] sm:$0xf0] }
 0x13c   :  { %2694 = vmatmul.bf16.vlgmr.msra.gmra.mxu1 %v6480_v6  ;;  %v1103_v31 = vmul.f32 %v1056_v0, %v1010_v47  ;;  %v1104_v14 = vmul.f32 %v1056_v0, %v1011_v29  ;;  %v6677_v6 = vld [vmem:[#allocation11 + $0x38] sm:$0xf0]  ;;  %7528 = vst [vmem:[#allocation31_spill] sm:$0xff] %v6693_v51 }
 0x13d   :  { %2707 = vmatmul.bf16.vlgmr.msra.gmra.mxu3 %v6484_v21  ;;  %2716 = vmatpush.bf16.msra.mxu0 %v4737_v48  ;;  %v6616_v48 = vld [vmem:[#allocation11 + $0x414] sm:$0xf0]  ;;  %7526 = vst [vmem:[#allocation29_spill] sm:$0xff] %v6677_v6  ;;  %v6679_v21 = vld [vmem:[#allocation11 + $0x12c] sm:$0xf] }
 0x13e   :  { %2751 = vmatpush.bf16.msrb.mxu3 %v5185_v40  ;;  %2738 = vmatpush.bf16.msrb.mxu1 %v5057_v53  ;;  %v6590_v40 = vld [vmem:[#allocation11 + $0x534] sm:$0xf0]  ;;  %v6618_v53 = vld [vmem:[#allocation11 + $0x508] sm:$0xf]  ;;  %v1155_v47 = vrot.slane %v1103_v31, 4  ;;  %v1161_v29 = vrot.slane %v1104_v14, 4 }
 0x13f   :  { %2732 = vmatpush.bf16.msra.mxu2 %v4817_v61  ;;  %v6635_v61 = vld [vmem:[#allocation11 + $0x178] sm:$0xf0] }
 0x141   :  { %2717 = vmatpush.bf16.msra.mxu0 %v4721_v20  ;;  %v6643_v20 = vld [vmem:[#allocation11 + $0x3f8] sm:$0xf0] }
 0x142   :  { %2752 = vmatpush.bf16.msrb.mxu3 %v5169_v56  ;;  %2739 = vmatpush.bf16.msrb.mxu1 %v5041_v22  ;;  %v6645_v22 = vld [vmem:[#allocation11 + $0x4c] sm:$0xf] }
 0x143   :  { %2777 = vmatpush.bf16.msrb.mxu2 %v4677_v7  ;;  %v6637_v7 = vld [vmem:[#allocation11 + $0x2ec] sm:$0xf]  ;;  %7524 = vst [vmem:[#allocation27_spill] sm:$0xff] %v6645_v22 }
 0x144   :  { %2733 = vmatmul.bf16.vlgmr.msra.gmra.mxu2 %v6488_v35  ;;  %v6665_v56 = vld [vmem:[#allocation11 + $0x3cc] sm:$0xf]  ;;  %v1105_v35 = vmul.f32 %v1056_v0, %v1012_v57  ;;  %v6683_v57 = vld [vmem:[#allocation11 + $0x138] sm:$0xf0] }
 0x145   :  { %2718 = vmatpush.bf16.msra.mxu0 %v4705_v26  ;;  %v6707_v26 = vld [vmem:[#allocation11 + $0x3b8] sm:$0xf0]  ;;  %v6709_v22 = vld [vmem:[#allocation11 + $0xc] sm:$0xf] }
 0x146   :  { %2753 = vmatpush.bf16.msrb.mxu3 %v5153_v27  ;;  %v6647_v27 = vld [vmem:[#allocation11 + $0x58] sm:$0xf0]  ;;  %2740 = vmatpush.bf16.msrb.mxu1 %v5025_v30  ;;  %v6675_v30 = vld [vmem:[#allocation11 + $0x2c] sm:$0xf]  ;;  %v1167_v49 = vrot.slane %v1105_v35, 4  ;;  %7531 = vst [vmem:[#allocation32_spill] sm:$0xff] %v6709_v22 }
 0x147   :  { %2778 = vmatpush.bf16.msrb.mxu2 %v4661_v33  ;;  %7525 = vst [vmem:[#allocation28_spill] sm:$0xff] %v6647_v27  ;;  %v6667_v33 = vld [vmem:[#allocation11 + $0x3d8] sm:$0xf0]  ;;  %v1156_v27 = vadd.f32 %v1155_v47, %v1103_v31  ;;  %v996_v31 = vld [vmem:[#allocation8 + $0x30] sm:$0xff]  ;;  %v997_v47 = vld [vmem:[#allocation8 + $0x38] sm:$0xff] }
 0x148   :  { %v6745_v0 = vld [vmem:[#allocation11 + $0x398] sm:$0xf0] }
 0x149   :  { %v994_v22 = vld [vmem:[#allocation8 + $0x20] sm:$0xff] }
 0x14a   :  { %2754 = vmatpush.bf16.msrb.mxu3 %v5137_v45  ;;  %v4613_v45 = vor.u32 %v6633_v4, %v6635_v61  ;;  %v7529_v4 = vor.u32 %v6528_v60, %v6526_v59  ;;  %v7530_v61 = vor.u32 %v6532_v63, %v6530_v62  ;;  %v7532_v59 = vor.u32 %v6538_v2, %v6540_v3  ;;  %v1070_v2 = vpop.permute.xlu2 %1069 }
 0x14b   :  { %2779 = vmatpush.bf16.msrb.mxu2 %v4645_v58  ;;  %v1173_v58 = vrot.slane %v1106_v5, 4  ;;  %v7533_v60 = vor.u32 %v6549_v13, %v6547_v12  ;;  %v1168_v3 = vadd.f32 %v1167_v49, %v1105_v35  ;;  %v6727_v12 = vld [vmem:[#allocation11 + $0x118] sm:$0xf0]  ;;  %v1018_v13 = vunpack.c.l.bf16 %v996_v31 }
 0x14c   :  { %2719 = vmatpush.bf16.msra.mxu0 %v7529_v4  ;;  %2741 = vmatpush.bf16.msrb.mxu1 %v7530_v61  ;;  %v1162_v4 = vadd.f32 %v1161_v29, %v1104_v14  ;;  %v6721_v61 = vld [vmem:[#allocation11 + $0x18] sm:$0xf0]  ;;  %v6732_v29 = vld [vmem:[#allocation11 + $0x28c] sm:$0xf]  ;;  %v1020_v63 = vunpack.c.l.bf16 %v997_v47  ;;  %v1021_v62 = vunpack.c.h.bf16 %v997_v47  ;;  %v7535_v35 = vor.u32 %v6544_v10, %v6542_v9 }
 0x14d   :  { %7534 = vst [vmem:[#allocation33_spill] sm:$0xff] %v6721_v61  ;;  %v1157_v49 = vrot.slane %v1156_v27, 2  ;;  %v6743_v14 = vld [vmem:[#allocation11 + $0x38c] sm:$0xf]  ;;  %v7537_v9 = vor.u32 %v6565_v24, %v6563_v23  ;;  %v7540_v47 = vor.u32 %v6557_v19, %v6555_v18  ;;  %v1014_v6 = vunpack.c.l.bf16 %v994_v22  ;;  %v6778_v18 = vld [vmem:[#allocation11 + $0x5f8] sm:$0xf0] }
 0x14e   :  { %2755 = vmatpush.bf16.msrb.mxu3 %v7533_v60  ;;  %v6734_v60 = vld [vmem:[#allocation11 + $0x298] sm:$0xf0]  ;;  %v1163_v10 = vrot.slane %v1162_v4, 2  ;;  %v1113_v61 = vmul.f32 %v1070_v2, %v1020_v63  ;;  %v6776_v23 = vld [vmem:[#allocation11 + $0x5ec] sm:$0xf] }
 0x14f   :  { %2780 = vmatpush.bf16.msrb.mxu2 %v4629_v37  ;;  %2720 = vmatmul.bf16.vlgmr.msra.gmra.mxu0 %v6491_v8  ;;  %v1019_v37 = vunpack.c.h.bf16 %v996_v31  ;;  %v1111_v8 = vmul.f32 %v1070_v2, %v1018_v13  ;;  %v7536_v31 = vor.u32 %v6551_v15, %v6553_v16  ;;  %v1169_v13 = vrot.slane %v1168_v3, 2 }
 0x150   :  { %2764 = vmatpush.bf16.msrb.mxu0 %v7532_v59  ;;  %v1174_v59 = vadd.f32 %v1173_v58, %v1106_v5  ;;  %2742 = vmatpush.bf16.msrb.mxu1 %v7535_v35  ;;  %v6755_v35 = vld [vmem:[#allocation11 + $0x4ec] sm:$0xf]  ;;  %v6757_v58 = vld [vmem:[#allocation11 + $0x4f8] sm:$0xf0]  ;;  %v1114_v16 = vmul.f32 %v1070_v2, %v1021_v62  ;;  %v7541_v62 = vor.u32 %v6567_v25, %v6573_v28 }
 0x151   :  { %7538 = vst [vmem:[#allocation34_spill] sm:$0xff] %v6755_v35  ;;  %v1112_v5 = vmul.f32 %v1070_v2, %v1019_v37  ;;  %v1203_v24 = vrot.slane %v1111_v8, 4  ;;  %v6766_v37 = vadd.f32 %v1157_v49, %v1156_v27  ;;  %v7542_v2 = vor.u32 %v6590_v40, %v6588_v38 }
 0x152   :  { %2756 = vmatpush.bf16.msrb.mxu3 %v7537_v9  ;;  %7539 = vst [vmem:[#allocation35_spill] sm:$0xff] %v6757_v58  ;;  %v1175_v51 = vrot.slane %v1174_v59, 2  ;;  %v1215_v9 = vrot.slane %v1113_v61, 4  ;;  %v1221_v63 = vrot.slane %v1114_v16, 4  ;;  %v1164_v15 = vadd.f32 %v1163_v10, %v1162_v4  ;;  %v1063_v4 = vpop.permute.xlu0 %1062 }
 0x153   :  { %2781 = vmatpush.bf16.msrb.mxu2 %v4613_v45  ;;  %v1204_v19 = vadd.f32 %v1203_v24, %v1111_v8  ;;  %v1015_v49 = vunpack.c.h.bf16 %v994_v22  ;;  %v1170_v45 = vadd.f32 %v1169_v13, %v1168_v3  ;;  %v1016_v38 = vunpack.c.l.bf16 %v995_v54  ;;  %v6788_v22 = vld [vmem:[#allocation11 + $0x26c] sm:$0xf] }
 0x154   :  { %2765 = vmatpush.bf16.msrb.mxu0 %v7536_v31  ;;  %v1209_v31 = vrot.slane %v1112_v5, 4  ;;  %2743 = vmatpush.bf16.msrb.mxu1 %v7540_v47  ;;  %v7543_v47 = vor.u32 %v6657_v50, %v6659_v46  ;;  %v1176_v58 = vadd.f32 %v1175_v51, %v1174_v59  ;;  %v1216_v25 = vadd.f32 %v1215_v9, %v1113_v61  ;;  %v6790_v46 = vld [vmem:[#allocation11 + $0x278] sm:$0xf0]  ;;  %v6811_v9 = vld [vmem:[#allocation11 + $0x4cc] sm:$0xf] }
 0x155   :  { %v1222_v28 = vadd.f32 %v1221_v63, %v1114_v16  ;;  %v1017_v40 = vunpack.c.h.bf16 %v995_v54  ;;  %v7544_v10 = vor.u32 %v6586_v36, %v6584_v34  ;;  %v5189_v8 = vor.u32 %v6776_v23, %v6778_v18  ;;  %v6798_v34 = vld [vmem:[#allocation11 + $0x36c] sm:$0xf]  ;;  %v6800_v36 = vld [vmem:[#allocation11 + $0x378] sm:$0xf0] }
 0x156   :  { %2757 = vmatpush.bf16.msrb.mxu3 %v7542_v2  ;;  %v1210_v27 = vadd.f32 %v1209_v31, %v1112_v5  ;;  %v1217_v50 = vrot.slane %v1216_v25, 2  ;;  %v1107_v51 = vmul.f32 %v1063_v4, %v1014_v6  ;;  %v1108_v61 = vmul.f32 %v1063_v4, %v1015_v49  ;;  %v1041_v2 = vpop.xlane.xlu1 %1040  ;;  %v5170_v18 = vld [vmem:[#allocation11 + $0x5d8] sm:$0xf0]  ;;  %v7550_v49 = vld [vmem:[#allocation25_spill] sm:$0xff] }
 0x157   :  { %2782 = vmatpush.bf16.msrb.mxu2 %v7543_v47  ;;  %v7545_v3 = vor.u32 %v6592_v41, %v6602_v42  ;;  %v7546_v54 = vor.u32 %v6620_v32, %v6618_v53  ;;  %v1223_v13 = vrot.slane %v1222_v28, 2  ;;  %v1109_v16 = vmul.f32 %v1063_v4, %v1016_v38  ;;  %v7551_v47 = vld [vmem:[#allocation26_spill] sm:$0xff] }
 0x158   :  { %2766 = vmatpush.bf16.msrb.mxu0 %v7541_v62  ;;  %v1205_v62 = vrot.slane %v1204_v19, 2  ;;  %v1211_v35 = vrot.slane %v1210_v27, 2  ;;  %2744 = vmatpush.bf16.msrb.mxu1 %v7544_v10  ;;  %v7547_v6 = vor.u32 %v6641_v17, %v6643_v20  ;;  %v7548_v41 = vor.u32 %v6679_v21, %v6683_v57  ;;  %v5959_v57 = vld [vmem:[#allocation11 + $0x5cc] sm:$0xf] }
 0x159   :  { %v1159_v42 = vrot.slane %v6766_v37, 1  ;;  %v1165_v53 = vrot.slane %v1164_v15, 1  ;;  %v1110_v32 = vmul.f32 %v1063_v4, %v1017_v40  ;;  %v1179_v23 = vrot.slane %v1107_v51, 4  ;;  %v6829_v4 = vld [vmem:[#allocation11 + $0x4d8] sm:$0xf0] }
 0x15a   :  { %2758 = vmatpush.bf16.msrb.mxu3 %v7546_v54  ;;  %v1206_v59 = vadd.f32 %v1205_v62, %v1204_v19  ;;  %v1212_v5 = vadd.f32 %v1211_v35, %v1210_v27  ;;  %v1171_v24 = vrot.slane %v1170_v45, 1  ;;  %v1177_v31 = vrot.slane %v1176_v58, 1  ;;  %v7556_v54 = vld [vmem:[#allocation24_spill] sm:$0xff] }
 0x15b   :  { %2783 = vmatpush.bf16.msrb.mxu2 %v7548_v41  ;;  %v4741_v35 = vor.u32 %v6788_v22, %v6790_v46  ;;  %v1185_v63 = vrot.slane %v1108_v61, 4  ;;  %v7549_v17 = vor.u32 %v6616_v48, %v6614_v52  ;;  %v4869_v21 = vor.u32 %v6798_v34, %v6800_v36  ;;  %v4706_v34 = vld [vmem:[#allocation11 + $0x238] sm:$0xf0] }
 0x15c   :  { %2767 = vmatpush.bf16.msrb.mxu0 %v7545_v3  ;;  %v6819_v20 = vadd.f32 %v1217_v50, %v1216_v25  ;;  %v1180_v19 = vadd.f32 %v1179_v23, %v1107_v51  ;;  %v1042_v27 = vmax.f32 %v1041_v2, 1.0  ;;  %v7552_v62 = vor.u32 %v7550_v49, %v7551_v47  ;;  %v6867_v2 = vld [vmem:[#allocation11 + $0x34c] sm:$0xf] }
 0x15d   :  { %2745 = vmatpush.bf16.msrb.mxu1 %v7549_v17  ;;  %2759 = vmatmul.bf16.vlgmr.msrb.gmra.mxu3 %v6495_v43  ;;  %v7553_v38 = vor.u32 %v6637_v7, %v6639_v11  ;;  %v1207_v52 = vrot.slane %v1206_v59, 1  ;;  %v1213_v48 = vrot.slane %v1212_v5, 1  ;;  %v6827_v40 = vadd.f32 %v1223_v13, %v1222_v28  ;;  %v6842_v28 = vld [vmem:[#allocation11 + $0x24c] sm:$0xf]  ;;  %v6869_v17 = vld [vmem:[#allocation11 + $0x358] sm:$0xf0] }
 0x15e   :  { %2803 = vmatpush.bf16.msra.mxu3 %v7547_v6  ;;  %v1191_v25 = vrot.slane %v1109_v16, 4  ;;  %v7554_v10 = vor.u32 %v6665_v56, %v6667_v33  ;;  %v6835_v50 = vadd.f32 %v1159_v42, %v6766_v37  ;;  %v6837_v51 = vadd.f32 %v1165_v53, %v1164_v15  ;;  %v6849_v33 = vld [vmem:[#allocation11 + $0x258] sm:$0xf0]  ;;  %v5955_v15 = vld [vmem:[#allocation11 + $0x5ac] sm:$0xf]  ;;  %v999_v42 = vld [vmem:[#allocation8 + $0x48] sm:$0xff] }
 0x15f   :  { %v7555_v7 = vor.u32 %v6725_v39, %v6727_v12  ;;  %v1186_v11 = vadd.f32 %v1185_v63, %v1108_v61  ;;  %v1197_v3 = vrot.slane %v1110_v32, 4  ;;  %v6845_v13 = vadd.f32 %v1171_v24, %v1170_v45  ;;  %v998_v37 = vld [vmem:[#allocation8 + $0x40] sm:$0xff]  ;;  %v7557_v53 = vld [vmem:[#allocation27_spill] sm:$0xff]  ;;  %v7558_v45 = vld [vmem:[#allocation28_spill] sm:$0xff] }
 0x160   :  { %2768 = vmatpush.bf16.msrb.mxu0 %v7552_v62  ;;  %2746 = vmatmul.bf16.vlgmr.msrb.gmra.mxu1 %v7556_v54  ;;  %v6847_v6 = vadd.f32 %v1177_v31, %v1176_v58  ;;  %v5173_v56 = vor.u32 %v5959_v57, %v5170_v18  ;;  %v1219_v41 = vrot.slane %v6819_v20, 1  ;;  %v5045_v39 = vor.u32 %v6811_v9, %v6829_v4  ;;  %v5154_v61 = vld [vmem:[#allocation11 + $0x5b8] sm:$0xf0]  ;;  %v7562_v18 = vld [vmem:[#allocation21_spill] sm:$0xff] }
 0x161   :  { %2790 = vmatpush.bf16.msra.mxu1 %v7553_v38  ;;  %2784 = vmatpush.bf16.msrb.mxu2 %v7555_v7  ;;  %v1181_v12 = vrot.slane %v1180_v19, 2  ;;  %6132 = vrcp.f32 %v1042_v27  ;;  %v7559_v23 = vor.u32 %v7557_v53, %v7558_v45  ;;  %v7560_v58 = vor.u32 %v6661_v44, %v6663_v1  ;;  %v7563_v7 = vld [vmem:[#allocation29_spill] sm:$0xff]  ;;  %v5951_v53 = vld [vmem:[#allocation11 + $0x58c] sm:$0xf]  ;;  %v5138_v45 = vld [vmem:[#allocation11 + $0x598] sm:$0xf0] }
 0x162   :  { %2804 = vmatpush.bf16.msra.mxu3 %v7554_v10  ;;  %v6862_v24 = vadd.f32 %v1213_v48, %v1212_v5  ;;  %v6865_v63 = vadd.f32 %v1191_v25, %v1109_v16  ;;  %v7561_v57 = vor.u32 %v6705_v55, %v6707_v26  ;;  %v1187_v44 = vrot.slane %v1186_v11, 2  ;;  %v6879_v5 = vld [vmem:[#allocation11 + $0x4b8] sm:$0xf0]  ;;  %v1077_v55 = vpop.permute.xlu2 %1076 }
 0x163   :  { %v6875_v1 = vadd.f32 %v1197_v3, %v1110_v32  ;;  %v1022_v27 = vunpack.c.l.bf16 %v998_v37  ;;  %v1023_v16 = vunpack.c.h.bf16 %v998_v37  ;;  %v4725_v49 = vor.u32 %v6842_v28, %v6849_v33  ;;  %v6889_v48 = vld [vmem:[#allocation11 + $0x338] sm:$0xf0] }
 0x164   :  { %2769 = vmatpush.bf16.msrb.mxu0 %v7559_v23  ;;  %2785 = vmatmul.bf16.vlgmr.msrb.gmra.mxu2 %v7562_v18  ;;  %v5157_v47 = vor.u32 %v5955_v15, %v5154_v61  ;;  %v1024_v62 = vunpack.c.l.bf16 %v999_v42  ;;  %v1025_v38 = vunpack.c.h.bf16 %v999_v42  ;;  %v6883_v26 = vadd.f32 %v1181_v12, %v1180_v19  ;;  %v7566_v15 = vld [vmem:[#allocation31_spill] sm:$0xff]  ;;  %v1000_v23 = vld [vmem:[#allocation8 + $0x50] sm:$0xff]  ;;  %v7573_v31 = vld [vmem:[#allocation34_spill] sm:$0xff] }
 0x165   :  { %2829 = vmatpush.bf16.msra.mxu2 %v5189_v8  ;;  %2791 = vmatpush.bf16.msra.mxu1 %v7560_v58  ;;  %v6860_v8 = vadd.f32 %v1207_v52, %v1206_v59  ;;  %v6877_v59 = vld [vmem:[#allocation11 + $0x4ac] sm:$0xf]  ;;  %v4853_v32 = vor.u32 %v6867_v2, %v6869_v17  ;;  %v1115_v25 = vmul.f32 %v1077_v55, %v1022_v27  ;;  %v1001_v27 = vld [vmem:[#allocation8 + $0x58] sm:$0xff]  ;;  %v7574_v17 = vld [vmem:[#allocation35_spill] sm:$0xff] }
 0x166   :  { %2805 = vmatpush.bf16.msra.mxu3 %v7561_v57  ;;  %v6887_v52 = vld [vmem:[#allocation11 + $0x32c] sm:$0xf]  ;;  %v1116_v10 = vmul.f32 %v1077_v55, %v1023_v16  ;;  %v7564_v3 = vor.u32 %v6675_v30, %v7563_v7  ;;  %v5029_v12 = vor.u32 %v6877_v59, %v6879_v5  ;;  %v1117_v61 = vmul.f32 %v1077_v55, %v1024_v62 }
 0x167   :  { %v1118_v42 = vmul.f32 %v1077_v55, %v1025_v38  ;;  %v6900_v58 = vpop.eup %6132  ;;  %v7568_v30 = vor.u32 %v6743_v14, %v6745_v0  ;;  %v6905_v2 = vadd.f32 %v1187_v44, %v1186_v11  ;;  %v1227_v57 = vrot.slane %v1115_v25, 4  ;;  %v7569_v11 = vld [vmem:[#allocation32_spill] sm:$0xff]  ;;  %v7570_v44 = vld [vmem:[#allocation33_spill] sm:$0xff] }
 0x168   :  { %2770 = vmatpush.bf16.msrb.mxu0 %v7564_v3  ;;  %v1233_v18 = vrot.slane %v1116_v10, 4  ;;  %v4837_v16 = vor.u32 %v6887_v52, %v6889_v48  ;;  %v1239_v62 = vrot.slane %v1117_v61, 4  ;;  %v6911_v55 = vrot.slane %v6900_v58, 4 }
 0x169   :  { %2830 = vmatpush.bf16.msra.mxu2 %v5173_v56  ;;  %v7565_v56 = vld [vmem:[#allocation30_spill] sm:$0xff]  ;;  %v1245_v38 = vrot.slane %v1118_v42, 4  ;;  %v1228_v7 = vadd.f32 %v1227_v57, %v1115_v25  ;;  %v5141_v0 = vor.u32 %v5951_v53, %v5138_v45  ;;  %v1026_v14 = vunpack.c.l.bf16 %v1000_v23 }
 0x16a   :  { %v7567_v37 = vor.u32 %v7565_v56, %v7566_v15  ;;  %2806 = vmatpush.bf16.msra.mxu3 %v7568_v30  ;;  %v1234_v3 = vadd.f32 %v1233_v18, %v1116_v10  ;;  %v7571_v56 = vor.u32 %v7569_v11, %v7570_v44  ;;  %v7572_v15 = vor.u32 %v6732_v29, %v6734_v60  ;;  %v1084_v30 = vpop.permute.xlu0 %1083 }
 0x16b   :  { %v1027_v52 = vunpack.c.h.bf16 %v1000_v23  ;;  %v1028_v48 = vunpack.c.l.bf16 %v1001_v27  ;;  %v7575_v19 = vor.u32 %v7573_v31, %v7574_v17  ;;  %v1229_v25 = vrot.slane %v1228_v7, 2  ;;  %v5843_v23 = vld [vmem:[#allocation11 + $0x22c] sm:$0xf] }
 0x16c   :  { %2792 = vmatpush.bf16.msra.mxu1 %v7567_v37  ;;  %2771 = vmatpush.bf16.msrb.mxu0 %v7571_v56  ;;  %v1246_v37 = vadd.f32 %v1245_v38, %v1118_v42  ;;  %v1235_v10 = vrot.slane %v1234_v3, 2  ;;  %v1029_v53 = vunpack.c.h.bf16 %v1001_v27  ;;  %v1119_v45 = vmul.f32 %v1084_v30, %v1026_v14  ;;  %v7576_v42 = vld [vmem:[#allocation20_spill] sm:$0xff] }
 0x16d   :  { %2831 = vmatpush.bf16.msra.mxu2 %v5157_v47  ;;  %v1240_v47 = vadd.f32 %v1239_v62, %v1117_v61  ;;  %v1120_v60 = vmul.f32 %v1084_v30, %v1027_v52  ;;  %v1121_v61 = vmul.f32 %v1084_v30, %v1028_v48  ;;  %v1230_v18 = vadd.f32 %v1229_v25, %v1228_v7  ;;  %v5919_v17 = vld [vmem:[#allocation11 + $0x48c] sm:$0xf] }
 0x16e   :  { %2807 = vmatpush.bf16.msra.mxu3 %v4869_v21  ;;  %v1247_v29 = vrot.slane %v1246_v37, 2  ;;  %v1236_v62 = vadd.f32 %v1235_v10, %v1234_v3  ;;  %v1122_v31 = vmul.f32 %v1084_v30, %v1029_v53  ;;  %v5010_v3 = vld [vmem:[#allocation11 + $0x498] sm:$0xf0]  ;;  %v4709_v9 = vor.u32 %v5843_v23, %v4706_v34  ;;  %v5915_v34 = vld [vmem:[#allocation11 + $0x46c] sm:$0xf] }
 0x16f   :  { %v1241_v57 = vrot.slane %v1240_v47, 2  ;;  %2772 = vmatmul.bf16.vlgmr.msrb.gmra.mxu0 %v7576_v42  ;;  %v1257_v27 = vrot.slane %v1120_v60, 4  ;;  %v1263_v38 = vrot.slane %v1121_v61, 4  ;;  %v5013_v4 = vor.u32 %v5919_v17, %v5010_v3  ;;  %v4818_v23 = vld [vmem:[#allocation11 + $0x318] sm:$0xf0] }
 0x170   :  { %2793 = vmatpush.bf16.msra.mxu1 %v7572_v15  ;;  %2816 = vmatpush.bf16.msra.mxu0 %v7575_v19  ;;  %v1251_v19 = vrot.slane %v1119_v45, 4  ;;  %v1248_v21 = vadd.f32 %v1247_v29, %v1246_v37  ;;  %v1237_v7 = vrot.slane %v1236_v62, 1  ;;  %v1269_v11 = vrot.slane %v1122_v31, 4 }
 0x171   :  { %2832 = vmatpush.bf16.msra.mxu2 %v5141_v0  ;;  %v1242_v36 = vadd.f32 %v1241_v57, %v1240_v47  ;;  %v1231_v0 = vrot.slane %v1230_v18, 1  ;;  %v1258_v22 = vadd.f32 %v1257_v27, %v1120_v60  ;;  %v1264_v46 = vadd.f32 %v1263_v38, %v1121_v61 }
 0x172   :  { %2808 = vmatpush.bf16.msra.mxu3 %v4853_v32  ;;  %v1252_v14 = vadd.f32 %v1251_v19, %v1119_v45  ;;  %v1249_v56 = vrot.slane %v1248_v21, 1  ;;  %v1238_v15 = vadd.f32 %v1237_v7, %v1236_v62  ;;  %v1270_v37 = vadd.f32 %v1269_v11, %v1122_v31  ;;  %v5304_v7 = vld [vmem:[#allocation12 + $0xe0] sm:$0xf] }
 0x173   :  { %v1243_v44 = vrot.slane %v1242_v36, 1  ;;  %v1265_v32 = vrot.slane %v1264_v46, 2  ;;  %v1183_v10 = vrot.slane %v6883_v26, 1  ;;  %v6943_v33 = vadd.f32 %v1219_v41, %v6819_v20  ;;  %v5871_v41 = vld [vmem:[#allocation11 + $0x30c] sm:$0xf] }
 0x174   :  { %2794 = vmatpush.bf16.msra.mxu1 %v4741_v35  ;;  %2817 = vmatpush.bf16.msra.mxu0 %v5045_v39  ;;  %v1232_v35 = vadd.f32 %v1231_v0, %v1230_v18  ;;  %v1253_v47 = vrot.slane %v1252_v14, 2  ;;  %v1259_v39 = vrot.slane %v1258_v22, 2  ;;  %v1250_v48 = vadd.f32 %v1249_v56, %v1248_v21  ;;  %v5122_v0 = vld [vmem:[#allocation11 + $0x578] sm:$0xf0] }
 0x175   :  { %v1244_v52 = vadd.f32 %v1243_v44, %v1242_v36  ;;  %v1271_v25 = vrot.slane %v1270_v37, 2  ;;  %v1266_v28 = vadd.f32 %v1265_v32, %v1264_v46  ;;  %v7577_v57 = vrot.slane %v6865_v63, 2  ;;  %v4994_v36 = vld [vmem:[#allocation11 + $0x478] sm:$0xf0]  ;;  %v991_v32 = vld [vmem:[#allocation8 + $0x8] sm:$0xff] }
 0x176   :  { %2809 = vmatpush.bf16.msra.mxu3 %v4837_v16  ;;  %v1254_v30 = vadd.f32 %v1253_v47, %v1252_v14  ;;  %v1356_v53 = vmul.f32 %v6911_v55, %v1232_v35  ;;  %v1260_v45 = vadd.f32 %v1259_v39, %v1258_v22  ;;  %v4690_v16 = vld [vmem:[#allocation11 + $0x218] sm:$0xf0]  ;;  %v7578_v60 = vrot.slane %v6875_v1, 2  ;;  %v6970_v35 = vpop.f32.mrf.mxu1  ;;  %v6028_v39 = vld [vmem:[#allocation12 + $0x1ec] sm:$0xf0] }
 0x177   :  { %v1272_v5 = vadd.f32 %v1271_v25, %v1270_v37  ;;  %v6949_v29 = vadd.f32 %v7577_v57, %v6865_v63  ;;  %v1267_v20 = vrot.slane %v1266_v28, 1  ;;  %v7579_v18 = vrot.slane %v6827_v40, 1  ;;  %v990_v44 = vld [vmem:[#allocation8] sm:$0xff] }
 0x178   :  { %2795 = vmatpush.bf16.msra.mxu1 %v4725_v49  ;;  %2818 = vmatpush.bf16.msra.mxu0 %v5029_v12  ;;  %v1357_v49 = vmul.f32 %v6911_v55, %v1238_v15  ;;  %v1255_v59 = vrot.slane %v1254_v30, 1  ;;  %v5839_v12 = vld [vmem:[#allocation11 + $0x20c] sm:$0xf]  ;;  %v6954_v61 = vadd.f32 %v7578_v60, %v6875_v1  ;;  %v1261_v42 = vrot.slane %v1260_v45, 1 }
 0x179   :  { %v6959_v62 = vadd.f32 %v7579_v18, %v6827_v40  ;;  %v1358_v31 = vmul.f32 %v6911_v55, %v1244_v52  ;;  %v1359_v63 = vmul.f32 %v6911_v55, %v1250_v48  ;;  %v5947_v1 = vld [vmem:[#allocation11 + $0x56c] sm:$0xf]  ;;  %v6964_v21 = vadd.f32 %v1183_v10, %v6883_v26  ;;  %v5996_v55 = vld [vmem:[#allocation12 + $0xec] sm:$0xf0] }
 0x17a   :  { %v1256_v19 = vadd.f32 %v1255_v59, %v1254_v30  ;;  %v1189_v17 = vrot.slane %v6905_v2, 1  ;;  %v2858_v27 = vpack.c.bf16 %v1356_v53, %v1356_v53  ;;  %v1262_v38 = vadd.f32 %v1261_v42, %v1260_v45 }
 0x17b   :  { %7580 = vst [vmem:[#allocation25_spill] sm:$0xff] %v6959_v62  ;;  %v2859_v40 = vpack.c.bf16 %v1357_v49, %v1357_v49  ;;  %v1268_v3 = vadd.f32 %v1267_v20, %v1266_v28  ;;  %v1273_v14 = vrot.slane %v1272_v5, 1  ;;  %v1329_v11 = vrot.slane %v6900_v58, 5  ;;  %v1049_v49 = vpop.permute.xlu1 %1048  ;;  %v7106_v62 = vld [vmem:[#allocation12 + $0x14c] sm:$0xf0] }
 0x17c   :  { %2796 = vmatpush.bf16.msra.mxu1 %v4709_v9  ;;  %2819 = vmatpush.bf16.msra.mxu0 %v5013_v4  ;;  %v1195_v56 = vrot.slane %v6949_v29, 1  ;;  %v1201_v22 = vrot.slane %v6954_v61, 1  ;;  %v4693_v46 = vor.u32 %v5839_v12, %v4690_v16  ;;  %v4821_v26 = vor.u32 %v5871_v41, %v4818_v23  ;;  %v5432_v4 = vld [vmem:[#allocation12 + $0x1e0] sm:$0xf]  ;;  %v7582_v23 = vld [vmem:[#allocation22_spill] sm:$0xff] }
 0x17d   :  { %v2860_v15 = vpack.c.bf16 %v1358_v31, %v1358_v31  ;;  %v2861_v47 = vpack.c.bf16 %v1359_v63, %v1359_v63  ;;  %v1360_v37 = vmul.f32 %v1329_v11, %v1256_v19  ;;  %v1361_v9 = vmul.f32 %v1329_v11, %v1262_v38  ;;  %v7583_v19 = vld [vmem:[#allocation23_spill] sm:$0xff] }
 0x17e   :  { %2810 = vmatpush.bf16.msra.mxu3 %v4821_v26  ;;  %v4997_v52 = vor.u32 %v5915_v34, %v4994_v36  ;;  %v5125_v48 = vor.u32 %v5947_v1, %v5122_v0  ;;  %v5305_v30 = vor.u32 %v5996_v55, %v5304_v7  ;;  %v1006_v25 = vunpack.c.l.bf16 %v990_v44  ;;  %v2541_v7 = vpop.f32.mrf.mxu1  ;;  %v1005_v55 = vld [vmem:[#allocation8 + $0x78] sm:$0xff] }
 0x17f   :  { %v6972_v10 = vunpack.c.l.b16 %v2858_v27  ;;  %v6974_v53 = vunpack.c.l.b16 %v2859_v40  ;;  %v1274_v45 = vadd.f32 %v1273_v14, %v1272_v5  ;;  %v1362_v28 = vmul.f32 %v1329_v11, %v1268_v3 }
 0x180   :  { %2797 = vmatpush.bf16.msra.mxu1 %v4693_v46  ;;  %v2862_v59 = vpack.c.bf16 %v1360_v37, %v1360_v37  ;;  %2820 = vmatpush.bf16.msra.mxu0 %v4997_v52  ;;  %v5433_v12 = vor.u32 %v6028_v39, %v5432_v4  ;;  %v1007_v16 = vunpack.c.h.bf16 %v990_v44  ;;  %v1008_v57 = vunpack.c.l.bf16 %v991_v32  ;;  %v1002_v52 = vld [vmem:[#allocation8 + $0x60] sm:$0xff] }
 0x181   :  { %2833 = vmatpush.bf16.msra.mxu2 %v5125_v48  ;;  %v6977_v60 = vadd.f32 %v1189_v17, %v6905_v2  ;;  %v6979_v42 = vunpack.c.l.b16 %v2860_v15  ;;  %v2863_v20 = vpack.c.bf16 %v1361_v9, %v1361_v9  ;;  %v1009_v41 = vunpack.c.h.bf16 %v991_v32  ;;  %2811 = vmatmul.bf16.vlgmr.msra.gmra.mxu3 %v7582_v23  ;;  %v1003_v48 = vld [vmem:[#allocation8 + $0x68] sm:$0xff] }
 0x182   :  { %3783 = vmatpush.bf16.msrb.mxu3 %v5433_v12  ;;  %v6983_v5 = vrot.slane %v6900_v58, 1  ;;  %v1099_v18 = vmul.f32 %v1049_v49, %v1006_v25  ;;  %v1100_v31 = vmul.f32 %v1049_v49, %v1007_v16  ;;  %v1101_v63 = vmul.f32 %v1049_v49, %v1008_v57  ;;  %v1091_v57 = vpop.permute.xlu2 %1090 }
 0x183   :  { %7581 = vst [vmem:[#allocation26_spill] sm:$0xff] %v6979_v42  ;;  %2798 = vmatmul.bf16.vlgmr.msra.gmra.mxu1 %v7583_v19  ;;  %v6987_v34 = vadd.f32 %v1195_v56, %v6949_v29  ;;  %v6990_v2 = vadd.f32 %v1201_v22, %v6954_v61  ;;  %v6992_v36 = vunpack.c.l.b16 %v2861_v47  ;;  %v6996_v27 = vmul.f32 %v1329_v11, %v1274_v45 }
 0x184   :  { %3770 = vmatpush.bf16.msrb.mxu1 %v5305_v30  ;;  %v2864_v38 = vpack.c.bf16 %v1362_v28, %v1362_v28  ;;  %v6998_v0 = vunpack.c.l.b16 %v2862_v59  ;;  %v1102_v40 = vmul.f32 %v1049_v49, %v1009_v41  ;;  %v1131_v3 = vrot.slane %v1099_v18, 4 }
 0x185   :  { %7584 = vst [vmem:[#allocation24_spill] sm:$0xff] %v6990_v2  ;;  %v1137_v14 = vrot.slane %v1100_v31, 4  ;;  %v1143_v29 = vrot.slane %v1101_v63, 4  ;;  %v7001_v61 = vunpack.c.l.b16 %v2863_v20  ;;  %v1344_v44 = vmul.f32 %v6983_v5, %v6835_v50 }
 0x186   :  { %7585 = vst [vmem:[#allocation27_spill] sm:$0xff] %v6992_v36  ;;  %v1345_v56 = vmul.f32 %v6983_v5, %v6837_v51  ;;  %v1132_v11 = vadd.f32 %v1131_v3, %v1099_v18  ;;  %v1149_v26 = vrot.slane %v1102_v40, 4  ;;  %v7010_v37 = vunpack.c.l.b16 %v2864_v38  ;;  %v7013_v51 = vpop.f32.mrf.mxu3 }
 0x187   :  { %v1138_v22 = vadd.f32 %v1137_v14, %v1100_v31  ;;  %v1144_v46 = vadd.f32 %v1143_v29, %v1101_v63  ;;  %v1346_v25 = vmul.f32 %v6983_v5, %v6845_v13  ;;  %v2846_v45 = vpack.c.bf16 %v1344_v44, %v1344_v44 }
 0x188   :  { %7586 = vst [vmem:[#allocation28_spill] sm:$0xff] %v7010_v37  ;;  %v1133_v4 = vrot.slane %v1132_v11, 2  ;;  %v1150_v50 = vadd.f32 %v1149_v26, %v1102_v40  ;;  %v2847_v28 = vpack.c.bf16 %v1345_v56, %v1345_v56  ;;  %v1030_v20 = vunpack.c.l.bf16 %v1002_v52 }
 0x189   :  { %v1139_v39 = vrot.slane %v1138_v22, 2  ;;  %v1145_v32 = vrot.slane %v1144_v46, 2  ;;  %v1031_v41 = vunpack.c.h.bf16 %v1002_v52  ;;  %v1032_v23 = vunpack.c.l.bf16 %v1003_v48 }
 0x18a   :  { %v1134_v49 = vadd.f32 %v1133_v4, %v1132_v11  ;;  %v1151_v16 = vrot.slane %v1150_v50, 2  ;;  %v1033_v18 = vunpack.c.h.bf16 %v1003_v48  ;;  %v1123_v7 = vmul.f32 %v1091_v57, %v1030_v20 }
 0x18b   :  { %v1140_v59 = vadd.f32 %v1139_v39, %v1138_v22  ;;  %v1146_v12 = vadd.f32 %v1145_v32, %v1144_v46  ;;  %v1124_v40 = vmul.f32 %v1091_v57, %v1031_v41  ;;  %v1125_v3 = vmul.f32 %v1091_v57, %v1032_v23 }
 0x18c   :  { %v1135_v31 = vrot.slane %v1134_v49, 1  ;;  %v1152_v38 = vadd.f32 %v1151_v16, %v1150_v50  ;;  %v1126_v14 = vmul.f32 %v1091_v57, %v1033_v18  ;;  %v2848_v13 = vpack.c.bf16 %v1346_v25, %v1346_v25  ;;  %v7021_v25 = vpop.f32.mrf.mxu0 }
 0x18d   :  { %v1141_v63 = vrot.slane %v1140_v59, 1  ;;  %v1147_v19 = vrot.slane %v1146_v12, 1  ;;  %v1275_v11 = vrot.slane %v1123_v7, 4  ;;  %v1281_v22 = vrot.slane %v1124_v40, 4 }
 0x18e   :  { %v1136_v29 = vadd.f32 %v1135_v31, %v1134_v49  ;;  %v1287_v46 = vrot.slane %v1125_v3, 4  ;;  %v1293_v26 = vrot.slane %v1126_v14, 4  ;;  %v1153_v4 = vrot.slane %v1152_v38, 1  ;;  %v2554_v50 = vpop.f32.mrf.mxu3 }
 0x18f   :  { %v1142_v44 = vadd.f32 %v1141_v63, %v1140_v59  ;;  %v1148_v56 = vadd.f32 %v1147_v19, %v1146_v12  ;;  %v1276_v48 = vadd.f32 %v1275_v11, %v1123_v7  ;;  %v1282_v16 = vadd.f32 %v1281_v22, %v1124_v40  ;;  %v5911_v19 = vld [vmem:[#allocation11 + $0x44c] sm:$0xf]  ;;  %v5992_v22 = vld [vmem:[#allocation12 + $0xcc] sm:$0xf0] }
 0x190   :  { %v1340_v39 = vmul.f32 %v6900_v58, %v1136_v29  ;;  %v1288_v20 = vadd.f32 %v1287_v46, %v1125_v3  ;;  %v1294_v57 = vadd.f32 %v1293_v26, %v1126_v14  ;;  %v7025_v49 = vmul.f32 %v6983_v5, %v6847_v6  ;;  %v4978_v29 = vld [vmem:[#allocation11 + $0x458] sm:$0xf0]  ;;  %v7033_v46 = vpop.f32.mrf.mxu2 }
 0x191   :  { %v1341_v32 = vmul.f32 %v6900_v58, %v1142_v44  ;;  %v1342_v52 = vmul.f32 %v6900_v58, %v1148_v56  ;;  %v7027_v59 = vunpack.c.l.b16 %v2846_v45  ;;  %v7029_v12 = vunpack.c.l.b16 %v2847_v28  ;;  %v5943_v44 = vld [vmem:[#allocation11 + $0x54c] sm:$0xf]  ;;  %v5106_v56 = vld [vmem:[#allocation11 + $0x558] sm:$0xf0]  ;;  %v5288_v28 = vld [vmem:[#allocation12 + $0xc0] sm:$0xf] }
 0x192   :  { %v7031_v41 = vunpack.c.l.b16 %v2848_v13  ;;  %v1277_v23 = vrot.slane %v1276_v48, 2  ;;  %v1283_v18 = vrot.slane %v1282_v16, 2  ;;  %v1289_v31 = vrot.slane %v1288_v20, 2  ;;  %v5416_v13 = vld [vmem:[#allocation12 + $0x1c0] sm:$0xf] }
 0x193   :  { %v1295_v63 = vrot.slane %v1294_v57, 2  ;;  %v1154_v7 = vadd.f32 %v1153_v4, %v1152_v38  ;;  %v2842_v40 = vpack.c.bf16 %v1340_v39, %v1340_v39  ;;  %v2843_v3 = vpack.c.bf16 %v1341_v32, %v1341_v32  ;;  %v6024_v32 = vld [vmem:[#allocation12 + $0x1cc] sm:$0xf0] }
 0x194   :  { %v2844_v14 = vpack.c.bf16 %v1342_v52, %v1342_v52  ;;  %v1278_v6 = vadd.f32 %v1277_v23, %v1276_v48  ;;  %v1284_v5 = vadd.f32 %v1283_v18, %v1282_v16  ;;  %v1290_v45 = vadd.f32 %v1289_v31, %v1288_v20  ;;  %v1004_v20 = vld [vmem:[#allocation8 + $0x70] sm:$0xff]  ;;  %v2567_v30 = vpop.f32.mrf.mxu0 }
 0x195   :  { %v1296_v11 = vadd.f32 %v1295_v63, %v1294_v57  ;;  %v3066_v4 = vrot.slane %v7027_v59, 7  ;;  %v3080_v39 = vrot.slane %v7029_v12, 7  ;;  %v3094_v57 = vrot.slane %v7031_v41, 7  ;;  %v1098_v12 = vpop.permute.xlu0 %1097  ;;  %v5090_v30 = vld [vmem:[#allocation11 + $0x538] sm:$0xf0] }
 0x196   :  { %v1279_v52 = vrot.slane %v1278_v6, 1  ;;  %v1285_v50 = vrot.slane %v1284_v5, 1  ;;  %v1291_v48 = vrot.slane %v1290_v45, 1  ;;  %v7042_v23 = vmul.f32 %v6900_v58, %v1154_v7 }
 0x197   :  { %v1297_v16 = vrot.slane %v1296_v11, 1  ;;  %v4981_v18 = vor.u32 %v5911_v19, %v4978_v29  ;;  %v5109_v31 = vor.u32 %v5943_v44, %v5106_v56  ;;  %v3034_v63 = vunpack.c.l.b16 %v2842_v40  ;;  %v5907_v29 = vld [vmem:[#allocation11 + $0x42c] sm:$0xf]  ;;  %v4962_v44 = vld [vmem:[#allocation11 + $0x438] sm:$0xf0] }
 0x198   :  { %v3035_v15 = vunpack.c.l.b16 %v2843_v3  ;;  %v3036_v26 = vunpack.c.l.b16 %v2844_v14  ;;  %v1330_v59 = vrot.slane %v6900_v58, 6  ;;  %v5289_v17 = vor.u32 %v5992_v22, %v5288_v28  ;;  %v5939_v56 = vld [vmem:[#allocation11 + $0x52c] sm:$0xf]  ;;  %v6016_v28 = vld [vmem:[#allocation12 + $0x18c] sm:$0xf0] }
 0x199   :  { %2821 = vmatpush.bf16.msra.mxu0 %v4981_v18  ;;  %2834 = vmatpush.bf16.msra.mxu2 %v5109_v31  ;;  %v5417_v9 = vor.u32 %v6024_v32, %v5416_v13  ;;  %v1034_v38 = vunpack.c.l.bf16 %v1004_v20  ;;  %v1035_v1 = vunpack.c.h.bf16 %v1004_v20  ;;  %v1280_v41 = vadd.f32 %v1279_v52, %v1278_v6  ;;  %v6020_v32 = vld [vmem:[#allocation12 + $0x1ac] sm:$0xf0]  ;;  %v7056_v52 = vld [vmem:[#allocation11 + $0x40c] sm:$0xf] }
 0x19a   :  { %v1286_v47 = vadd.f32 %v1285_v50, %v1284_v5  ;;  %v1292_v7 = vadd.f32 %v1291_v48, %v1290_v45  ;;  %v1298_v36 = vadd.f32 %v1297_v16, %v1296_v11  ;;  %3771 = vmatpush.bf16.msrb.mxu1 %v5289_v17  ;;  %v1036_v19 = vunpack.c.l.bf16 %v1005_v55  ;;  %v5400_v5 = vld [vmem:[#allocation12 + $0x1a0] sm:$0xf]  ;;  %v5935_v48 = vld [vmem:[#allocation11 + $0x50c] sm:$0xf]  ;;  %v5074_v16 = vld [vmem:[#allocation11 + $0x518] sm:$0xf0] }
 0x19b   :  { %3784 = vmatpush.bf16.msrb.mxu3 %v5417_v9  ;;  %v1037_v40 = vunpack.c.h.bf16 %v1005_v55  ;;  %v1127_v3 = vmul.f32 %v1098_v12, %v1034_v38  ;;  %v1128_v14 = vmul.f32 %v1098_v12, %v1035_v1  ;;  %v7048_v22 = vsel %vm445_vm3, %v3066_v4, %v3034_v63  ;;  %v5272_v9 = vld [vmem:[#allocation12 + $0xa0] sm:$0xf]  ;;  %v5988_v55 = vld [vmem:[#allocation12 + $0xac] sm:$0xf0]  ;;  %v2580_v1 = vpop.f32.mrf.mxu2 }
 0x19c   :  { %v7051_v6 = vsel %vm445_vm3, %v3080_v39, %v3035_v15  ;;  %v7054_v17 = vsel %vm445_vm3, %v3094_v57, %v3036_v26  ;;  %v1129_v45 = vmul.f32 %v1098_v12, %v1036_v19  ;;  %v7058_v50 = vmul.f32 %v1330_v59, %v1280_v41  ;;  %v4946_v26 = vld [vmem:[#allocation11 + $0x418] sm:$0xf0]  ;;  %v7066_v63 = vld [vmem:[#allocation12 + $0x80] sm:$0xf] }
 0x19d   :  { %7587 = vst [vmem:[#allocation21_spill] sm:$0xff] %v7054_v17  ;;  %v1130_v11 = vmul.f32 %v1098_v12, %v1037_v40  ;;  %v1299_v13 = vrot.slane %v1127_v3, 4  ;;  %v1305_v38 = vrot.slane %v1128_v14, 4  ;;  %v7060_v4 = vmul.f32 %v1330_v59, %v1286_v47  ;;  %v5984_v12 = vld [vmem:[#allocation12 + $0x8c] sm:$0xf0] }
 0x19e   :  { %v7062_v15 = vmul.f32 %v1330_v59, %v1292_v7  ;;  %v7064_v39 = vmul.f32 %v1330_v59, %v1298_v36  ;;  %v1311_v18 = vrot.slane %v1129_v45, 4  ;;  %v5384_v19 = vld [vmem:[#allocation12 + $0x180] sm:$0xf]  ;;  %v4965_v40 = vor.u32 %v5907_v29, %v4962_v44  ;;  %v7070_v36 = vld [vmem:[#allocation12 + $0x2ec] sm:$0xf0] }
 0x19f   :  { %v1300_v20 = vadd.f32 %v1299_v13, %v1127_v3  ;;  %v1306_v57 = vadd.f32 %v1305_v38, %v1128_v14  ;;  %v1317_v31 = vrot.slane %v1130_v11, 4  ;;  %v5093_v41 = vor.u32 %v5939_v56, %v5090_v30  ;;  %v7068_v7 = vld [vmem:[#allocation12 + $0x2e0] sm:$0xf]  ;;  %v6092_v13 = vld [vmem:[#allocation12 + $0x3ec] sm:$0xf0] }
 0x1a0   :  { %7588 = vst [vmem:[#allocation29_spill] sm:$0xff] %v7062_v15  ;;  %v5273_v1 = vor.u32 %v5988_v55, %v5272_v9  ;;  %v5401_v47 = vor.u32 %v6020_v32, %v5400_v5  ;;  %v1312_v42 = vadd.f32 %v1311_v18, %v1129_v45  ;;  %v5688_v14 = vld [vmem:[#allocation12 + $0x3e0] sm:$0xf]  ;;  %2822 = vmatpush.bf16.msra.mxu0 %v4965_v40  ;;  %v7079_v30 = vld [vmem:[#allocation12 + $0x6c] sm:$0xf0]  ;;  %v7085_v5 = vpop.f32.mrf.mxu1  ;;  %v7087_v45 = vpop.f32.mrf.mxu0 }
 0x1a1   :  { %v1301_v59 = vrot.slane %v1300_v20, 2  ;;  %v1307_v37 = vrot.slane %v1306_v57, 2  ;;  %v1318_v3 = vadd.f32 %v1317_v31, %v1130_v11  ;;  %2835 = vmatpush.bf16.msra.mxu2 %v5093_v41  ;;  %v7074_v38 = vadd.f32 %v7013_v51, %v6970_v35  ;;  %v7077_v56 = vld [vmem:[#allocation12 + $0x60] sm:$0xf]  ;;  %v7083_v55 = vld [vmem:[#allocation12 + $0x16c] sm:$0xf0] }
 0x1a2   :  { %v4949_v29 = vor.u32 %v7056_v52, %v4946_v26  ;;  %v5077_v44 = vor.u32 %v5935_v48, %v5074_v16  ;;  %v7081_v9 = vld [vmem:[#allocation12 + $0x160] sm:$0xf]  ;;  %v1313_v18 = vrot.slane %v1312_v42, 2  ;;  %3772 = vmatpush.bf16.msrb.mxu1 %v5273_v1  ;;  %3785 = vmatpush.bf16.msrb.mxu3 %v5401_v47  ;;  %v7091_v52 = vld [vmem:[#allocation12 + $0x2cc] sm:$0xf0]  ;;  %v5257_v48 = vor.u32 %v5984_v12, %v7066_v63 }
 0x1a3   :  { %v1302_v11 = vadd.f32 %v1301_v59, %v1300_v20  ;;  %v1308_v32 = vadd.f32 %v1307_v37, %v1306_v57  ;;  %v1319_v35 = vrot.slane %v1318_v3, 2  ;;  %v7089_v51 = vld [vmem:[#allocation12 + $0x2c0] sm:$0xf]  ;;  %v5385_v16 = vor.u32 %v6016_v28, %v5384_v19  ;;  %v7098_v41 = vld [vmem:[#allocation12 + $0x3cc] sm:$0xf0] }
 0x1a4   :  { %v7093_v26 = vld [vmem:[#allocation12 + $0x3c0] sm:$0xf]  ;;  %v5561_v31 = vor.u32 %v7070_v36, %v7068_v7  ;;  %v5689_v40 = vor.u32 %v6092_v13, %v5688_v14  ;;  %v7102_v20 = vld [vmem:[#allocation12 + $0x4c] sm:$0xf0]  ;;  %v1314_v47 = vadd.f32 %v1313_v18, %v1312_v42  ;;  %v7589_v28 = vpack.c.bf16 %v6996_v27, %v6996_v27  ;;  %2823 = vmatpush.bf16.msra.mxu0 %v4949_v29  ;;  %v7127_v14 = vpop.f32.mrf.mxu3  ;;  %v7129_v13 = vpop.f32.mrf.mxu2 }
 0x1a5   :  { %v7100_v37 = vld [vmem:[#allocation12 + $0x40] sm:$0xf]  ;;  %v1303_v57 = vrot.slane %v1302_v11, 1  ;;  %v1309_v1 = vrot.slane %v1308_v32, 1  ;;  %v1320_v59 = vadd.f32 %v1319_v35, %v1318_v3  ;;  %v2866_v12 = vpack.c.bf16 %v7058_v50, %v7058_v50  ;;  %2836 = vmatpush.bf16.msra.mxu2 %v5077_v44  ;;  %v7121_v36 = vld [vmem:[#allocation12 + $0x2ac] sm:$0xf0] }
 0x1a6   :  { %v7104_v17 = vld [vmem:[#allocation12 + $0x140] sm:$0xf]  ;;  %v7111_v63 = vunpack.c.l.b16 %v7589_v28  ;;  %v2867_v19 = vpack.c.bf16 %v7060_v4, %v7060_v4  ;;  %v7125_v27 = vld [vmem:[#allocation12 + $0x3ac] sm:$0xf0]  ;;  %v1315_v50 = vrot.slane %v1314_v47, 1  ;;  %3773 = vmatpush.bf16.msrb.mxu1 %v5257_v48  ;;  %3786 = vmatpush.bf16.msrb.mxu3 %v5385_v16  ;;  %v5241_v4 = vor.u32 %v7079_v30, %v7077_v56 }
 0x1a7   :  { %v7119_v42 = vld [vmem:[#allocation12 + $0x2a0] sm:$0xf]  ;;  %v1321_v18 = vrot.slane %v1320_v59, 1  ;;  %v5369_v29 = vor.u32 %v7083_v55, %v7081_v9  ;;  %v7137_v35 = vld [vmem:[#allocation12 + $0x2c] sm:$0xf0]  ;;  %v5545_v48 = vor.u32 %v7091_v52, %v7089_v51  ;;  %v5673_v56 = vor.u32 %v7098_v41, %v7093_v26  ;;  %2824 = vmatmul.bf16.vlgmr.msra.gmra.mxu0 %v7556_v54 }
 0x1a8   :  { %v7123_v3 = vld [vmem:[#allocation12 + $0x3a0] sm:$0xf]  ;;  %v7141_v7 = vld [vmem:[#allocation12 + $0x12c] sm:$0xf0]  ;;  %3796 = vmatpush.bf16.msrb.mxu0 %v5561_v31  ;;  %v7154_v55 = vrot.slane %v6900_v58, 2  ;;  %v1304_v16 = vadd.f32 %v1303_v57, %v1302_v11  ;;  %v1310_v15 = vadd.f32 %v1309_v1, %v1308_v32  ;;  %2837 = vmatmul.bf16.vlgmr.msra.gmra.mxu2 %v6495_v43  ;;  %v5225_v31 = vor.u32 %v7102_v20, %v7100_v37  ;;  %v2593_v37 = vpop.f32.mrf.mxu1  ;;  %v2619_v20 = vpop.f32.mrf.mxu0 }
 0x1a9   :  { %v7135_v44 = vld [vmem:[#allocation12 + $0x20] sm:$0xf]  ;;  %3809 = vmatpush.bf16.msrb.mxu2 %v5689_v40  ;;  %v7151_v9 = vld [vmem:[#allocation12 + $0x28c] sm:$0xf0]  ;;  %v7165_v26 = vrot.slane %v6900_v58, 3  ;;  %v7167_v40 = vadd.f32 %v1315_v50, %v1314_v47  ;;  %v5353_v11 = vor.u32 %v7106_v62, %v7104_v17  ;;  %v2566_v54 = vadd.f32 %v7021_v25, %v7074_v38 }
 0x1aa   :  { %v7139_v28 = vld [vmem:[#allocation12 + $0x120] sm:$0xf]  ;;  %v7162_v52 = vld [vmem:[#allocation12 + $0x38c] sm:$0xf0]  ;;  %v7178_v41 = vrot.slane %v6900_v58, 7  ;;  %v7180_v57 = vunpack.c.l.b16 %v2866_v12  ;;  %v7182_v1 = vadd.f32 %v1321_v18, %v1320_v59  ;;  %3774 = vmatpush.bf16.msrb.mxu1 %v5241_v4  ;;  %3787 = vmatpush.bf16.msrb.mxu3 %v5369_v29  ;;  %v5529_v62 = vor.u32 %v7121_v36, %v7119_v42 }
 0x1ab   :  { %v7149_v30 = vld [vmem:[#allocation12 + $0x280] sm:$0xf]  ;;  %v7175_v43 = vld [vmem:[#allocation12 + $0xc] sm:$0xf0]  ;;  %v5657_v25 = vor.u32 %v7125_v27, %v7123_v3  ;;  %v7188_v17 = vunpack.c.l.b16 %v2867_v19  ;;  %v5209_v58 = vor.u32 %v7137_v35, %v7135_v44  ;;  %v5337_v38 = vor.u32 %v7141_v7, %v7139_v28  ;;  %v7217_v18 = vld [vmem:[#allocation12 + $0xe4] sm:$0xf] }
 0x1ac   :  { %v7160_v51 = vld [vmem:[#allocation12 + $0x380] sm:$0xf]  ;;  %3797 = vmatpush.bf16.msrb.mxu0 %v5545_v48  ;;  %v7195_v47 = vadd.f32 %v7033_v46, %v2566_v54  ;;  %v7199_v12 = vld [vmem:[#allocation12 + $0x10c] sm:$0xf0]  ;;  %v5513_v42 = vor.u32 %v7151_v9, %v7149_v30  ;;  %v1348_v46 = vmul.f32 %v7154_v55, %v6964_v21  ;;  %v1352_v4 = vmul.f32 %v7165_v26, %v6860_v8  ;;  %v2606_v28 = vpop.f32.mrf.mxu3  ;;  %v2632_v48 = vpop.f32.mrf.mxu2  ;;  %v7230_v30 = vld [vmem:[#allocation12 + $0x1e4] sm:$0xf] }
 0x1ad   :  { %v7173_v32 = vld [vmem:[#allocation12] sm:$0xf]  ;;  %3810 = vmatpush.bf16.msrb.mxu2 %v5673_v56  ;;  %v5641_v19 = vor.u32 %v7162_v52, %v7160_v51  ;;  %v7209_v27 = vld [vmem:[#allocation12 + $0x26c] sm:$0xf0]  ;;  %v1368_v29 = vmul.f32 %v7178_v41, %v1304_v16  ;;  %v1349_v44 = vmul.f32 %v7154_v55, %v6977_v60  ;;  %v1353_v35 = vmul.f32 %v7165_v26, %v6862_v24  ;;  %v7228_v56 = vld [vmem:[#allocation12 + $0xf0] sm:$0xf0] }
 0x1ae   :  { %v7197_v59 = vld [vmem:[#allocation12 + $0x100] sm:$0xf]  ;;  %v5193_v36 = vor.u32 %v7175_v43, %v7173_v32  ;;  %v7215_v50 = vld [vmem:[#allocation12 + $0x36c] sm:$0xf0]  ;;  %3775 = vmatpush.bf16.msrb.mxu1 %v5225_v31  ;;  %3788 = vmatpush.bf16.msrb.mxu3 %v5353_v11  ;;  %v2850_v8 = vpack.c.bf16 %v1348_v46, %v1348_v46  ;;  %v3076_v9 = vrot.slane %v7180_v57, 2  ;;  %v1369_v16 = vmul.f32 %v7178_v41, %v1310_v15 }
 0x1af   :  { %v7207_v3 = vld [vmem:[#allocation12 + $0x260] sm:$0xf]  ;;  %v5321_v21 = vor.u32 %v7199_v12, %v7197_v59  ;;  %v7234_v60 = vld [vmem:[#allocation12 + $0x1f0] sm:$0xf0]  ;;  %v2854_v24 = vpack.c.bf16 %v1352_v4, %v1352_v4  ;;  %v2870_v51 = vpack.c.bf16 %v1368_v29, %v1368_v29  ;;  %v2851_v31 = vpack.c.bf16 %v1349_v44, %v1349_v44  ;;  %v7241_v12 = vld [vmem:[#allocation12 + $0x24c] sm:$0xf0] }
 0x1b0   :  { %v7213_v7 = vld [vmem:[#allocation12 + $0x360] sm:$0xf]  ;;  %3798 = vmatpush.bf16.msrb.mxu0 %v5529_v62  ;;  %v3090_v52 = vrot.slane %v7188_v17, 2  ;;  %v5497_v54 = vor.u32 %v7209_v27, %v7207_v3  ;;  %v3042_v37 = vunpack.c.l.b16 %v2850_v8  ;;  %v2855_v20 = vpack.c.bf16 %v1353_v35, %v1353_v35  ;;  %v7245_v62 = vld [vmem:[#allocation12 + $0x34c] sm:$0xf0]  ;;  %v7255_v27 = vpop.f32.mrf.mxu1  ;;  %v7257_v35 = vpop.f32.mrf.mxu0 }
 0x1b1   :  { %3811 = vmatpush.bf16.msrb.mxu2 %v5657_v25  ;;  %v7237_v11 = vld [vmem:[#allocation12 + $0x240] sm:$0xf]  ;;  %v2871_v59 = vpack.c.bf16 %v1369_v16, %v1369_v16  ;;  %v5625_v25 = vor.u32 %v7215_v50, %v7213_v7  ;;  %v3046_v46 = vunpack.c.l.b16 %v2854_v24  ;;  %v3062_v4 = vunpack.c.l.b16 %v2870_v51  ;;  %v7249_v44 = vld [vmem:[#allocation12 + $0xc4] sm:$0xf]  ;;  %v7251_v28 = vld [vmem:[#allocation12 + $0xd0] sm:$0xf0] }
 0x1b2   :  { %v7243_v15 = vld [vmem:[#allocation12 + $0x340] sm:$0xf]  ;;  %v3043_v29 = vunpack.c.l.b16 %v2851_v31  ;;  %v7253_v3 = vld [vmem:[#allocation12 + $0x1c4] sm:$0xf]  ;;  %3776 = vmatpush.bf16.msrb.mxu1 %v5209_v58  ;;  %3789 = vmatpush.bf16.msrb.mxu3 %v5337_v38  ;;  %v5309_v48 = vor.u32 %v7217_v18, %v7228_v56  ;;  %v3068_v8 = vrot.slane %v3042_v37, 6  ;;  %v3047_v7 = vunpack.c.l.b16 %v2855_v20 }
 0x1b3   :  { %v3063_v50 = vunpack.c.l.b16 %v2871_v59  ;;  %v7261_v16 = vld [vmem:[#allocation12 + $0x1d0] sm:$0xf0]  ;;  %v7263_v24 = vld [vmem:[#allocation12 + $0x220] sm:$0xf]  ;;  %v5437_v51 = vor.u32 %v7230_v30, %v7234_v60  ;;  %v3070_v31 = vrot.slane %v3046_v46, 5  ;;  %v5481_v58 = vor.u32 %v7241_v12, %v7237_v11 }
 0x1b4   :  { %3799 = vmatpush.bf16.msrb.mxu0 %v5513_v42  ;;  %v3082_v2 = vrot.slane %v3043_v29, 6  ;;  %v7269_v38 = vld [vmem:[#allocation12 + $0x22c] sm:$0xf0]  ;;  %v7271_v18 = vld [vmem:[#allocation12 + $0x320] sm:$0xf]  ;;  %v3069_v56 = vsel %vm447_vm4, %v3068_v8, %v7048_v22  ;;  %v3084_v37 = vrot.slane %v3047_v7, 5  ;;  %v5609_v42 = vor.u32 %v7245_v62, %v7243_v15  ;;  %v7324_v8 = vpop.f32.mrf.mxu3 }
 0x1b5   :  { %3812 = vmatpush.bf16.msrb.mxu2 %v5641_v19  ;;  %v5293_v19 = vor.u32 %v7249_v44, %v7251_v28  ;;  %v7279_v30 = vld [vmem:[#allocation12 + $0x32c] sm:$0xf0]  ;;  %v7281_v60 = vld [vmem:[#allocation12 + $0xa4] sm:$0xf]  ;;  %v3071_v11 = vsel %vm449_vm5, %v3070_v31, %v3069_v56  ;;  %v3078_v20 = vrot.slane %v3062_v4, 1  ;;  %v5421_v22 = vor.u32 %v7253_v3, %v7261_v16 }
 0x1b6   :  { %v3083_v59 = vsel %vm447_vm4, %v3082_v2, %v7051_v6  ;;  %v7288_v12 = vld [vmem:[#allocation12 + $0xb0] sm:$0xf0]  ;;  %v7290_v46 = vld [vmem:[#allocation12 + $0x1a4] sm:$0xf]  ;;  %3777 = vmatpush.bf16.msrb.mxu1 %v5193_v36  ;;  %3790 = vmatpush.bf16.msrb.mxu3 %v5321_v21  ;;  %v7590_v15 = vrot.slane %v6972_v10, 4  ;;  %v3092_v29 = vrot.slane %v3063_v50, 1  ;;  %v2592_v6 = vadd.f32 %v7085_v5, %v7195_v47 }
 0x1b7   :  { %v3085_v4 = vsel %vm449_vm5, %v3084_v37, %v3083_v59  ;;  %v7299_v2 = vld [vmem:[#allocation12 + $0x1b0] sm:$0xf0]  ;;  %v7303_v44 = vld [vmem:[#allocation12 + $0x200] sm:$0xf]  ;;  %v7591_v28 = vpack.c.bf16 %v7025_v49, %v7025_v49  ;;  %v7592_v10 = vrot.slane %v6998_v0, 3  ;;  %v7593_v36 = vrot.slane %v6974_v53, 4 }
 0x1b8   :  { %v3073_v62 = vsel %vm451_vm6, %v7590_v15, %v3071_v11  ;;  %3800 = vmatpush.bf16.msrb.mxu0 %v5497_v54  ;;  %v5465_v5 = vor.u32 %v7269_v38, %v7263_v24  ;;  %v7318_v47 = vld [vmem:[#allocation12 + $0x20c] sm:$0xf0]  ;;  %v7320_v3 = vld [vmem:[#allocation12 + $0x300] sm:$0xf]  ;;  %v7326_v54 = vpop.f32.mrf.mxu2  ;;  %v3116_v0 = vrot.slane %v7111_v63, 3  ;;  %v5593_v50 = vor.u32 %v7279_v30, %v7271_v18 }
 0x1b9   :  { %v7308_v32 = vunpack.c.l.b16 %v7591_v28  ;;  %3813 = vmatpush.bf16.msrb.mxu2 %v5625_v25  ;;  %v3075_v43 = vsel %vm453_vm7, %v7592_v10, %v3073_v62  ;;  %v3087_v21 = vsel %vm451_vm6, %v7593_v36, %v3085_v4  ;;  %v7322_v49 = vld [vmem:[#allocation12 + $0x30c] sm:$0xf0]  ;;  %v7594_v25 = vrot.slane %v7001_v61, 3  ;;  %v7352_v18 = vld [vmem:[#allocation12 + $0x84] sm:$0xf] }
 0x1ba   :  { %3822 = vmatpush.bf16.msra.mxu1 %v5309_v48  ;;  %3835 = vmatpush.bf16.msra.mxu3 %v5437_v51  ;;  %v3077_v53 = vsel %vm455_vm8, %v3076_v9, %v3075_v43  ;;  %v5277_v48 = vor.u32 %v7281_v60, %v7288_v12  ;;  %v5405_v57 = vor.u32 %v7290_v46, %v7299_v2  ;;  %v2645_v9 = vpop.f32.mrf.mxu1  ;;  %v2671_v51 = vpop.f32.mrf.mxu0  ;;  %v6014_v59 = vld [vmem:[#allocation12 + $0x184] sm:$0xf]  ;;  %v5386_v12 = vld [vmem:[#allocation12 + $0x190] sm:$0xf0] }
 0x1bb   :  { %v3089_v7 = vsel %vm453_vm7, %v7594_v25, %v3087_v21  ;;  %v3079_v16 = vsel %vm457_vm9, %v3078_v20, %v3077_v53  ;;  %v5449_v38 = vor.u32 %v7318_v47, %v7303_v44  ;;  %v5577_v17 = vor.u32 %v7322_v49, %v7320_v3  ;;  %v5562_v15 = vld [vmem:[#allocation12 + $0x2f0] sm:$0xf0]  ;;  %v5978_v53 = vld [vmem:[#allocation12 + $0x64] sm:$0xf] }
 0x1bc   :  { %v3091_v24 = vsel %vm455_vm8, %v3090_v52, %v3089_v7  ;;  %v7345_v61 = vpack.c.b16 %v3079_v16, %v3079_v16  ;;  %v7354_v52 = vld [vmem:[#allocation12 + $0x90] sm:$0xf0]  ;;  %v3108_v56 = vrot.slane %v7308_v32, 7  ;;  %3801 = vmatpush.bf16.msrb.mxu0 %v5481_v58  ;;  %v7360_v30 = vadd.f32 %v7127_v14, %v2592_v6  ;;  %v2658_v36 = vpop.f32.mrf.mxu3 }
 0x1bd   :  { %v3093_v31 = vsel %vm457_vm9, %v3092_v29, %v3091_v24  ;;  %3814 = vmatpush.bf16.msrb.mxu2 %v5609_v42  ;;  %v7364_v60 = vadd.f32 %v7129_v13, %v7087_v45  ;;  %v7595_v11 = vpack.c.bf16 %v7042_v23, %v7042_v23  ;;  %v1350_v58 = vmul.f32 %v7154_v55, %v6987_v34  ;;  %v7596_v45 = vld [vmem:[#allocation29_spill] sm:$0xff]  ;;  %v7598_v34 = vld [vmem:[#allocation24_spill] sm:$0xff] }
 0x1be   :  { %v7357_v37 = vpack.c.b16 %v3093_v31, %v3093_v31  ;;  %3778 = vmatmul.bf16.vlgmr.msrb.gmra.mxu1 %v7345_v61  ;;  %3836 = vmatpush.bf16.msra.mxu3 %v5421_v22  ;;  %v1354_v14 = vmul.f32 %v7165_v26, %v6943_v33  ;;  %v1370_v42 = vmul.f32 %v7178_v41, %v7167_v40  ;;  %v6058_v22 = vld [vmem:[#allocation12 + $0x2e4] sm:$0xf]  ;;  %v7599_v33 = vld [vmem:[#allocation25_spill] sm:$0xff] }
 0x1bf   :  { %v3037_v20 = vunpack.c.l.b16 %v7595_v11  ;;  %v7597_v13 = vpack.c.bf16 %v7596_v45, %v7596_v45  ;;  %3823 = vmatpush.bf16.msra.mxu1 %v5293_v19  ;;  %v5261_v23 = vor.u32 %v7352_v18, %v7354_v52  ;;  %v1351_v62 = vmul.f32 %v7154_v55, %v7598_v34  ;;  %v6090_v40 = vld [vmem:[#allocation12 + $0x3e4] sm:$0xf]  ;;  %v5690_v29 = vld [vmem:[#allocation12 + $0x3f0] sm:$0xf0] }
 0x1c0   :  { %3791 = vmatmul.bf16.vlgmr.msrb.gmra.mxu3 %v7357_v37  ;;  %v1355_v4 = vmul.f32 %v7165_v26, %v7599_v33  ;;  %v2852_v2 = vpack.c.bf16 %v1350_v58, %v1350_v58  ;;  %v2856_v6 = vpack.c.bf16 %v1354_v14, %v1354_v14  ;;  %v2872_v44 = vpack.c.bf16 %v1370_v42, %v1370_v42  ;;  %v2684_v26 = vpop.f32.mrf.mxu2  ;;  %v5242_v25 = vld [vmem:[#allocation12 + $0x70] sm:$0xf0]  ;;  %v6086_v52 = vld [vmem:[#allocation12 + $0x3c4] sm:$0xf] }
 0x1c1   :  { %v7379_v46 = vunpack.c.l.b16 %v7597_v13  ;;  %v1371_v28 = vmul.f32 %v7178_v41, %v7182_v1  ;;  %v7600_v19 = vpack.c.bf16 %v7064_v39, %v7064_v39  ;;  %3802 = vmatpush.bf16.msrb.mxu0 %v5465_v5  ;;  %3815 = vmatpush.bf16.msrb.mxu2 %v5593_v50  ;;  %v5389_v10 = vor.u32 %v6014_v59, %v5386_v12  ;;  %v6010_v41 = vld [vmem:[#allocation12 + $0x164] sm:$0xf]  ;;  %v5370_v5 = vld [vmem:[#allocation12 + $0x170] sm:$0xf0] }
 0x1c2   :  { %v2853_v55 = vpack.c.bf16 %v1351_v62, %v1351_v62  ;;  %v2857_v43 = vpack.c.bf16 %v1355_v4, %v1355_v4  ;;  %3837 = vmatpush.bf16.msra.mxu3 %v5405_v57  ;;  %v5565_v21 = vor.u32 %v6058_v22, %v5562_v15  ;;  %v3044_v47 = vunpack.c.l.b16 %v2852_v2  ;;  %v6054_v50 = vld [vmem:[#allocation12 + $0x2c4] sm:$0xf]  ;;  %v5546_v24 = vld [vmem:[#allocation12 + $0x2d0] sm:$0xf0]  ;;  %v7395_v9 = vpop.f32.mrf.mxu1  ;;  %v7602_v62 = vld [vmem:[#allocation26_spill] sm:$0xff] }
 0x1c3   :  { %v7393_v32 = vunpack.c.l.b16 %v7600_v19  ;;  %v3048_v3 = vunpack.c.l.b16 %v2856_v6  ;;  %v2873_v49 = vpack.c.bf16 %v1371_v28, %v1371_v28  ;;  %3824 = vmatpush.bf16.msra.mxu1 %v5277_v48  ;;  %v5693_v1 = vor.u32 %v6090_v40, %v5690_v29  ;;  %v5674_v11 = vld [vmem:[#allocation12 + $0x3d0] sm:$0xf0]  ;;  %v5974_v13 = vld [vmem:[#allocation12 + $0x44] sm:$0xf] }
 0x1c4   :  { %v3064_v39 = vunpack.c.l.b16 %v2872_v44  ;;  %v3045_v7 = vunpack.c.l.b16 %v2853_v55  ;;  %v3049_v16 = vunpack.c.l.b16 %v2857_v43  ;;  %v3109_v51 = vsel %vm445_vm3, %v3108_v56, %v3037_v20  ;;  %v7601_v14 = vld [vmem:[#allocation21_spill] sm:$0xff]  ;;  %v6006_v15 = vld [vmem:[#allocation12 + $0x144] sm:$0xf]  ;;  %v7604_v44 = vld [vmem:[#allocation28_spill] sm:$0xff] }
 0x1c5   :  { %v3096_v57 = vrot.slane %v3044_v47, 6  ;;  %v3098_v31 = vrot.slane %v3048_v3, 5  ;;  %v3065_v18 = vunpack.c.l.b16 %v2873_v49  ;;  %3803 = vmatpush.bf16.msrb.mxu0 %v5449_v38  ;;  %3816 = vmatpush.bf16.msrb.mxu2 %v5577_v17  ;;  %v3104_v48 = vrot.slane %v7379_v46, 2  ;;  %v5354_v34 = vld [vmem:[#allocation12 + $0x150] sm:$0xf0]  ;;  %v7606_v19 = vld [vmem:[#allocation27_spill] sm:$0xff]  ;;  %v2708_v49 = vpop.f32.mrf.mxu3 }
 0x1c6   :  { %v3110_v59 = vrot.slane %v3045_v7, 6  ;;  %v3112_v12 = vrot.slane %v3049_v16, 5  ;;  %v5245_v58 = vor.u32 %v5978_v53, %v5242_v25  ;;  %3838 = vmatpush.bf16.msra.mxu3 %v5389_v10  ;;  %v3118_v45 = vrot.slane %v7393_v32, 2  ;;  %v5226_v2 = vld [vmem:[#allocation12 + $0x50] sm:$0xf0] }
 0x1c7   :  { %v3097_v42 = vsel %vm447_vm4, %v3096_v57, %v7601_v14  ;;  %v5373_v56 = vor.u32 %v6010_v41, %v5370_v5  ;;  %v5549_v20 = vor.u32 %v6054_v50, %v5546_v24  ;;  %3825 = vmatpush.bf16.msra.mxu1 %v5261_v23  ;;  %v3106_v17 = vrot.slane %v3064_v39, 1  ;;  %v6050_v6 = vld [vmem:[#allocation12 + $0x2a4] sm:$0xf]  ;;  %v5530_v55 = vld [vmem:[#allocation12 + $0x2b0] sm:$0xf0] }
 0x1c8   :  { %v3099_v38 = vsel %vm449_vm5, %v3098_v31, %v3097_v42  ;;  %v3111_v46 = vsel %vm447_vm4, %v3110_v59, %v3109_v51  ;;  %v5677_v22 = vor.u32 %v6086_v52, %v5674_v11  ;;  %v7603_v33 = vrot.slane %v7602_v62, 4  ;;  %v6082_v43 = vld [vmem:[#allocation12 + $0x3a4] sm:$0xf]  ;;  %v5658_v36 = vld [vmem:[#allocation12 + $0x3b0] sm:$0xf0] }
 0x1c9   :  { %3848 = vmatpush.bf16.msra.mxu0 %v5565_v21  ;;  %3861 = vmatpush.bf16.msra.mxu2 %v5693_v1  ;;  %v3113_v40 = vsel %vm449_vm5, %v3112_v12, %v3111_v46  ;;  %v3120_v29 = vrot.slane %v3065_v18, 1  ;;  %v7605_v23 = vrot.slane %v7604_v44, 3  ;;  %v7607_v32 = vrot.slane %v7606_v19, 4  ;;  %v6002_v1 = vld [vmem:[#allocation12 + $0x124] sm:$0xf] }
 0x1ca   :  { %v3101_v4 = vsel %vm451_vm6, %v7603_v33, %v3099_v38  ;;  %v2644_v26 = vadd.f32 %v7255_v27, %v7364_v60  ;;  %3839 = vmatpush.bf16.msra.mxu3 %v5373_v56  ;;  %v5357_v3 = vor.u32 %v6006_v15, %v5354_v34  ;;  %v5229_v41 = vor.u32 %v5974_v13, %v5226_v2  ;;  %v5338_v39 = vld [vmem:[#allocation12 + $0x130] sm:$0xf0]  ;;  %v2697_v27 = vpop.f32.mrf.mxu1  ;;  %v5970_v16 = vld [vmem:[#allocation12 + $0x24] sm:$0xf]  ;;  %v6029_v13 = vld [vmem:[#allocation12 + $0x1f4] sm:$0xf0] }
 0x1cb   :  { %v3103_v28 = vsel %vm453_vm7, %v7605_v23, %v3101_v4  ;;  %v3115_v10 = vsel %vm451_vm6, %v7607_v32, %v3113_v40  ;;  %3826 = vmatpush.bf16.msra.mxu1 %v5245_v58  ;;  %v5533_v7 = vor.u32 %v6050_v6, %v5530_v55  ;;  %v5210_v5 = vld [vmem:[#allocation12 + $0x30] sm:$0xf0]  ;;  %v6046_v50 = vld [vmem:[#allocation12 + $0x284] sm:$0xf]  ;;  %v5341_v18 = vor.u32 %v6002_v1, %v5338_v39  ;;  %v5312_v15 = vld [vmem:[#allocation12 + $0xe8] sm:$0xf] }
 0x1cc   :  { %v3105_v21 = vsel %vm455_vm8, %v3104_v48, %v3103_v28  ;;  %v3117_v47 = vsel %vm453_vm7, %v3116_v0, %v3115_v10  ;;  %v5661_v0 = vor.u32 %v6082_v43, %v5658_v36  ;;  %v5514_v51 = vld [vmem:[#allocation12 + $0x290] sm:$0xf0]  ;;  %v6078_v57 = vld [vmem:[#allocation12 + $0x384] sm:$0xf]  ;;  %v2657_v11 = vadd.f32 %v7324_v8, %v2644_v26  ;;  %v2721_v48 = vpop.f32.mrf.mxu0  ;;  %v5997_v34 = vld [vmem:[#allocation12 + $0xf4] sm:$0xf0] }
 0x1cd   :  { %3849 = vmatpush.bf16.msra.mxu0 %v5549_v20  ;;  %v3107_v53 = vsel %vm457_vm9, %v3106_v17, %v3105_v21  ;;  %v3119_v25 = vsel %vm455_vm8, %v3118_v45, %v3117_v47  ;;  %3862 = vmatpush.bf16.msra.mxu2 %v5677_v22  ;;  %v5642_v31 = vld [vmem:[#allocation12 + $0x390] sm:$0xf0]  ;;  %v5966_v52 = vld [vmem:[#allocation12 + $0x4] sm:$0xf]  ;;  %v5213_v59 = vor.u32 %v5970_v16, %v5210_v5  ;;  %v5440_v20 = vld [vmem:[#allocation12 + $0x1e8] sm:$0xf]  ;;  %v2710_v33 = vpop.f32.mrf.mxu3  ;;  %v2734_v21 = vpop.f32.mrf.mxu2 }
 0x1ce   :  { %v7422_v60 = vpack.c.b16 %v3107_v53, %v3107_v53  ;;  %v3121_v63 = vsel %vm457_vm9, %v3120_v29, %v3119_v25  ;;  %3840 = vmatpush.bf16.msra.mxu3 %v5357_v3  ;;  %v5194_v12 = vld [vmem:[#allocation12 + $0x10] sm:$0xf0]  ;;  %v5998_v58 = vld [vmem:[#allocation12 + $0x104] sm:$0xf]  ;;  %v5517_v42 = vor.u32 %v6046_v50, %v5514_v51  ;;  %v5645_v45 = vor.u32 %v6078_v57, %v5642_v31  ;;  %v6025_v44 = vld [vmem:[#allocation12 + $0x1d4] sm:$0xf0] }
 0x1cf   :  { %v7425_v24 = vpack.c.b16 %v3121_v63, %v3121_v63  ;;  %3827 = vmatpush.bf16.msra.mxu1 %v5229_v41  ;;  %v5322_v14 = vld [vmem:[#allocation12 + $0x110] sm:$0xf0]  ;;  %v6042_v56 = vld [vmem:[#allocation12 + $0x264] sm:$0xf]  ;;  %v2670_v38 = vadd.f32 %v7257_v35, %v2657_v11  ;;  %v5197_v4 = vor.u32 %v5966_v52, %v5194_v12  ;;  %v5441_v40 = vor.u32 %v6029_v13, %v5440_v20  ;;  %v5424_v35 = vld [vmem:[#allocation12 + $0x1c8] sm:$0xf] }
 0x1d0   :  { %3804 = vmatmul.bf16.vlgmr.msrb.gmra.mxu0 %v7422_v60  ;;  %v5498_v17 = vld [vmem:[#allocation12 + $0x270] sm:$0xf0]  ;;  %v6074_v46 = vld [vmem:[#allocation12 + $0x364] sm:$0xf]  ;;  %v5325_v22 = vor.u32 %v5998_v58, %v5322_v14  ;;  %v2709_v23 = vadd.f32 %v2708_v49, %v7395_v9  ;;  %v5313_v28 = vor.u32 %v5997_v34, %v5312_v15  ;;  %v5993_v55 = vld [vmem:[#allocation12 + $0xd4] sm:$0xf0]  ;;  %v5425_v26 = vor.u32 %v6025_v44, %v5424_v35 }
 0x1d1   :  { %3817 = vmatmul.bf16.vlgmr.msrb.gmra.mxu2 %v7425_v24  ;;  %3850 = vmatpush.bf16.msra.mxu0 %v5533_v7  ;;  %v5626_v8 = vld [vmem:[#allocation12 + $0x370] sm:$0xf0]  ;;  %v7432_v62 = vadd.f32 %v7326_v54, %v2670_v38  ;;  %v5501_v29 = vor.u32 %v6042_v56, %v5498_v17  ;;  %v6038_v6 = vld [vmem:[#allocation12 + $0x244] sm:$0xf]  ;;  %v5296_v54 = vld [vmem:[#allocation12 + $0xc8] sm:$0xf] }
 0x1d2   :  { %3863 = vmatpush.bf16.msra.mxu2 %v5661_v0  ;;  %3841 = vmatpush.bf16.msra.mxu3 %v5341_v18  ;;  %v5629_v2 = vor.u32 %v6074_v46, %v5626_v8  ;;  %v5482_v19 = vld [vmem:[#allocation12 + $0x250] sm:$0xf0]  ;;  %v6070_v32 = vld [vmem:[#allocation12 + $0x344] sm:$0xf]  ;;  %v2722_v43 = vadd.f32 %v2721_v48, %v2709_v23  ;;  %v5408_v25 = vld [vmem:[#allocation12 + $0x1a8] sm:$0xf]  ;;  %v5297_v49 = vor.u32 %v5993_v55, %v5296_v54 }
 0x1d3   :  { %3828 = vmatpush.bf16.msra.mxu1 %v5213_v59  ;;  %v5610_v10 = vld [vmem:[#allocation12 + $0x350] sm:$0xf0]  ;;  %v5485_v47 = vor.u32 %v6038_v6, %v5482_v19  ;;  %v6034_v53 = vld [vmem:[#allocation12 + $0x224] sm:$0xf]  ;;  %v6021_v9 = vld [vmem:[#allocation12 + $0x1b4] sm:$0xf0] }
 0x1d4   :  { %v2723_v36 = vpop.f32.mrf.mxu0  ;;  %v5613_v3 = vor.u32 %v6070_v32, %v5610_v10  ;;  %v5466_v41 = vld [vmem:[#allocation12 + $0x230] sm:$0xf0]  ;;  %v6066_v1 = vld [vmem:[#allocation12 + $0x324] sm:$0xf]  ;;  %v2735_v27 = vadd.f32 %v2734_v21, %v2722_v43  ;;  %v5280_v63 = vld [vmem:[#allocation12 + $0xa8] sm:$0xf]  ;;  %v5409_v0 = vor.u32 %v6021_v9, %v5408_v25 }
 0x1d5   :  { %3851 = vmatpush.bf16.msra.mxu0 %v5517_v42  ;;  %v5594_v39 = vld [vmem:[#allocation12 + $0x330] sm:$0xf0]  ;;  %v5989_v7 = vld [vmem:[#allocation12 + $0xb4] sm:$0xf0]  ;;  %v6030_v16 = vld [vmem:[#allocation12 + $0x204] sm:$0xf]  ;;  %v5469_v5 = vor.u32 %v6034_v53, %v5466_v41  ;;  %v2736_v56 = vpop.f32.mrf.mxu2 }
 0x1d6   :  { %3864 = vmatpush.bf16.msra.mxu2 %v5645_v45  ;;  %3842 = vmatpush.bf16.msra.mxu3 %v5325_v22  ;;  %v5597_v50 = vor.u32 %v6066_v1, %v5594_v39  ;;  %v5450_v51 = vld [vmem:[#allocation12 + $0x210] sm:$0xf0]  ;;  %v5392_v57 = vld [vmem:[#allocation12 + $0x188] sm:$0xf]  ;;  %v6017_v31 = vld [vmem:[#allocation12 + $0x194] sm:$0xf0]  ;;  %v5281_v18 = vor.u32 %v5989_v7, %v5280_v63 }
 0x1d7   :  { %3829 = vmatpush.bf16.msra.mxu1 %v5197_v4  ;;  %v6062_v52 = vld [vmem:[#allocation12 + $0x304] sm:$0xf]  ;;  %v5578_v11 = vld [vmem:[#allocation12 + $0x310] sm:$0xf0]  ;;  %v5264_v48 = vld [vmem:[#allocation12 + $0x88] sm:$0xf]  ;;  %v5393_v14 = vor.u32 %v6017_v31, %v5392_v57  ;;  %v5453_v13 = vor.u32 %v6030_v16, %v5450_v51 }
 0x1d8   :  { %v5985_v59 = vld [vmem:[#allocation12 + $0x94] sm:$0xf0]  ;;  %v5568_v12 = vld [vmem:[#allocation12 + $0x2e8] sm:$0xf]  ;;  %v5581_v38 = vor.u32 %v6062_v52, %v5578_v11 }
 0x1d9   :  { %3852 = vmatpush.bf16.msra.mxu0 %v5501_v29  ;;  %3843 = vmatmul.bf16.vlgmr.msra.gmra.mxu3 %v7357_v37  ;;  %v6061_v58 = vld [vmem:[#allocation12 + $0x2f4] sm:$0xf0]  ;;  %v5696_v42 = vld [vmem:[#allocation12 + $0x3e8] sm:$0xf]  ;;  %v5265_v46 = vor.u32 %v5985_v59, %v5264_v48 }
 0x1da   :  { %3887 = vmatpush.bf16.msrb.mxu3 %v5441_v40  ;;  %3865 = vmatpush.bf16.msra.mxu2 %v5629_v2  ;;  %v6093_v45 = vld [vmem:[#allocation12 + $0x3f4] sm:$0xf0]  ;;  %v5569_v8 = vor.u32 %v6061_v58, %v5568_v12  ;;  %v5248_v22 = vld [vmem:[#allocation12 + $0x68] sm:$0xf] }
 0x1db   :  { %3874 = vmatpush.bf16.msrb.mxu1 %v5313_v28  ;;  %v5376_v15 = vld [vmem:[#allocation12 + $0x168] sm:$0xf]  ;;  %v6013_v34 = vld [vmem:[#allocation12 + $0x174] sm:$0xf0]  ;;  %v5697_v33 = vor.u32 %v6093_v45, %v5696_v42  ;;  %v5995_v42 = vld [vmem:[#allocation12 + $0xec] sm:$0xf] }
 0x1dc   :  { %3830 = vmatmul.bf16.vlgmr.msra.gmra.mxu1 %v7345_v61  ;;  %v5981_v4 = vld [vmem:[#allocation12 + $0x74] sm:$0xf0]  ;;  %v5552_v40 = vld [vmem:[#allocation12 + $0x2c8] sm:$0xf]  ;;  %v5377_v35 = vor.u32 %v6013_v34, %v5376_v15  ;;  %v5314_v45 = vld [vmem:[#allocation12 + $0xf8] sm:$0xf0] }
 0x1dd   :  { %3853 = vmatpush.bf16.msra.mxu0 %v5485_v47  ;;  %v2747_v20 = vpop.f32.mrf.mxu1  ;;  %v6057_v29 = vld [vmem:[#allocation12 + $0x2d4] sm:$0xf0]  ;;  %v5680_v2 = vld [vmem:[#allocation12 + $0x3c8] sm:$0xf]  ;;  %v5249_v44 = vor.u32 %v5981_v4, %v5248_v22  ;;  %v5317_v22 = vor.u32 %v5995_v42, %v5314_v45  ;;  %v5979_v42 = vld [vmem:[#allocation12 + $0x6c] sm:$0xf] }
 0x1de   :  { %3888 = vmatpush.bf16.msrb.mxu3 %v5425_v26  ;;  %3866 = vmatpush.bf16.msra.mxu2 %v5613_v3  ;;  %v2748_v17 = vadd.f32 %v2747_v20, %v2735_v27  ;;  %v6089_v6 = vld [vmem:[#allocation12 + $0x3d4] sm:$0xf0]  ;;  %v5553_v23 = vor.u32 %v6057_v29, %v5552_v40  ;;  %v5232_v28 = vld [vmem:[#allocation12 + $0x48] sm:$0xf]  ;;  %v5991_v29 = vld [vmem:[#allocation12 + $0xcc] sm:$0xf] }
 0x1df   :  { %3875 = vmatpush.bf16.msrb.mxu1 %v5297_v49  ;;  %v5360_v19 = vld [vmem:[#allocation12 + $0x148] sm:$0xf]  ;;  %v6009_v32 = vld [vmem:[#allocation12 + $0x154] sm:$0xf0]  ;;  %v5681_v10 = vor.u32 %v6089_v6, %v5680_v2  ;;  %v5298_v2 = vld [vmem:[#allocation12 + $0xd8] sm:$0xf0] }
 0x1e0   :  { %v5977_v54 = vld [vmem:[#allocation12 + $0x54] sm:$0xf0]  ;;  %v5536_v55 = vld [vmem:[#allocation12 + $0x2a8] sm:$0xf]  ;;  %v2760_v21 = vpop.f32.mrf.mxu3  ;;  %v5361_v3 = vor.u32 %v6009_v32, %v5360_v19  ;;  %v6023_v6 = vld [vmem:[#allocation12 + $0x1cc] sm:$0xf]  ;;  %v5301_v32 = vor.u32 %v5991_v29, %v5298_v2 }
 0x1e1   :  { %3854 = vmatpush.bf16.msra.mxu0 %v5469_v5  ;;  %v6053_v43 = vld [vmem:[#allocation12 + $0x2b4] sm:$0xf0]  ;;  %v5664_v36 = vld [vmem:[#allocation12 + $0x3a8] sm:$0xf]  ;;  %v7439_v53 = vadd.f32 %v2760_v21, %v2748_v17  ;;  %v5233_v25 = vor.u32 %v5977_v54, %v5232_v28  ;;  %v5282_v21 = vld [vmem:[#allocation12 + $0xb8] sm:$0xf0] }
 0x1e2   :  { %3889 = vmatpush.bf16.msrb.mxu3 %v5409_v0  ;;  %3867 = vmatpush.bf16.msra.mxu2 %v5597_v50  ;;  %v6085_v26 = vld [vmem:[#allocation12 + $0x3b4] sm:$0xf0]  ;;  %v5537_v9 = vor.u32 %v6053_v43, %v5536_v55  ;;  %v5216_v49 = vld [vmem:[#allocation12 + $0x28] sm:$0xf]  ;;  %v5250_v45 = vld [vmem:[#allocation12 + $0x78] sm:$0xf0] }
 0x1e3   :  { %3876 = vmatpush.bf16.msrb.mxu1 %v5281_v18  ;;  %v5344_v41 = vld [vmem:[#allocation12 + $0x128] sm:$0xf]  ;;  %v6005_v1 = vld [vmem:[#allocation12 + $0x134] sm:$0xf0]  ;;  %v5665_v39 = vor.u32 %v6085_v26, %v5664_v36  ;;  %v5987_v26 = vld [vmem:[#allocation12 + $0xac] sm:$0xf] }
 0x1e4   :  { %v5973_v27 = vld [vmem:[#allocation12 + $0x34] sm:$0xf0]  ;;  %v5520_v63 = vld [vmem:[#allocation12 + $0x288] sm:$0xf]  ;;  %v5345_v5 = vor.u32 %v6005_v1, %v5344_v41  ;;  %v5285_v41 = vor.u32 %v5987_v26, %v5282_v21  ;;  %v6003_v26 = vld [vmem:[#allocation12 + $0x12c] sm:$0xf] }
 0x1e5   :  { %3855 = vmatpush.bf16.msra.mxu0 %v5453_v13  ;;  %v2749_v47 = vpop.f32.mrf.mxu1  ;;  %v6049_v7 = vld [vmem:[#allocation12 + $0x294] sm:$0xf0]  ;;  %v5648_v0 = vld [vmem:[#allocation12 + $0x388] sm:$0xf]  ;;  %v5217_v57 = vor.u32 %v5973_v27, %v5216_v49  ;;  %v6027_v13 = vld [vmem:[#allocation12 + $0x1ec] sm:$0xf] }
 0x1e6   :  { %3890 = vmatpush.bf16.msrb.mxu3 %v5393_v14  ;;  %3868 = vmatpush.bf16.msra.mxu2 %v5581_v38  ;;  %v6081_v16 = vld [vmem:[#allocation12 + $0x394] sm:$0xf0]  ;;  %v5200_v50 = vld [vmem:[#allocation12 + $0x8] sm:$0xf]  ;;  %v5521_v31 = vor.u32 %v6049_v7, %v5520_v63  ;;  %v5442_v38 = vld [vmem:[#allocation12 + $0x1f8] sm:$0xf0] }
 0x1e7   :  { %3877 = vmatpush.bf16.msrb.mxu1 %v5265_v46  ;;  %v5969_v18 = vld [vmem:[#allocation12 + $0x14] sm:$0xf0]  ;;  %v5328_v52 = vld [vmem:[#allocation12 + $0x108] sm:$0xf]  ;;  %v5649_v48 = vor.u32 %v6081_v16, %v5648_v0  ;;  %v5445_v4 = vor.u32 %v6027_v13, %v5442_v38  ;;  %v6019_v47 = vld [vmem:[#allocation12 + $0x1ac] sm:$0xf] }
 0x1e8   :  { %3856 = vmatmul.bf16.vlgmr.msra.gmra.mxu0 %v7422_v60  ;;  %v6001_v11 = vld [vmem:[#allocation12 + $0x114] sm:$0xf0]  ;;  %v5504_v59 = vld [vmem:[#allocation12 + $0x268] sm:$0xf]  ;;  %v2762_v56 = vpop.f32.mrf.mxu3  ;;  %v5201_v17 = vor.u32 %v5969_v18, %v5200_v50  ;;  %v5983_v7 = vld [vmem:[#allocation12 + $0x8c] sm:$0xf] }
 0x1e9   :  { %3900 = vmatpush.bf16.msrb.mxu0 %v5569_v8  ;;  %3869 = vmatmul.bf16.vlgmr.msra.gmra.mxu2 %v7425_v24  ;;  %v6045_v12 = vld [vmem:[#allocation12 + $0x274] sm:$0xf0]  ;;  %v5632_v58 = vld [vmem:[#allocation12 + $0x368] sm:$0xf]  ;;  %v5329_v20 = vor.u32 %v6001_v11, %v5328_v52  ;;  %v5266_v0 = vld [vmem:[#allocation12 + $0x98] sm:$0xf0] }
 0x1ea   :  { %3913 = vmatpush.bf16.msrb.mxu2 %v5697_v33  ;;  %3891 = vmatpush.bf16.msrb.mxu3 %v5377_v35  ;;  %v6077_v14 = vld [vmem:[#allocation12 + $0x374] sm:$0xf0]  ;;  %v5505_v46 = vor.u32 %v6045_v12, %v5504_v59  ;;  %v5488_v15 = vld [vmem:[#allocation12 + $0x248] sm:$0xf]  ;;  %v5426_v35 = vld [vmem:[#allocation12 + $0x1d8] sm:$0xf0]  ;;  %v5269_v59 = vor.u32 %v5983_v7, %v5266_v0 }
 0x1eb   :  { %3878 = vmatpush.bf16.msrb.mxu1 %v5249_v44  ;;  %v5633_v8 = vor.u32 %v6077_v14, %v5632_v58  ;;  %v6041_v34 = vld [vmem:[#allocation12 + $0x254] sm:$0xf0]  ;;  %v5616_v33 = vld [vmem:[#allocation12 + $0x348] sm:$0xf]  ;;  %v7443_v44 = vpop.f32.mrf.mxu2  ;;  %v5429_v43 = vor.u32 %v6023_v6, %v5426_v35  ;;  %v6015_v16 = vld [vmem:[#allocation12 + $0x18c] sm:$0xf] }
 0x1ec   :  { %v7441_v51 = vpop.f32.mrf.mxu0  ;;  %v6073_v40 = vld [vmem:[#allocation12 + $0x354] sm:$0xf0]  ;;  %v5489_v28 = vor.u32 %v6041_v34, %v5488_v15  ;;  %v5600_v55 = vld [vmem:[#allocation12 + $0x328] sm:$0xf]  ;;  %v6059_v50 = vld [vmem:[#allocation12 + $0x2ec] sm:$0xf] }
 0x1ed   :  { %3901 = vmatpush.bf16.msrb.mxu0 %v5553_v23  ;;  %v5617_v19 = vor.u32 %v6073_v40, %v5616_v33  ;;  %v6037_v54 = vld [vmem:[#allocation12 + $0x234] sm:$0xf0]  ;;  %v6091_v52 = vld [vmem:[#allocation12 + $0x3ec] sm:$0xf]  ;;  %v5698_v11 = vld [vmem:[#allocation12 + $0x3f8] sm:$0xf0] }
 0x1ee   :  { %3914 = vmatpush.bf16.msrb.mxu2 %v5681_v10  ;;  %3892 = vmatpush.bf16.msrb.mxu3 %v5361_v3  ;;  %v5472_v10 = vld [vmem:[#allocation12 + $0x228] sm:$0xf]  ;;  %v6069_v36 = vld [vmem:[#allocation12 + $0x334] sm:$0xf0]  ;;  %v5410_v3 = vld [vmem:[#allocation12 + $0x1b8] sm:$0xf0] }
 0x1ef   :  { %3879 = vmatpush.bf16.msrb.mxu1 %v5233_v25  ;;  %v5473_v25 = vor.u32 %v6037_v54, %v5472_v10  ;;  %v5601_v49 = vor.u32 %v6069_v36, %v5600_v55  ;;  %v6033_v1 = vld [vmem:[#allocation12 + $0x214] sm:$0xf0]  ;;  %v5413_v63 = vor.u32 %v6019_v47, %v5410_v3  ;;  %v6011_v56 = vld [vmem:[#allocation12 + $0x16c] sm:$0xf]  ;;  %v5378_v13 = vld [vmem:[#allocation12 + $0x178] sm:$0xf0] }
 0x1f0   :  { %v6065_v27 = vld [vmem:[#allocation12 + $0x314] sm:$0xf0]  ;;  %v6055_v38 = vld [vmem:[#allocation12 + $0x2cc] sm:$0xf]  ;;  %v5381_v15 = vor.u32 %v6011_v56, %v5378_v13  ;;  %v5362_v6 = vld [vmem:[#allocation12 + $0x158] sm:$0xf0] }
 0x1f1   :  { %3902 = vmatpush.bf16.msrb.mxu0 %v5537_v9  ;;  %v5456_v9 = vld [vmem:[#allocation12 + $0x208] sm:$0xf]  ;;  %v5975_v33 = vld [vmem:[#allocation12 + $0x4c] sm:$0xf]  ;;  %v5218_v36 = vld [vmem:[#allocation12 + $0x38] sm:$0xf0] }
 0x1f2   :  { %3915 = vmatpush.bf16.msrb.mxu2 %v5665_v39  ;;  %3893 = vmatpush.bf16.msrb.mxu3 %v5345_v5  ;;  %v5584_v39 = vld [vmem:[#allocation12 + $0x308] sm:$0xf]  ;;  %v5394_v5 = vld [vmem:[#allocation12 + $0x198] sm:$0xf0]  ;;  %v5457_v18 = vor.u32 %v6033_v1, %v5456_v9  ;;  %v6007_v40 = vld [vmem:[#allocation12 + $0x14c] sm:$0xf] }
 0x1f3   :  { %3880 = vmatpush.bf16.msrb.mxu1 %v5217_v57  ;;  %v5570_v57 = vld [vmem:[#allocation12 + $0x2f8] sm:$0xf0]  ;;  %v5397_v58 = vor.u32 %v6015_v16, %v5394_v5  ;;  %v6051_v35 = vld [vmem:[#allocation12 + $0x2ac] sm:$0xf]  ;;  %v5365_v54 = vor.u32 %v6007_v40, %v5362_v6 }
 0x1f4   :  { %v2775_v23 = vpop.f32.mrf.mxu0  ;;  %v5573_v14 = vor.u32 %v6059_v50, %v5570_v57  ;;  %v5346_v47 = vld [vmem:[#allocation12 + $0x138] sm:$0xf0]  ;;  %v6047_v3 = vld [vmem:[#allocation12 + $0x28c] sm:$0xf] }
 0x1f5   :  { %3903 = vmatpush.bf16.msrb.mxu0 %v5521_v31  ;;  %v2788_v31 = vpop.f32.mrf.mxu2  ;;  %v5538_v23 = vld [vmem:[#allocation12 + $0x2b8] sm:$0xf0]  ;;  %v6079_v9 = vld [vmem:[#allocation12 + $0x38c] sm:$0xf]  ;;  %v5349_v1 = vor.u32 %v6003_v26, %v5346_v47 }
 0x1f6   :  { %3916 = vmatpush.bf16.msrb.mxu2 %v5649_v48  ;;  %3894 = vmatpush.bf16.msrb.mxu3 %v5329_v20  ;;  %v5585_v48 = vor.u32 %v6065_v27, %v5584_v39  ;;  %v5701_v20 = vor.u32 %v6091_v52, %v5698_v11  ;;  %v5541_v55 = vor.u32 %v6051_v35, %v5538_v23  ;;  %v5967_v27 = vld [vmem:[#allocation12 + $0xc] sm:$0xf]  ;;  %v5330_v5 = vld [vmem:[#allocation12 + $0x118] sm:$0xf0] }
 0x1f7   :  { %3881 = vmatpush.bf16.msrb.mxu1 %v5201_v17  ;;  %v5554_v17 = vld [vmem:[#allocation12 + $0x2d8] sm:$0xf0]  ;;  %v5999_v7 = vld [vmem:[#allocation12 + $0x10c] sm:$0xf]  ;;  %v3979_v35 = vmul.f32 %v7432_v62, %v7432_v62 }
 0x1f8   :  { %v5557_v34 = vor.u32 %v6055_v38, %v5554_v17  ;;  %v6043_v50 = vld [vmem:[#allocation12 + $0x26c] sm:$0xf]  ;;  %v5506_v57 = vld [vmem:[#allocation12 + $0x278] sm:$0xf0]  ;;  %v5333_v11 = vor.u32 %v5999_v7, %v5330_v5 }
 0x1f9   :  { %3904 = vmatpush.bf16.msrb.mxu0 %v5505_v46  ;;  %3895 = vmatmul.bf16.vlgmr.msrb.gmra.mxu3 %v7357_v37  ;;  %v6087_v46 = vld [vmem:[#allocation12 + $0x3cc] sm:$0xf]  ;;  %v5474_v38 = vld [vmem:[#allocation12 + $0x238] sm:$0xf0] }
 0x1fa   :  { %3917 = vmatpush.bf16.msrb.mxu2 %v5633_v8  ;;  %3939 = vmatpush.bf16.msra.mxu3 %v5445_v4  ;;  %v5682_v8 = vld [vmem:[#allocation12 + $0x3d8] sm:$0xf0]  ;;  %v6075_v31 = vld [vmem:[#allocation12 + $0x36c] sm:$0xf] }
 0x1fb   :  { %3926 = vmatpush.bf16.msra.mxu1 %v5317_v22  ;;  %v5253_v22 = vor.u32 %v5979_v42, %v5250_v45  ;;  %v5234_v4 = vld [vmem:[#allocation12 + $0x58] sm:$0xf0]  ;;  %v5685_v2 = vor.u32 %v6087_v46, %v5682_v8  ;;  %v6071_v42 = vld [vmem:[#allocation12 + $0x34c] sm:$0xf] }
 0x1fc   :  { %3882 = vmatmul.bf16.vlgmr.msrb.gmra.mxu1 %v7345_v61  ;;  %v5618_v45 = vld [vmem:[#allocation12 + $0x358] sm:$0xf0]  ;;  %v6035_v13 = vld [vmem:[#allocation12 + $0x22c] sm:$0xf] }
 0x1fd   :  { %3905 = vmatpush.bf16.msrb.mxu0 %v5489_v28  ;;  %v6083_v28 = vld [vmem:[#allocation12 + $0x3ac] sm:$0xf]  ;;  %v5602_v46 = vld [vmem:[#allocation12 + $0x338] sm:$0xf0]  ;;  %v5477_v8 = vor.u32 %v6035_v13, %v5474_v38 }
 0x1fe   :  { %3918 = vmatpush.bf16.msrb.mxu2 %v5617_v19  ;;  %3940 = vmatpush.bf16.msra.mxu3 %v5429_v43  ;;  %v5666_v19 = vld [vmem:[#allocation12 + $0x3b8] sm:$0xf0]  ;;  %v5971_v43 = vld [vmem:[#allocation12 + $0x2c] sm:$0xf] }
 0x1ff   :  { %3927 = vmatpush.bf16.msra.mxu1 %v5301_v32  ;;  %v5237_v32 = vor.u32 %v5975_v33, %v5234_v4  ;;  %v5669_v21 = vor.u32 %v6083_v28, %v5666_v19  ;;  %v6067_v17 = vld [vmem:[#allocation12 + $0x32c] sm:$0xf]  ;;  %v5586_v4 = vld [vmem:[#allocation12 + $0x318] sm:$0xf0]  ;;  %v3978_v28 = vmul.f32 %v7360_v30, %v7360_v30  ;;  %v3980_v19 = vmul.f32 %v7439_v53, %v7439_v53 }
 0x200   :  { %v7447_v12 = vpop.f32.mrf.mxu1  ;;  %v6063_v33 = vld [vmem:[#allocation12 + $0x30c] sm:$0xf] }
 0x201   :  { %3906 = vmatpush.bf16.msrb.mxu0 %v5473_v25  ;;  %v5522_v25 = vld [vmem:[#allocation12 + $0x298] sm:$0xf0] }
 0x202   :  { %3919 = vmatpush.bf16.msrb.mxu2 %v5601_v49  ;;  %3941 = vmatpush.bf16.msra.mxu3 %v5413_v63  ;;  %v5650_v49 = vld [vmem:[#allocation12 + $0x398] sm:$0xf0]  ;;  %v5525_v39 = vor.u32 %v6047_v3, %v5522_v25 }
 0x203   :  { %3928 = vmatpush.bf16.msra.mxu1 %v5285_v41  ;;  %v5221_v41 = vor.u32 %v5971_v43, %v5218_v36  ;;  %v5202_v63 = vld [vmem:[#allocation12 + $0x18] sm:$0xf0]  ;;  %v5653_v16 = vor.u32 %v6079_v9, %v5650_v49 }
 0x204   :  { %v7449_v29 = vpop.f32.mrf.mxu3  ;;  %v5205_v52 = vor.u32 %v5967_v27, %v5202_v63 }
 0x205   :  { %3907 = vmatpush.bf16.msrb.mxu0 %v5457_v18  ;;  %v5634_v18 = vld [vmem:[#allocation12 + $0x378] sm:$0xf0] }
 0x206   :  { %3920 = vmatpush.bf16.msrb.mxu2 %v5585_v48  ;;  %3942 = vmatpush.bf16.msra.mxu3 %v5397_v58  ;;  %v5509_v48 = vor.u32 %v6043_v50, %v5506_v57  ;;  %v6039_v58 = vld [vmem:[#allocation12 + $0x24c] sm:$0xf] }
 0x207   :  { %3929 = vmatpush.bf16.msra.mxu1 %v5269_v59  ;;  %v5637_v59 = vor.u32 %v6075_v31, %v5634_v18 }
 0x208   :  { %3908 = vmatmul.bf16.vlgmr.msrb.gmra.mxu0 %v7422_v60  ;;  %v2801_v10 = vpop.f32.mrf.mxu1 }
 0x209   :  { %3952 = vmatpush.bf16.msra.mxu0 %v5573_v14  ;;  %3921 = vmatmul.bf16.vlgmr.msrb.gmra.mxu2 %v7425_v24  ;;  %v5490_v14 = vld [vmem:[#allocation12 + $0x258] sm:$0xf0] }
 0x20a   :  { %3965 = vmatpush.bf16.msra.mxu2 %v5701_v20  ;;  %3943 = vmatpush.bf16.msra.mxu3 %v5381_v15  ;;  %v5493_v56 = vor.u32 %v6039_v58, %v5490_v14  ;;  %v5621_v20 = vor.u32 %v6071_v42, %v5618_v45  ;;  %v6031_v15 = vld [vmem:[#allocation12 + $0x20c] sm:$0xf] }
 0x20b   :  { %3930 = vmatpush.bf16.msra.mxu1 %v5253_v22  ;;  %v5605_v22 = vor.u32 %v6067_v17, %v5602_v46 }
 0x20c   :  { %v2814_v0 = vpop.f32.mrf.mxu3 }
 0x20d   :  { %3953 = vmatpush.bf16.msra.mxu0 %v5557_v34  ;;  %v5458_v34 = vld [vmem:[#allocation12 + $0x218] sm:$0xf0] }
 0x20e   :  { %3966 = vmatpush.bf16.msra.mxu2 %v5685_v2  ;;  %3944 = vmatpush.bf16.msra.mxu3 %v5365_v54  ;;  %v5461_v40 = vor.u32 %v6031_v15, %v5458_v34  ;;  %v5589_v2 = vor.u32 %v6063_v33, %v5586_v4 }
 0x20f   :  { %3931 = vmatpush.bf16.msra.mxu1 %v5237_v32 }
 0x211   :  { %3954 = vmatpush.bf16.msra.mxu0 %v5541_v55 }
 0x212   :  { %3967 = vmatpush.bf16.msra.mxu2 %v5669_v21  ;;  %3945 = vmatpush.bf16.msra.mxu3 %v5349_v1 }
 0x213   :  { %3932 = vmatpush.bf16.msra.mxu1 %v5221_v41 }
 0x215   :  { %3955 = vmatpush.bf16.msra.mxu0 %v5525_v39 }
 0x216   :  { %3968 = vmatpush.bf16.msra.mxu2 %v5653_v16  ;;  %3946 = vmatpush.bf16.msra.mxu3 %v5333_v11 }
 0x217   :  { %3933 = vmatpush.bf16.msra.mxu1 %v5205_v52 }
 0x219   :  { %3956 = vmatpush.bf16.msra.mxu0 %v5509_v48  ;;  %3947 = vmatmul.bf16.vlgmr.msra.gmra.mxu3 %v7357_v37 }
 0x21a   :  { %3969 = vmatpush.bf16.msra.mxu2 %v5637_v59  ;;  %3934 = vmatmul.bf16.vlgmr.msra.gmra.mxu1 %v7345_v61  ;;  %v2787_v61 = vadd.f32 %v7443_v44, %v7441_v51 }
 0x21c   :  { %v2800_v6 = vadd.f32 %v7447_v12, %v2787_v61 }
 0x21d   :  { %3957 = vmatpush.bf16.msra.mxu0 %v5493_v56 }
 0x21e   :  { %3970 = vmatpush.bf16.msra.mxu2 %v5621_v20  ;;  %v2813_v23 = vadd.f32 %v7449_v29, %v2800_v6 }
 0x221   :  { %3958 = vmatpush.bf16.msra.mxu0 %v5477_v8 }
 0x222   :  { %3971 = vmatpush.bf16.msra.mxu2 %v5605_v22 }
 0x224   :  { %v2825_v37 = vpop.f32.mrf.mxu0 }
 0x225   :  { %3959 = vmatpush.bf16.msra.mxu0 %v5461_v40 }
 0x226   :  { %3972 = vmatpush.bf16.msra.mxu2 %v5589_v2 }
 0x228   :  { %3960 = vmatmul.bf16.vlgmr.msra.gmra.mxu0 %v7422_v60  ;;  %v2826_v60 = vadd.f32 %v2825_v37, %v2813_v23 }
 0x229   :  { %3973 = vmatmul.bf16.vlgmr.msra.gmra.mxu2 %v7425_v24  ;;  %v3982_v24 = vadd.f32 %v3979_v35, %v3978_v28 }
 0x22b   :  { %v2838_v32 = vpop.f32.mrf.mxu2  ;;  %v3983_v12 = vadd.f32 %v3982_v24, %v3980_v19 }
 0x22c   :  { %v7467_v10 = vadd.f32 %v2838_v32, %v2826_v60  ;;  %v2827_v51 = vpop.f32.mrf.mxu0 }
 0x22e   :  { %v3981_v44 = vmul.f32 %v7467_v10, %v7467_v10 }
 0x230   :  { %v3984_v54 = vadd.f32 %v3983_v12, %v3981_v44 }
 0x232   :  { %3985 = vadd.xlane.f32.xlu0 %v3984_v54 }
 0x233   :  { %v2840_v55 = vpop.f32.mrf.mxu2 }
 0x23b   :  { %v3779_v29 = vpop.f32.mrf.mxu1 }
 0x243   :  { %v3792_v43 = vpop.f32.mrf.mxu3  ;;  %v3781_v26 = vpop.f32.mrf.mxu1 }
 0x244   :  { %v3793_v36 = vadd.f32 %v3792_v43, %v3779_v29 }
 0x24b   :  { %v3794_v21 = vpop.f32.mrf.mxu3 }
 0x24d   :  { %v3805_v47 = vpop.f32.mrf.mxu0 }
 0x24e   :  { %v3806_v3 = vadd.f32 %v3805_v47, %v3793_v36 }
 0x254   :  { %v3818_v25 = vpop.f32.mrf.mxu2 }
 0x255   :  { %v7471_v9 = vadd.f32 %v3818_v25, %v3806_v3  ;;  %v3807_v49 = vpop.f32.mrf.mxu0 }
 0x257   :  { %v4001_v34 = vmul.f32 %v7471_v9, %v7471_v9 }
 0x259   :  { %v3831_v41 = vpop.f32.mrf.mxu1 }
 0x25c   :  { %v3820_v1 = vpop.f32.mrf.mxu2  ;;  %v3844_v39 = vpop.f32.mrf.mxu3 }
 0x25d   :  { %v3845_v27 = vadd.f32 %v3844_v39, %v3831_v41 }
 0x261   :  { %v3833_v63 = vpop.f32.mrf.mxu1 }
 0x264   :  { %v3846_v0 = vpop.f32.mrf.mxu3 }
 0x265   :  { %v3857_v7 = vpop.f32.mrf.mxu0 }
 0x266   :  { %v3858_v56 = vadd.f32 %v3857_v7, %v3845_v27 }
 0x26c   :  { %v3870_v16 = vpop.f32.mrf.mxu2 }
 0x26d   :  { %v3859_v5 = vpop.f32.mrf.mxu0  ;;  %v3871_v13 = vadd.f32 %v3870_v16, %v3858_v56 }
 0x26f   :  { %v4002_v22 = vmul.f32 %v3871_v13, %v3871_v13 }
 0x271   :  { %v4005_v2 = vadd.f32 %v4002_v22, %v4001_v34 }
 0x274   :  { %v3872_v50 = vpop.f32.mrf.mxu2 }
 0x279   :  { %v3883_v57 = vpop.f32.mrf.mxu1 }
 0x27c   :  { %v3896_v31 = vpop.f32.mrf.mxu3 }
 0x27d   :  { %v3897_v20 = vadd.f32 %v3896_v31, %v3883_v57 }
 0x281   :  { %v3885_v18 = vpop.f32.mrf.mxu1 }
 0x284   :  { %v3898_v11 = vpop.f32.mrf.mxu3 }
 0x285   :  { %v3909_v52 = vpop.f32.mrf.mxu0 }
 0x286   :  { %v3910_v38 = vadd.f32 %v3909_v52, %v3897_v20 }
 0x28c   :  { %v3922_v48 = vpop.f32.mrf.mxu2 }
 0x28d   :  { %v3911_v59 = vpop.f32.mrf.mxu0  ;;  %v3923_v46 = vadd.f32 %v3922_v48, %v3910_v38 }
 0x28f   :  { %v4003_v33 = vmul.f32 %v3923_v46, %v3923_v46 }
 0x291   :  { %v4006_v35 = vadd.f32 %v4005_v2, %v4003_v33 }
 0x294   :  { %v3924_v58 = vpop.f32.mrf.mxu2 }
 0x297   :  { %v3935_v14 = vpop.f32.mrf.mxu1 }
 0x29c   :  { %v3948_v42 = vpop.f32.mrf.mxu3 }
 0x29d   :  { %v3949_v15 = vadd.f32 %v3948_v42, %v3935_v14 }
 0x29f   :  { %v3937_v45 = vpop.f32.mrf.mxu1 }
 0x2a4   :  { %v3950_v8 = vpop.f32.mrf.mxu3 }
 0x2a5   :  { %v3961_v17 = vpop.f32.mrf.mxu0  ;;  %v3986_v19 = vpop.xlane.xlu0 %3985 }
 0x2a6   :  { %v3962_v4 = vadd.f32 %v3961_v17, %v3949_v15  ;;  %6134 = vrsqrt.f32 %v3986_v19  ;;  %vm3993_vm14 = vweird.f32 %v3986_v19 }
 0x2ac   :  { %v3974_v40 = vpop.f32.mrf.mxu2  ;;  %v6135_v60 = vpop.eup %6134 }
 0x2ad   :  { %v3975_v61 = vadd.f32 %v3974_v40, %v3962_v4  ;;  %v3963_v37 = vpop.f32.mrf.mxu0  ;;  %v3988_v32 = vmul.f32 %v6135_v60, %v3986_v19  ;;  %vm3994_vm12 = vweird.f32 %v6135_v60 }
 0x2ae   :  { %vm3995_vm15 = vmor %vm3993_vm14, %vm3994_vm12 }
 0x2af   :  { %v4004_v6 = vmul.f32 %v3975_v61, %v3975_v61  ;;  %v3989_v51 = vmul.f32 %v6135_v60, %v3988_v32 }
 0x2b1   :  { %v4007_v23 = vadd.f32 %v4006_v35, %v4004_v6  ;;  %v3990_v44 = vmul.f32 0.5, %v3989_v51 }
 0x2b3   :  { %4008 = vadd.xlane.f32.xlu2 %v4007_v23  ;;  %v3991_v55 = vsub.f32 1.5, %v3990_v44 }
 0x2b4   :  { %v3976_v28 = vpop.f32.mrf.mxu2 }
 0x2b5   :  { %v3992_v36 = vmul.f32 %v6135_v60, %v3991_v55 }
 0x2b7   :  { %v3996_v47 = vsel %vm3995_vm15, %v6135_v60, %v3992_v36 }
 0x2b8   :  { %v3997_v39 = vmul.f32 %v3996_v47, %v7360_v30  ;;  %v3998_v27 = vmul.f32 %v3996_v47, %v7432_v62  ;;  %v3999_v63 = vmul.f32 %v3996_v47, %v7439_v53  ;;  %v4000_v7 = vmul.f32 %v3996_v47, %v7467_v10 }
 0x2b9   :  { %v4105_v30 = vstv %s7493_s6 }
 0x326   :  { %v4009_v24 = vpop.xlane.xlu2 %4008 }
 0x327   :  { %6136 = vrsqrt.f32 %v4009_v24  ;;  %vm4016_vm0 = vweird.f32 %v4009_v24 }
 0x32d   :  { %v6137_v12 = vpop.eup %6136 }
 0x32e   :  { %v4011_v54 = vmul.f32 %v6137_v12, %v4009_v24  ;;  %vm4017_vm13 = vweird.f32 %v6137_v12 }
 0x32f   :  { %vm4018_vm1 = vmor %vm4016_vm0, %vm4017_vm13 }
 0x330   :  { %v4012_v29 = vmul.f32 %v6137_v12, %v4011_v54 }
 0x332   :  { %v4013_v43 = vmul.f32 0.5, %v4012_v29 }
 0x334   :  { %v4014_v26 = vsub.f32 1.5, %v4013_v43 }
 0x336   :  { %v4015_v21 = vmul.f32 %v6137_v12, %v4014_v26 }
 0x338   :  { %v4019_v3 = vsel %vm4018_vm1, %v6137_v12, %v4015_v21 }
 0x339   :  { %v4020_v25 = vmul.f32 %v4019_v3, %v7471_v9  ;;  %v4021_v49 = vmul.f32 %v4019_v3, %v3871_v13  ;;  %v4022_v41 = vmul.f32 %v4019_v3, %v3923_v46  ;;  %v4023_v1 = vmul.f32 %v4019_v3, %v3975_v61 }
 0x33b   :  { %4039 = vmatpush.xpose.msrb.mxu1 %v4020_v25  ;;  %4059 = vmatpush.xpose.msrb.mxu3 %v4021_v49 }
 0x33e   :  { %4040 = vmatmul.f32.vlgmr.msrb.gmra.mxu1 %v3997_v39  ;;  %4060 = vmatmul.f32.vlgmr.msrb.gmra.mxu3 %v3998_v27 }
 0x33f   :  { %4079 = vmatpush.xpose.msra.mxu1 %v4022_v41  ;;  %4099 = vmatpush.xpose.msra.mxu3 %v4023_v1 }
 0x346   :  { %4080 = vmatmul.f32.vlgmr.msra.gmra.mxu1 %v3999_v63  ;;  %4100 = vmatmul.f32.vlgmr.msra.gmra.mxu3 %v4000_v7 }
 0x3bb   :  { %v4041_v9 = vpop.f32.mrf.mxu1 }
 0x3c1   :  { %v4061_v0 = vpop.f32.mrf.mxu3 }
 0x3c2   :  { %v4062_v16 = vadd.f32 %v4061_v0, %v4041_v9 }
 0x3c3   :  { %v4081_v5 = vpop.f32.mrf.mxu1 }
 0x3c4   :  { %v4082_v50 = vadd.f32 %v4081_v5, %v4062_v16 }
 0x3c9   :  { %v4101_v57 = vpop.f32.mrf.mxu3 }
 0x3ca   :  { %v4102_v62 = vadd.f32 %v4101_v57, %v4082_v50 }
 0x3cc   :  { %v4106_v53 = vmul.f32 %v4105_v30, %v4102_v62 }
 0x3ce   :  { %4107 = vst.msk [vmem:[#allocation14] sm:$0xff] %vm1038_vm11, %v4106_v53 }
 0x3cf   :  { %4118 = dma.vmem_to_hbm [thread:$0]  %s4114_s11, 128, %s4116_s14, [#allocation5]  }
 0x3d0   :  { %6314 = dma.done.wait [#allocation5], 128  }
 0x3d1   :  { %6315 = vsyncadd [#allocation5], 4294967168 }
 0x3d2   :  { %4123 = vsyncpa [#allocation4], 1 }
 0x3d3   :  { %4124 = vsyncpa [#allocation7], 1 }
 0x3d4   :  { %4125 = vsyncpa [#allocation10], 1 }
 0x3d5   :  { %4126 = vsyncpa [#allocation13], 1 }
 0x3d6   :  { %4127 = vsyncpa [#allocation5], 1 }

</bundles_post_ra>
